<compile_context>
chip_gen: v5e
topology: v5e:2x2
jax: 0.10.0
libtpu: 0.0.40
codegen_flags: <defaults>
</compile_context>

<pallas_src>
import jax
import jax.numpy as jnp
from jax import lax
from jax.experimental import pallas as pl
from jax.experimental.pallas import tpu as pltpu

# ----------------------- static problem geometry (compile-time) -----------------------
LANE = 128                     # lane width; padded feature width of every hidden state
F_IN = 56                      # real input feature count (padded to LANE)
NUM_CLASSES = 2
BIAS_LANE = LANE - 1           # constant-1 lane used to fold the bias into the matmul
LAYER_DIMS = ((F_IN, 16), (16, 32), (32, 64), (64, NUM_CLASSES))
NUM_LAYERS = len(LAYER_DIMS)
SLAB_ROWS = NUM_LAYERS * 2 * LANE   # 4 layers x (Wl block + Wr block) x 128 rows = 1024

NPG = 16                       # nodes per graph
GPB = 16                       # graphs per node block
NB = NPG * GPB                 # node rows per grid step (256 -> >=256 MXU rows)
NBLK = 2                       # grid size (number of node blocks)
NUM_GRAPHS = NBLK * GPB        # 32 graphs per kernel call
NUM_NODES = NBLK * NB          # 512 nodes per kernel call


def gcn_kernel(x_ref, a_ref, p_ref, w_ref, out_ref):
    """One node block (256 nodes / 16 graphs) of the full forward pass.

    Per layer:
        agg = A @ h                               (mean neighbour aggregation)
        h   = relu(agg @ Wl_blk + h @ Wr_blk)     (bias + const-1 passthrough folded in Wr_blk)
    Then: pooled = P @ h ; softmax over the 2 real class lanes.
    All operands are full 128-lane tiles; weight slices are static [128,128] blocks.
    """
    a = a_ref[...]                                   # [NB, NB]  f32 row-normalized adjacency block
    h = x_ref[...]                                   # [NB, 128] f32 (features + const-1 at lane 127)

    for layer in range(NUM_LAYERS):
        base = layer * 2 * LANE
        wl_blk = w_ref[base:base + LANE, :]                  # [128, 128] neighbour weights (Wl^T)
        wr_blk = w_ref[base + LANE:base + 2 * LANE, :]       # [128, 128] self weights + bias row + 1-passthrough
        agg = jnp.dot(a, h, preferred_element_type=jnp.float32)          # [NB, 128]
        out = (jnp.dot(agg, wl_blk, preferred_element_type=jnp.float32)
               + jnp.dot(h, wr_blk, preferred_element_type=jnp.float32))  # [NB, 128]
        h = jnp.maximum(out, 0.0)                                         # ReLU; lane 127 stays 1
        # TODO(synk): F.dropout(training=True) (random masking) not implemented — eval mode only.

    # global_mean_pool over this block's graphs.
    pooled = jnp.dot(p_ref[...], h, preferred_element_type=jnp.float32)   # [GPB, 128]

    # softmax over the 2 real class lanes (pad lanes masked to -inf-ish), exact divide.
    lane_idx = lax.broadcasted_iota(jnp.int32, pooled.shape, 1)
    logits = jnp.where(lane_idx < NUM_CLASSES, pooled, jnp.float32(-1e30))
    m = jnp.max(logits, axis=1, keepdims=True)
    e = jnp.exp(logits - m)
    out_ref[...] = e / jnp.sum(e, axis=1, keepdims=True)                   # [GPB, 128] lane-dense


@jax.jit
def gcn_forward(x_pad, a_blocks, pool_blocks, slab):
    """Hot path: one pallas_call, grid over node blocks (parallel -> both v7x TCs)."""
    out_padded = pl.pallas_call(
        gcn_kernel,
        out_shape=jax.ShapeDtypeStruct((NUM_GRAPHS, LANE), jnp.float32),
        grid=(NBLK,),
        in_specs=[
            pl.BlockSpec((NB, LANE), lambda g: (g, 0)),          # node features, per block
            pl.BlockSpec((NB, NB), lambda g: (g, 0)),            # diagonal adjacency block
            pl.BlockSpec((GPB, NB), lambda g: (g, 0)),           # pool rows for this block's graphs
            pl.BlockSpec((SLAB_ROWS, LANE), lambda g: (0, 0)),   # weight slab, resident across grid
        ],
        out_specs=pl.BlockSpec((GPB, LANE), lambda g: (g, 0)),
        compiler_params=pltpu.CompilerParams(dimension_semantics=("parallel",)),
    )(x_pad, a_blocks, pool_blocks, slab)
    return out_padded[:, :NUM_CLASSES]                            # slice real classes in wrapper


# ------------------------------- one-time (hoisted) setup -------------------------------
def build_graph_operators(edge_index, batch, num_nodes, num_graphs):
    """Dense operators (f32), built once for the static topology.

    A[i, j] = 1/deg_in(i) for each edge j->i (PyG scatter-mean; duplicates counted;
    isolated nodes aggregate to zero).  P[g, i] = 1/|graph g| if batch[i] == g.
    """
    src, dst = edge_index[0], edge_index[1]
    adj = jnp.zeros((num_nodes, num_nodes), jnp.float32).at[dst, src].add(1.0)
    deg = jnp.sum(adj, axis=1, keepdims=True)
    adj = adj / jnp.maximum(deg, 1.0)

    pool = jnp.zeros((num_graphs, num_nodes), jnp.float32)
    pool = pool.at[batch, jnp.arange(num_nodes)].set(1.0)
    cnt = jnp.sum(pool, axis=1, keepdims=True)
    pool = pool / jnp.maximum(cnt, 1.0)
    return adj, pool


def blockify_operators(adj_full, pool_full):
    """Extract the block-diagonal adjacency blocks / per-block pool columns (graphs never
    cross a node-block boundary, so only the diagonal blocks are nonzero)."""
    a_blocks = jnp.concatenate(
        [adj_full[g * NB:(g + 1) * NB, g * NB:(g + 1) * NB] for g in range(NBLK)], axis=0)
    p_blocks = jnp.concatenate(
        [pool_full[g * GPB:(g + 1) * GPB, g * NB:(g + 1) * NB] for g in range(NBLK)], axis=0)
    return a_blocks, p_blocks                                     # [NBLK*NB, NB], [NUM_GRAPHS, NB]


def pad_features(x):
    """Pad features to 128 lanes and install the constant-1 bias lane."""
    xp = jnp.zeros((x.shape[0], LANE), jnp.float32)
    xp = xp.at[:, :F_IN].set(x)
    return xp.at[:, BIAS_LANE].set(1.0)


def pack_params(params):
    """Pack weights into one f32 [1024, 128] slab of full [128,128] blocks (done once).

    Layer l rows [l*256, l*256+128): Wl^T (neighbour term), rows 0..din-1, cols 0..dout-1.
    Layer l rows [l*256+128, l*256+256): Wr^T (self term) + bias at row 127 + a 1 at
    [127, 127] so the constant-1 lane of h propagates through every layer.
    """
    slab = jnp.zeros((SLAB_ROWS, LANE), jnp.float32)
    for layer, ((wl, wr, b), (din, dout)) in enumerate(zip(params, LAYER_DIMS)):
        base = layer * 2 * LANE
        slab = slab.at[base:base + din, :dout].set(wl.T)                       # Wl block
        slab = slab.at[base + LANE:base + LANE + din, :dout].set(wr.T)         # Wr block
        slab = slab.at[base + LANE + BIAS_LANE, :dout].set(b)                  # bias row
        slab = slab.at[base + LANE + BIAS_LANE, BIAS_LANE].set(1.0)            # const-1 passthrough
    return slab


def init_params(key):
    """Deterministic SAGEConv params: (W_lin_l [out,in], W_lin_r [out,in], bias [out])."""
    params = []
    for (din, dout) in LAYER_DIMS:
        key, k1, k2, k3 = jax.random.split(key, 4)
        scale = 1.0 / jnp.sqrt(jnp.float32(din))
        wl = jax.random.uniform(k1, (dout, din), jnp.float32, -scale, scale)
        wr = jax.random.uniform(k2, (dout, din), jnp.float32, -scale, scale)
        b = jax.random.uniform(k3, (dout,), jnp.float32, -scale, scale)
        params.append((wl, wr, b))
    return params


def reference_forward(x, adj, pool, params):
    """Pure-JAX f32 reference of the same forward pass (sanity check)."""
    h = x
    for wl, wr, b in params:
        h = jnp.maximum((adj @ h) @ wl.T + h @ wr.T + b, 0.0)
    return jax.nn.softmax(pool @ h, axis=1)


if __name__ == "__main__":
    key = jax.random.PRNGKey(0)
    kx, ke, kp = jax.random.split(key, 3)

    # 32 graphs x 16 nodes, 40 random intra-graph edges each. Graph i occupies global
    # nodes [i*NPG, (i+1)*NPG); GPB consecutive graphs share one 256-node block.
    E_PER_GRAPH = 40
    x = jax.random.normal(kx, (NUM_NODES, F_IN), jnp.float32)
    local_edges = jax.random.randint(ke, (2, NUM_GRAPHS, E_PER_GRAPH), 0, NPG, jnp.int32)
    graph_base = (jnp.arange(NUM_GRAPHS, dtype=jnp.int32) * NPG)[None, :, None]
    edge_index = (local_edges + graph_base).reshape(2, -1)
    batch = jnp.repeat(jnp.arange(NUM_GRAPHS, dtype=jnp.int32), NPG)

    params = init_params(kp)

    # One-time setup hoisted out of the hot path (static topology + static weights).
    adj_full, pool_full = build_graph_operators(edge_index, batch, NUM_NODES, NUM_GRAPHS)
    a_blocks, pool_blocks = blockify_operators(adj_full, pool_full)
    slab = pack_params(params)
    x_pad = pad_features(x)

    out = gcn_forward(x_pad, a_blocks, pool_blocks, slab)
    out = jax.block_until_ready(out)

    assert out.shape == (NUM_GRAPHS, NUM_CLASSES)
    assert bool(jnp.all(jnp.isfinite(out)))
    # exact-divide f32 softmax: rows sum to 1 tightly
    assert bool(jnp.allclose(jnp.sum(out, axis=1), 1.0, atol=1e-3))
    # matches the pure-JAX f32 reference
    ref = reference_forward(x, adj_full, pool_full, params)
    assert bool(jnp.allclose(out, ref, atol=1e-2))
    print("KERNEL_OK")
</pallas_src>

<mosaic_0001>
module attributes {stable_mosaic.version = 11 : i64} {
  func.func @gcn_kernel(%arg0: i32, %arg1: memref<256x128xf32, #tpu.memory_space<vmem>>, %arg2: memref<256x256xf32, #tpu.memory_space<vmem>>, %arg3: memref<16x256xf32, #tpu.memory_space<vmem>>, %arg4: memref<1024x128xf32, #tpu.memory_space<vmem>>, %arg5: memref<16x128xf32, #tpu.memory_space<vmem>>) attributes {dimension_semantics = [#tpu.dimension_semantics<parallel>], iteration_bounds = array<i64: 2>, scalar_prefetch = 0 : i64, scratch_operands = 0 : i64, tpu.core_type = #tpu.core_type<tc>, window_params = [{transform_indices = @transform_0, window_bounds = array<i64: 256, 128>}, {transform_indices = @transform_1, window_bounds = array<i64: 256, 256>}, {transform_indices = @transform_2, window_bounds = array<i64: 16, 256>}, {pipeline_mode = #tpu.pipeline_mode<synchronous>, transform_indices = @transform_3, window_bounds = array<i64: 1024, 128>}, {transform_indices = @transform_4, window_bounds = array<i64: 16, 128>}]} {
    %c0 = arith.constant 0 : index
    %c0_0 = arith.constant 0 : index
    %0 = vector.load %arg2[%c0, %c0_0] : memref<256x256xf32, #tpu.memory_space<vmem>>, vector<256x256xf32>
    %c0_1 = arith.constant 0 : index
    %c0_2 = arith.constant 0 : index
    %1 = vector.load %arg1[%c0_1, %c0_2] : memref<256x128xf32, #tpu.memory_space<vmem>>, vector<256x128xf32>
    %c0_3 = arith.constant 0 : index
    %c0_4 = arith.constant 0 : index
    %2 = vector.load %arg4[%c0_3, %c0_4] : memref<1024x128xf32, #tpu.memory_space<vmem>>, vector<128x128xf32>
    %c128 = arith.constant 128 : index
    %c0_5 = arith.constant 0 : index
    %3 = vector.load %arg4[%c128, %c0_5] : memref<1024x128xf32, #tpu.memory_space<vmem>>, vector<128x128xf32>
    %cst = arith.constant dense<0.000000e+00> : vector<256x128xf32>
    %4 = tpu.matmul %0, %1, %cst {dimension_numbers = #tpu.dot_dimension_numbers<[1], [0], [0], [1], [0, 0, 1, 1], [], []>} : vector<256x256xf32>, vector<256x128xf32>, vector<256x128xf32> -> vector<256x128xf32>
    %cst_6 = arith.constant dense<0.000000e+00> : vector<256x128xf32>
    %5 = tpu.matmul %4, %2, %cst_6 {dimension_numbers = #tpu.dot_dimension_numbers<[1], [0], [0], [1], [0, 0, 1, 1], [], []>} : vector<256x128xf32>, vector<128x128xf32>, vector<256x128xf32> -> vector<256x128xf32>
    %cst_7 = arith.constant dense<0.000000e+00> : vector<256x128xf32>
    %6 = tpu.matmul %1, %3, %cst_7 {dimension_numbers = #tpu.dot_dimension_numbers<[1], [0], [0], [1], [0, 0, 1, 1], [], []>} : vector<256x128xf32>, vector<128x128xf32>, vector<256x128xf32> -> vector<256x128xf32>
    %7 = arith.addf %5, %6 : vector<256x128xf32>
    %cst_8 = arith.constant 0.000000e+00 : f32
    %8 = vector.broadcast %cst_8 : f32 to vector<256x128xf32>
    %9 = arith.maximumf %7, %8 : vector<256x128xf32>
    %c256 = arith.constant 256 : index
    %c0_9 = arith.constant 0 : index
    %10 = vector.load %arg4[%c256, %c0_9] : memref<1024x128xf32, #tpu.memory_space<vmem>>, vector<128x128xf32>
    %c384 = arith.constant 384 : index
    %c0_10 = arith.constant 0 : index
    %11 = vector.load %arg4[%c384, %c0_10] : memref<1024x128xf32, #tpu.memory_space<vmem>>, vector<128x128xf32>
    %cst_11 = arith.constant dense<0.000000e+00> : vector<256x128xf32>
    %12 = tpu.matmul %0, %9, %cst_11 {dimension_numbers = #tpu.dot_dimension_numbers<[1], [0], [0], [1], [0, 0, 1, 1], [], []>} : vector<256x256xf32>, vector<256x128xf32>, vector<256x128xf32> -> vector<256x128xf32>
    %cst_12 = arith.constant dense<0.000000e+00> : vector<256x128xf32>
    %13 = tpu.matmul %12, %10, %cst_12 {dimension_numbers = #tpu.dot_dimension_numbers<[1], [0], [0], [1], [0, 0, 1, 1], [], []>} : vector<256x128xf32>, vector<128x128xf32>, vector<256x128xf32> -> vector<256x128xf32>
    %cst_13 = arith.constant dense<0.000000e+00> : vector<256x128xf32>
    %14 = tpu.matmul %9, %11, %cst_13 {dimension_numbers = #tpu.dot_dimension_numbers<[1], [0], [0], [1], [0, 0, 1, 1], [], []>} : vector<256x128xf32>, vector<128x128xf32>, vector<256x128xf32> -> vector<256x128xf32>
    %15 = arith.addf %13, %14 : vector<256x128xf32>
    %cst_14 = arith.constant 0.000000e+00 : f32
    %16 = vector.broadcast %cst_14 : f32 to vector<256x128xf32>
    %17 = arith.maximumf %15, %16 : vector<256x128xf32>
    %c512 = arith.constant 512 : index
    %c0_15 = arith.constant 0 : index
    %18 = vector.load %arg4[%c512, %c0_15] : memref<1024x128xf32, #tpu.memory_space<vmem>>, vector<128x128xf32>
    %c640 = arith.constant 640 : index
    %c0_16 = arith.constant 0 : index
    %19 = vector.load %arg4[%c640, %c0_16] : memref<1024x128xf32, #tpu.memory_space<vmem>>, vector<128x128xf32>
    %cst_17 = arith.constant dense<0.000000e+00> : vector<256x128xf32>
    %20 = tpu.matmul %0, %17, %cst_17 {dimension_numbers = #tpu.dot_dimension_numbers<[1], [0], [0], [1], [0, 0, 1, 1], [], []>} : vector<256x256xf32>, vector<256x128xf32>, vector<256x128xf32> -> vector<256x128xf32>
    %cst_18 = arith.constant dense<0.000000e+00> : vector<256x128xf32>
    %21 = tpu.matmul %20, %18, %cst_18 {dimension_numbers = #tpu.dot_dimension_numbers<[1], [0], [0], [1], [0, 0, 1, 1], [], []>} : vector<256x128xf32>, vector<128x128xf32>, vector<256x128xf32> -> vector<256x128xf32>
    %cst_19 = arith.constant dense<0.000000e+00> : vector<256x128xf32>
    %22 = tpu.matmul %17, %19, %cst_19 {dimension_numbers = #tpu.dot_dimension_numbers<[1], [0], [0], [1], [0, 0, 1, 1], [], []>} : vector<256x128xf32>, vector<128x128xf32>, vector<256x128xf32> -> vector<256x128xf32>
    %23 = arith.addf %21, %22 : vector<256x128xf32>
    %cst_20 = arith.constant 0.000000e+00 : f32
    %24 = vector.broadcast %cst_20 : f32 to vector<256x128xf32>
    %25 = arith.maximumf %23, %24 : vector<256x128xf32>
    %c768 = arith.constant 768 : index
    %c0_21 = arith.constant 0 : index
    %26 = vector.load %arg4[%c768, %c0_21] : memref<1024x128xf32, #tpu.memory_space<vmem>>, vector<128x128xf32>
    %c896 = arith.constant 896 : index
    %c0_22 = arith.constant 0 : index
    %27 = vector.load %arg4[%c896, %c0_22] : memref<1024x128xf32, #tpu.memory_space<vmem>>, vector<128x128xf32>
    %cst_23 = arith.constant dense<0.000000e+00> : vector<256x128xf32>
    %28 = tpu.matmul %0, %25, %cst_23 {dimension_numbers = #tpu.dot_dimension_numbers<[1], [0], [0], [1], [0, 0, 1, 1], [], []>} : vector<256x256xf32>, vector<256x128xf32>, vector<256x128xf32> -> vector<256x128xf32>
    %cst_24 = arith.constant dense<0.000000e+00> : vector<256x128xf32>
    %29 = tpu.matmul %28, %26, %cst_24 {dimension_numbers = #tpu.dot_dimension_numbers<[1], [0], [0], [1], [0, 0, 1, 1], [], []>} : vector<256x128xf32>, vector<128x128xf32>, vector<256x128xf32> -> vector<256x128xf32>
    %cst_25 = arith.constant dense<0.000000e+00> : vector<256x128xf32>
    %30 = tpu.matmul %25, %27, %cst_25 {dimension_numbers = #tpu.dot_dimension_numbers<[1], [0], [0], [1], [0, 0, 1, 1], [], []>} : vector<256x128xf32>, vector<128x128xf32>, vector<256x128xf32> -> vector<256x128xf32>
    %31 = arith.addf %29, %30 : vector<256x128xf32>
    %cst_26 = arith.constant 0.000000e+00 : f32
    %32 = vector.broadcast %cst_26 : f32 to vector<256x128xf32>
    %33 = arith.maximumf %31, %32 : vector<256x128xf32>
    %c0_27 = arith.constant 0 : index
    %c0_28 = arith.constant 0 : index
    %34 = vector.load %arg3[%c0_27, %c0_28] : memref<16x256xf32, #tpu.memory_space<vmem>>, vector<16x256xf32>
    %cst_29 = arith.constant dense<0.000000e+00> : vector<16x128xf32>
    %35 = tpu.matmul %34, %33, %cst_29 {dimension_numbers = #tpu.dot_dimension_numbers<[1], [0], [0], [1], [0, 0, 1, 1], [], []>} : vector<16x256xf32>, vector<256x128xf32>, vector<16x128xf32> -> vector<16x128xf32>
    %36 = tpu.iota {dimensions = array<i32: 1>} : vector<16x128xi32>
    %c2_i32 = arith.constant 2 : i32
    %37 = vector.broadcast %c2_i32 : i32 to vector<16x128xi32>
    %38 = arith.cmpi slt, %36, %37 : vector<16x128xi32>
    %cst_30 = arith.constant -1.000000e+30 : f32
    %39 = vector.broadcast %cst_30 : f32 to vector<16x128xf32>
    %40 = arith.select %38, %35, %39 : vector<16x128xi1>, vector<16x128xf32>
    %cst_31 = arith.constant dense<0xFF800000> : vector<16xf32>
    %41 = vector.multi_reduction <maximumf>, %40, %cst_31 [1] : vector<16x128xf32> to vector<16xf32>
    %42 = vector.shape_cast %41 : vector<16xf32> to vector<16x1xf32>
    %43 = vector.broadcast %42 : vector<16x1xf32> to vector<16x128xf32>
    %44 = arith.subf %40, %43 : vector<16x128xf32>
    %45 = math.exp %44 : vector<16x128xf32>
    %cst_32 = arith.constant dense<0.000000e+00> : vector<16xf32>
    %46 = vector.multi_reduction <add>, %45, %cst_32 [1] : vector<16x128xf32> to vector<16xf32>
    %47 = vector.shape_cast %46 : vector<16xf32> to vector<16x1xf32>
    %48 = vector.broadcast %47 : vector<16x1xf32> to vector<16x128xf32>
    %49 = arith.divf %45, %48 : vector<16x128xf32>
    %c0_33 = arith.constant 0 : index
    %c0_34 = arith.constant 0 : index
    %50 = vector.load %arg5[%c0_33, %c0_34] : memref<16x128xf32, #tpu.memory_space<vmem>>, vector<16x128xf32>
    tpu.vector_store %arg5[%c0_33, %c0_34], %49 {strides = array<i32>} : memref<16x128xf32, #tpu.memory_space<vmem>>, vector<16x128xf32>,
    return
  }
  func.func @transform_0(%arg0: i32) -> (i32, i32) {
    %c0_i32 = arith.constant 0 : i32
    %c0_i32_0 = arith.constant 0 : i32
    return %arg0, %c0_i32 : i32, i32
  }
  func.func @transform_1(%arg0: i32) -> (i32, i32) {
    %c0_i32 = arith.constant 0 : i32
    %c0_i32_0 = arith.constant 0 : i32
    return %arg0, %c0_i32 : i32, i32
  }
  func.func @transform_2(%arg0: i32) -> (i32, i32) {
    %c0_i32 = arith.constant 0 : i32
    %c0_i32_0 = arith.constant 0 : i32
    return %arg0, %c0_i32 : i32, i32
  }
  func.func @transform_3(%arg0: i32) -> (i32, i32) {
    %c0_i32 = arith.constant 0 : i32
    %c0_i32_0 = arith.constant 0 : i32
    %c0_i32_1 = arith.constant 0 : i32
    return %c0_i32, %c0_i32_0 : i32, i32
  }
  func.func @transform_4(%arg0: i32) -> (i32, i32) {
    %c0_i32 = arith.constant 0 : i32
    %c0_i32_0 = arith.constant 0 : i32
    return %arg0, %c0_i32 : i32, i32
  }
}

</mosaic_0001>

<bundles_post_ra>
// kernel: gcn_forward.1
= control target key start
LH: loop header
LB: loop body
LE: loop exit
PB: predicated region body
PF: predicated region fallthrough
CT: control target
= control target key end

     0   :  { %s4730_s0 = inlined_call_operand.hbm [shape: f32[512,128], index: 0, kind: input, shape index: {}]   ;;  %s4731_s1 = inlined_call_operand.hbm [shape: f32[512,256], index: 1, kind: input, shape index: {}]   ;;  %s4732_s2 = inlined_call_operand.hbm [shape: f32[32,256], index: 2, kind: input, shape index: {}]   ;;  %s4733_s3 = inlined_call_operand.hbm [shape: f32[1024,128], index: 3, kind: input, shape index: {}]   ;;  %s4734_s4 = inlined_call_operand.vmem [shape: f32[32,128], index: 4, kind: output, shape index: {}]  }
   0x1   :  { %4809 = sst [smem:[#allocation33_spill]] %s4731_s1 }
   0x2   :  { %4810 = sst [smem:[#allocation34_spill]] %s4733_s3 }
   0x3   :  { %9 = vsyncpa [#allocation3], 0 }
   0x4   :  { %11 = vsyncpa [#allocation3 + $0x1], 0 }
   0x5   :  { %12 = vsyncpa [#allocation5], 0 }
   0x6   :  { %14 = vsyncpa [#allocation5 + $0x1], 0 }
   0x7   :  { %15 = vsyncpa [#allocation8], 0  ;;  %s3116_s15 = smov 0   ;;  %s3118_s16 = smov 0  }
   0x8   :  { %s3120_s17 = smov 0   ;;  %s3122_s18 = smov 0  }
   0x9 LB: > { %s3137_s19 = sadd.s32 1, %s3084_s18   ;;  %s28_s20 = sadd.s32 1, %s3080_s17  ;;  %s3084_s18 = sphi %s3122_s18, %s4934_s18   ;;  %s3080_s17 = sphi %s3120_s17, %s4933_s17   ;;  %s3076_s16 = sphi %s3118_s16, %s4932_s16   ;;  %s3072_s15 = sphi %s3116_s15, %s4931_s15  }
   0xa   : > { %s25_s21 = ssub.s32 %s3084_s18, %s3137_s19  ;;  %p35_p0 = scmp.ne.s32.totalorder %s3080_s17, %s3076_s16 }
   0xb   : > { %p26_p1 = scmp.eq.s32.totalorder %s25_s21, 0  ;;  %p36_p2 = scmp.eq.s32.totalorder %s3084_s18, 0 }
   0xc   : > { %p2792_p3 = scmp.lt.s32.totalorder %s3084_s18, 2  ;;  %s3150_s23 = sand.u32 1, %s3080_s17  }
   0xd   : > { %s3147_s22 = scalar_select %p26_p1, %s3080_s17, %s28_s20  }
   0xe   : > { %p37_p4 = por %p36_p2, %p35_p0  ;;  %s200_s24 = sand.u32 1, %s3084_s18  }
   0xf   : > { %s2713_s25 = sshll.u32 %s3150_s23, 9  ;;  %s2732_s27 = sshll.u32 %s3084_s18, 9 }
  0x10   : > { %p3154_p5 = pnand %p2792_p3, %p37_p4  ;;  %s4812_s1 = sld [smem:[#allocation33_spill]] }
  0x11   : > { %s204_s6 = scalar_lea.vmem [#allocation4], %s2713_s25  ;;  %s3162_s8 = scalar_lea.sflag [#allocation5], %s200_s24 }
  0x12   : > { %s213_s7 = sshll.u32 %s204_s6, 4  ;;  %p2926_p7 = pneg %p3154_p5  ;;  %s214_s7 = int_to_ptr.vmem [resolvable:$true] %s213_s7 }
  0x16   : > { %s210_s30 = scalar_lea.hbm %s4812_s1, %s2732_s27  ;;  %s2929_s13 = scalar_lea.hbm %s4812_s1, 1024 }
  0x17   : > { %s211_s5 = sshll.u32 %s210_s30, 4  ;;  %s212_s5 = int_to_ptr.hbm [resolvable:$true] %s211_s5 }
  0x18   : > { %s2922_s9 = sshra.s32 %s212_s5, 4  ;;  %s2923_s9 = int_to_ptr.hbm [resolvable:$true] %s2922_s9 }
  0x19   : > { %s2924_s10 = scalar_lea.hbm %s2923_s9, 512  ;;  %p2930_p10 = scmp.lt.s32.totalorder %s2923_s9, %s4812_s1 }
  0x1a   : > { %p2925_p6 = scmp.ne.s32.totalorder %s2923_s9, %s2924_s10  ;;  %p2931_p11 = scmp.lt.s32.totalorder %s2929_s13, %s2924_s10 }
  0x1c   : > { %p2927_p8 = pnand %p2926_p7, %p2925_p6  ;;  %p2932_p12 = por %p2931_p11, %p2930_p10 }
  0x1e   : > { %p2928_p9 = pneg %p2927_p8 }
  0x20   : > { %p2933_p13 = pnand %p2932_p12, %p2928_p9 }
  0x22   : > { %2936 = shalt.err (!%p2933_p13)
}
  0x23   : > { %s4735_s21 = smov 256   ;;  %s4736_s24 = smov 16  }
  0x24   : > { %2787 = dma.hbm_to_vmem [thread:$0]  (!%p3154_p5), %s212_s5, 8192, %s214_s7, %s3162_s8, %s4735_s21, %s4735_s21, %s4736_s24  }
  0x25   : > { %s3182_s25 = sadd.s32 4294967295, %s3084_s18   ;;  %p41_p1 = scmp.ne.s32.totalorder %s3076_s16, %s3072_s15 }
  0x26   : > { %p42_p0 = scmp.eq.s32.totalorder %s3182_s25, 0  ;;  %p2707_p2 = scmp.ge.s32.totalorder %s3084_s18, 1 }
  0x27   : > { %p151_p3 = scmp.lt.s32.totalorder %s3084_s18, 3  ;;  %s4814_s3 = sld [smem:[#allocation34_spill]] }
  0x28   : > { %p3191_p4 = por %p42_p0, %p41_p1  ;;  %s3088_s15 = smov [#allocation7]  }
  0x29   : > { %p3198_p6 = pnand %p2707_p2, %p151_p3  ;;  %s164_s6 = sshll.u32 %s3088_s15, 4  ;;  %s165_s6 = int_to_ptr.vmem [resolvable:$true] %s164_s6 }
  0x2a   : > { %s2710_s7 = sshll.u32 %s3150_s23, 8  ;;  %s2730_s9 = sshll.u32 %s3084_s18, 8 }
  0x2b   : > { %p2777_p8 = pneg %p3198_p6  ;;  %s3089_s10 = smov 128  }
  0x2c   : > { %s3090_s11 = smov 8   ;;  %s187_s14 = scalar_lea.hbm %s4730_s0, %s2730_s9 }
  0x2d   : > { %s162_s30 = sshll.u32 %s4814_s3, 4  ;;  %p2778_p9 = pnand %p2777_p8, %p42_p0  ;;  %s163_s30 = int_to_ptr.hbm [resolvable:$true] %s162_s30 }
  0x2e   : > { %s182_s20 = scalar_lea.vmem [#allocation2], %s2710_s7  ;;  %s188_s29 = sshll.u32 %s187_s14, 4  ;;  %s189_s29 = int_to_ptr.hbm [resolvable:$true] %s188_s29 }
  0x2f   : > { %2780 = dma.hbm_to_vmem [thread:$0]  (!%p2778_p9), %s163_s30, 16384, %s165_s6, [#allocation8], %s3089_s10, %s3089_s10, %s3090_s11  }
  0x30   : > { %s190_s28 = sshll.u32 %s182_s20, 4  ;;  %s2717_s21 = sshll.u32 %s3150_s23, 5  ;;  %s191_s28 = int_to_ptr.vmem [resolvable:$true] %s190_s28 }
  0x31   : > { %s179_s15 = scalar_lea.sflag [#allocation3], %s3150_s23  ;;  %s2982_s24 = sshra.s32 %s189_s29, 4  ;;  %s2983_s24 = int_to_ptr.hbm [resolvable:$true] %s2982_s24 }
  0x32   : > { %s2984_s1 = scalar_lea.hbm %s2983_s24, 256  ;;  %s2989_s12 = scalar_lea.hbm %s4730_s0, 512 }
  0x33   : > { %p2985_p10 = scmp.ne.s32.totalorder %s2983_s24, %s2984_s1  ;;  %p2990_p13 = scmp.lt.s32.totalorder %s2983_s24, %s4730_s0 }
  0x34   : > { %p2991_p1 = scmp.lt.s32.totalorder %s2989_s12, %s2984_s1 }
  0x35   : > { %p2987_p11 = pnand %p2985_p10, %p2926_p7 }
  0x36   : > { %p2992_p2 = por %p2991_p1, %p2990_p13 }
  0x37   : > { %p2988_p12 = pneg %p2987_p11 }
  0x39   : > { %p2993_p3 = pnand %p2992_p2, %p2988_p12 }
  0x3b   : > { %2996 = shalt.err (!%p2993_p3)
}
  0x3c   : > { %2784 = dma.hbm_to_vmem [thread:$0]  (!%p3154_p5), %s189_s29, 4096, %s191_s28, %s179_s15, %s3089_s10, %s3089_s10, %s3090_s11  }
  0x3d   : > { %s2734_s23 = sshll.u32 %s3084_s18, 5  ;;  %s227_s30 = scalar_lea.vmem [#allocation6], %s2717_s21 }
  0x3e   : > { %s233_s20 = scalar_lea.hbm %s4732_s2, %s2734_s23  ;;  %s236_s6 = sshll.u32 %s227_s30, 4  ;;  %s237_s6 = int_to_ptr.vmem [resolvable:$true] %s236_s6 }
  0x3f   : > { %s234_s3 = sshll.u32 %s233_s20, 4  ;;  %s3019_s18 = scalar_lea.hbm %s4732_s2, 64  ;;  %s235_s3 = int_to_ptr.hbm [resolvable:$true] %s234_s3 }
  0x40   : > { %s3012_s24 = sshra.s32 %s235_s3, 4  ;;  %s3013_s24 = int_to_ptr.hbm [resolvable:$true] %s3012_s24 }
  0x41   : > { %s3014_s1 = scalar_lea.hbm %s3013_s24, 32  ;;  %p3020_p11 = scmp.lt.s32.totalorder %s3013_s24, %s4732_s2 }
  0x42   : > { %p3015_p8 = scmp.ne.s32.totalorder %s3013_s24, %s3014_s1  ;;  %p3021_p12 = scmp.lt.s32.totalorder %s3019_s18, %s3014_s1 }
  0x44   : > { %p3017_p9 = pnand %p3015_p8, %p2926_p7  ;;  %p3022_p13 = por %p3021_p12, %p3020_p11 }
  0x46   : > { %p3018_p10 = pneg %p3017_p9 }
  0x48   : > { %p3023_p1 = pnand %p3022_p13, %p3018_p10 }
  0x4a   : > { %3026 = shalt.err (!%p3023_p1)
}
  0x4b   : > { %s4816_s21 = smov 16   ;;  %s4817_s29 = smov 256  }
  0x4c   : > { %2790 = dma.hbm_to_vmem [thread:$0]  (!%p3154_p5), %s235_s3, 512, %s237_s6, %s3162_s8, %s4817_s29, %s4817_s29, %s4816_s21  }
  0x4d   : > { %248 = sbr.rel (%p3198_p6) target bundleno = 2697 (0xa89), region = 36 }
  0x52   : > { %s250_s15 = sand.u32 1, %s3076_s16  }
  0x53   : > { %s2722_s9 = sshll.u32 %s250_s15, 8  ;;  %s251_s7 = scalar_lea.sflag [#allocation3], %s250_s15 }
  0x54   : > { %s3246_s23 = scalar_lea.vmem [#allocation2], %s2722_s9 }
  0x55   : > { %3059 = dma.done.wait (%p3191_p4), %s251_s7, 4096  }
  0x56   : > { %3061 = vsyncadd (%p3191_p4), %s251_s7, 4294963200  ;;  %s260_s26 = sand.u32 1, %s3182_s25   ;;  %s2723_s13 = sshll.u32 %s250_s15, 9 }
  0x57   : > { %s261_s3 = scalar_lea.sflag [#allocation5], %s260_s26  ;;  %s3253_s8 = scalar_lea.vmem [#allocation4], %s2723_s13 }
  0x58   : > { %3063 = dma.done.wait (%p3191_p4), %s261_s3, 8704  }
  0x59   : > { %3065 = vsyncadd (%p3191_p4), %s261_s3, 4294958592  ;;  %s2724_s5 = sshll.u32 %s250_s15, 5 }
  0x5a   : > { %s3259_s14 = scalar_lea.vmem [#allocation6], %s2724_s5 }
  0x5b   : > { %3067 = dma.done.wait (%p42_p0), [#allocation8], 16384  }
  0x5c   : > { %3069 = vsyncadd (%p42_p0), [#allocation8], 4294950912  ;;  %v3266_v0 = vld [vmem:[%s3246_s23 + $0x78] sm:$0xff]  ;;  %v3272_v2 = vld [vmem:[%s3246_s23 + $0x70] sm:$0xff]  ;;  %s2726_s27 = sshll.u32 %s3182_s25, 1 }
  0x5d   : > { %v3269_v1 = vld [vmem:[%s3246_s23 + $0xf8] sm:$0xff]  ;;  %452 = vmatpush.msra.mxu0 %v3266_v0  ;;  %v3277_v3 = vld [vmem:[%s3246_s23 + $0xf0] sm:$0xff]  ;;  %v3280_v4 = vld [vmem:[%s3246_s23 + $0x68] sm:$0xff]  ;;  %p319_p5 = scmp.lt.s32.totalorder %s2726_s27, 3 }
  0x5e   : > { %565 = vmatpush.msra.mxu1 %v3269_v1  ;;  %v3283_v5 = vld [vmem:[%s3246_s23 + $0xe8] sm:$0xff]  ;;  %v451_v6 = vld [vmem:[#allocation7 + $0xf8] sm:$0xff]  ;;  %v3288_v7 = vld [vmem:[%s3246_s23 + $0x60] sm:$0xff] }
  0x5f   : > { %453 = vmatpush.msra.mxu0 %v3272_v2  ;;  %v3291_v8 = vld [vmem:[%s3246_s23 + $0xe0] sm:$0xff]  ;;  %678 = vmatpush.msra.mxu2 %v451_v6  ;;  %v450_v9 = vld [vmem:[#allocation7 + $0xf0] sm:$0xff]  ;;  %v449_v10 = vld [vmem:[#allocation7 + $0xe8] sm:$0xff]  ;;  %s4936_s27 = smov (!%p319_p5, %s2726_s27), 3 }
  0x60   : > { %566 = vmatpush.msra.mxu1 %v3277_v3  ;;  %v3296_v11 = vld [vmem:[%s3246_s23 + $0x58] sm:$0xff]  ;;  %v448_v13 = vld [vmem:[#allocation7 + $0xe0] sm:$0xff]  ;;  %v3304_v14 = vld [vmem:[%s3246_s23 + $0x50] sm:$0xff]  ;;  %s2727_s20 = sshll.u32 %s4936_s27, 3 }
  0x61   : > { %454 = vmatpush.msra.mxu0 %v3280_v4  ;;  %v3299_v12 = vld [vmem:[%s3246_s23 + $0xd8] sm:$0xff]  ;;  %679 = vmatpush.msra.mxu2 %v450_v9  ;;  %v3307_v15 = vld [vmem:[%s3246_s23 + $0xd0] sm:$0xff]  ;;  %v3312_v17 = vld [vmem:[%s3246_s23 + $0x48] sm:$0xff]  ;;  %s322_s6 = scalar_lea.vmem %s4734_s4, %s2727_s20 }
  0x62   : > { %567 = vmatpush.msra.mxu1 %v3283_v5  ;;  %v447_v16 = vld [vmem:[#allocation7 + $0xd8] sm:$0xff]  ;;  %v3315_v18 = vld [vmem:[%s3246_s23 + $0xc8] sm:$0xff]  ;;  %v446_v19 = vld [vmem:[#allocation7 + $0xd0] sm:$0xff] }
  0x63   : > { %455 = vmatpush.msra.mxu0 %v3288_v7  ;;  %680 = vmatpush.msra.mxu2 %v449_v10  ;;  %v3320_v20 = vld [vmem:[%s3246_s23 + $0x40] sm:$0xff]  ;;  %v445_v22 = vld [vmem:[#allocation7 + $0xc8] sm:$0xff]  ;;  %v3328_v23 = vld [vmem:[%s3246_s23 + $0x38] sm:$0xff] }
  0x64   : > { %568 = vmatpush.msra.mxu1 %v3291_v8  ;;  %v3323_v21 = vld [vmem:[%s3246_s23 + $0xc0] sm:$0xff]  ;;  %v3331_v24 = vld [vmem:[%s3246_s23 + $0xb8] sm:$0xff]  ;;  %v3336_v26 = vld [vmem:[%s3246_s23 + $0x30] sm:$0xff] }
  0x65   : > { %456 = vmatpush.msra.mxu0 %v3296_v11  ;;  %681 = vmatpush.msra.mxu2 %v448_v13  ;;  %v444_v25 = vld [vmem:[#allocation7 + $0xc0] sm:$0xff]  ;;  %v3339_v27 = vld [vmem:[%s3246_s23 + $0xb0] sm:$0xff]  ;;  %v443_v28 = vld [vmem:[#allocation7 + $0xb8] sm:$0xff] }
  0x66   : > { %569 = vmatpush.msra.mxu1 %v3299_v12  ;;  %v3344_v29 = vld [vmem:[%s3246_s23 + $0x28] sm:$0xff]  ;;  %v442_v31 = vld [vmem:[#allocation7 + $0xb0] sm:$0xff]  ;;  %v392_v32 = vld [vmem:[%s3246_s23 + $0x20] sm:$0xff] }
  0x67   : > { %457 = vmatpush.msra.mxu0 %v3304_v14  ;;  %682 = vmatpush.msra.mxu2 %v447_v16  ;;  %v3347_v30 = vld [vmem:[%s3246_s23 + $0xa8] sm:$0xff]  ;;  %v3353_v33 = vld [vmem:[%s3246_s23 + $0xa0] sm:$0xff]  ;;  %v391_v35 = vld [vmem:[%s3246_s23 + $0x18] sm:$0xff] }
  0x68   : > { %570 = vmatpush.msra.mxu1 %v3307_v15  ;;  %v441_v34 = vld [vmem:[#allocation7 + $0xa8] sm:$0xff]  ;;  %v3359_v36 = vld [vmem:[%s3246_s23 + $0x98] sm:$0xff]  ;;  %v440_v37 = vld [vmem:[#allocation7 + $0xa0] sm:$0xff] }
  0x69   : > { %458 = vmatpush.msra.mxu0 %v3312_v17  ;;  %683 = vmatpush.msra.mxu2 %v446_v19  ;;  %v390_v38 = vld [vmem:[%s3246_s23 + $0x10] sm:$0xff]  ;;  %v439_v40 = vld [vmem:[#allocation7 + $0x98] sm:$0xff]  ;;  %v389_v41 = vld [vmem:[%s3246_s23 + $0x8] sm:$0xff] }
  0x6a   : > { %571 = vmatpush.msra.mxu1 %v3315_v18  ;;  %v3364_v39 = vld [vmem:[%s3246_s23 + $0x90] sm:$0xff]  ;;  %v3369_v42 = vld [vmem:[%s3246_s23 + $0x88] sm:$0xff]  ;;  %v388_v44 = vld [vmem:[%s3246_s23] sm:$0xff] }
  0x6b   : > { %459 = vmatpush.msra.mxu0 %v3320_v20  ;;  %684 = vmatpush.msra.mxu2 %v445_v22  ;;  %v438_v43 = vld [vmem:[#allocation7 + $0x90] sm:$0xff]  ;;  %v3374_v45 = vld [vmem:[%s3246_s23 + $0x80] sm:$0xff]  ;;  %v325_v47 = vld [vmem:[%s3253_s8 + $0x8] sm:$0xff] }
  0x6c   : > { %572 = vmatpush.msra.mxu1 %v3323_v21  ;;  %v3378_v46 = vld [vmem:[%s3253_s8] sm:$0xff]  ;;  %v437_v48 = vld [vmem:[#allocation7 + $0x88] sm:$0xff]  ;;  %v3384_v50 = vld [vmem:[%s3253_s8 + $0x10] sm:$0xff] }
  0x6d   : > { %460 = vmatpush.msra.mxu0 %v3328_v23  ;;  %685 = vmatpush.msra.mxu2 %v444_v25  ;;  %v436_v49 = vld [vmem:[#allocation7 + $0x80] sm:$0xff]  ;;  %v327_v51 = vld [vmem:[%s3253_s8 + $0x18] sm:$0xff]  ;;  %v329_v53 = vld [vmem:[%s3253_s8 + $0x28] sm:$0xff] }
  0x6e   : > { %573 = vmatpush.msra.mxu1 %v3331_v24  ;;  %v3389_v52 = vld [vmem:[%s3253_s8 + $0x20] sm:$0xff]  ;;  %v3394_v54 = vld [vmem:[%s3253_s8 + $0x30] sm:$0xff]  ;;  %v331_v55 = vld [vmem:[%s3253_s8 + $0x38] sm:$0xff] }
  0x6f   : > { %461 = vmatpush.msra.mxu0 %v3336_v26  ;;  %686 = vmatpush.msra.mxu2 %v443_v28  ;;  %v3399_v56 = vld [vmem:[%s3253_s8 + $0x40] sm:$0xff]  ;;  %v333_v57 = vld [vmem:[%s3253_s8 + $0x48] sm:$0xff]  ;;  %v3404_v58 = vld [vmem:[%s3253_s8 + $0x50] sm:$0xff] }
  0x70   : > { %574 = vmatpush.msra.mxu1 %v3339_v27  ;;  %v335_v59 = vld [vmem:[%s3253_s8 + $0x58] sm:$0xff]  ;;  %v3410_v60 = vld [vmem:[%s3253_s8 + $0x60] sm:$0xff]  ;;  %v337_v61 = vld [vmem:[%s3253_s8 + $0x68] sm:$0xff] }
  0x71   : > { %462 = vmatpush.msra.mxu0 %v3344_v29  ;;  %687 = vmatpush.msra.mxu2 %v442_v31  ;;  %v3416_v62 = vld [vmem:[%s3253_s8 + $0x70] sm:$0xff]  ;;  %v339_v63 = vld [vmem:[%s3253_s8 + $0x78] sm:$0xff]  ;;  %v3422_v6 = vld [vmem:[%s3253_s8 + $0x80] sm:$0xff] }
  0x72   : > { %575 = vmatpush.msra.mxu1 %v3347_v30  ;;  %v341_v9 = vld [vmem:[%s3253_s8 + $0x88] sm:$0xff]  ;;  %v435_v10 = vld [vmem:[#allocation7 + $0x78] sm:$0xff]  ;;  %v434_v13 = vld [vmem:[#allocation7 + $0x70] sm:$0xff] }
  0x73   : > { %463 = vmatpush.msra.mxu0 %v392_v32  ;;  %688 = vmatpush.msra.mxu2 %v441_v34  ;;  %v433_v16 = vld [vmem:[#allocation7 + $0x68] sm:$0xff]  ;;  %v432_v19 = vld [vmem:[#allocation7 + $0x60] sm:$0xff]  ;;  %v3428_v22 = vld [vmem:[%s3253_s8 + $0x90] sm:$0xff] }
  0x74   : > { %576 = vmatpush.msra.mxu1 %v3353_v33  ;;  %791 = vmatpush.msra.mxu3 %v435_v10  ;;  %v343_v25 = vld [vmem:[%s3253_s8 + $0x98] sm:$0xff]  ;;  %v429_v28 = vld [vmem:[#allocation7 + $0x48] sm:$0xff]  ;;  %v426_v34 = vld [vmem:[#allocation7 + $0x30] sm:$0xff] }
  0x75   : > { %464 = vmatpush.msra.mxu0 %v391_v35  ;;  %689 = vmatpush.msra.mxu2 %v440_v37  ;;  %v345_v31 = vld [vmem:[%s3253_s8 + $0xa8] sm:$0xff]  ;;  %v3440_v37 = vld [vmem:[%s3253_s8 + $0xb0] sm:$0xff]  ;;  %v359_v10 = vld [vmem:[%s3253_s8 + $0x118] sm:$0xff] }
  0x76   : > { %577 = vmatpush.msra.mxu1 %v3359_v36  ;;  %792 = vmatpush.msra.mxu3 %v434_v13 }
  0x77   : > { %465 = vmatpush.msra.mxu0 %v390_v38  ;;  %690 = vmatpush.msra.mxu2 %v439_v40  ;;  %v423_v40 = vld [vmem:[#allocation7 + $0x18] sm:$0xff] }
  0x78   : > { %578 = vmatpush.msra.mxu1 %v3364_v39  ;;  %793 = vmatpush.msra.mxu3 %v433_v16 }
  0x79   : > { %466 = vmatpush.msra.mxu0 %v389_v41  ;;  %691 = vmatpush.msra.mxu2 %v438_v43  ;;  %v3446_v43 = vld [vmem:[%s3253_s8 + $0xc0] sm:$0xff] }
  0x7a   : > { %579 = vmatpush.msra.mxu1 %v3369_v42  ;;  %794 = vmatpush.msra.mxu3 %v432_v19 }
  0x7b   : > { %467 = vmatpush.msra.mxu0 %v388_v44  ;;  %692 = vmatpush.msra.mxu2 %v437_v48  ;;  %v3452_v48 = vld [vmem:[%s3253_s8 + $0xd0] sm:$0xff] }
  0x7c   : > { %580 = vmatpush.msra.mxu1 %v3374_v45  ;;  %468 = vmatmul.f32.vlgmr.msra.gmra.mxu0 %v3378_v46 }
  0x7d   : > { %581 = vmatmul.f32.vlgmr.msra.gmra.mxu1 %v325_v47  ;;  %693 = vmatpush.msra.mxu2 %v436_v49  ;;  %v420_v47 = vld [vmem:[#allocation7] sm:$0xff]  ;;  %v351_v49 = vld [vmem:[%s3253_s8 + $0xd8] sm:$0xff] }
  0x7e   : > { %694 = vmatmul.f32.vlgmr.msra.gmra.mxu2 %v388_v44  ;;  %v349_v44 = vld [vmem:[%s3253_s8 + $0xc8] sm:$0xff] }
  0x84   : > { %471 = vmatmul.f32.gmra.mxu0 %v3384_v50 }
  0x85   : > { %584 = vmatmul.f32.gmra.mxu1 %v327_v51  ;;  %v353_v51 = vld [vmem:[%s3253_s8 + $0xe8] sm:$0xff] }
  0x86   : > { %697 = vmatmul.f32.gmra.mxu2 %v389_v41  ;;  %v422_v41 = vld [vmem:[#allocation7 + $0x10] sm:$0xff] }
  0x8c   : > { %474 = vmatmul.f32.gmra.mxu0 %v3389_v52 }
  0x8d   : > { %587 = vmatmul.f32.gmra.mxu1 %v329_v53  ;;  %v3464_v53 = vld [vmem:[%s3253_s8 + $0xf0] sm:$0xff] }
  0x8e   : > { %700 = vmatmul.f32.gmra.mxu2 %v390_v38  ;;  %v347_v38 = vld [vmem:[%s3253_s8 + $0xb8] sm:$0xff] }
  0x94   : > { %477 = vmatmul.f32.gmra.mxu0 %v3394_v54 }
  0x95   : > { %590 = vmatmul.f32.gmra.mxu1 %v331_v55 }
  0x96   : > { %703 = vmatmul.f32.gmra.mxu2 %v391_v35  ;;  %v425_v35 = vld [vmem:[#allocation7 + $0x28] sm:$0xff] }
  0x9c   : > { %480 = vmatmul.f32.gmra.mxu0 %v3399_v56 }
  0x9d   : > { %593 = vmatmul.f32.gmra.mxu1 %v333_v57  ;;  %v3470_v57 = vld [vmem:[%s3253_s8 + $0x100] sm:$0xff] }
  0x9e   : > { %706 = vmatmul.f32.gmra.mxu2 %v392_v32  ;;  %v427_v32 = vld [vmem:[#allocation7 + $0x38] sm:$0xff] }
  0xa4   : > { %483 = vmatmul.f32.gmra.mxu0 %v3404_v58 }
  0xa5   : > { %596 = vmatmul.f32.gmra.mxu1 %v335_v59  ;;  %v357_v59 = vld [vmem:[%s3253_s8 + $0x108] sm:$0xff] }
  0xa6   : > { %709 = vmatmul.f32.gmra.mxu2 %v3344_v29  ;;  %v3434_v29 = vld [vmem:[%s3253_s8 + $0xa0] sm:$0xff] }
  0xac   : > { %486 = vmatmul.f32.gmra.mxu0 %v3410_v60 }
  0xad   : > { %599 = vmatmul.f32.gmra.mxu1 %v337_v61 }
  0xae   : > { %712 = vmatmul.f32.gmra.mxu2 %v3336_v26  ;;  %v430_v26 = vld [vmem:[#allocation7 + $0x50] sm:$0xff] }
  0xb4   : > { %489 = vmatmul.f32.gmra.mxu0 %v3416_v62 }
  0xb5   : > { %602 = vmatmul.f32.gmra.mxu1 %v339_v63 }
  0xb6   : > { %715 = vmatmul.f32.gmra.mxu2 %v3328_v23  ;;  %v431_v23 = vld [vmem:[#allocation7 + $0x58] sm:$0xff] }
  0xb7   : > { %795 = vmatpush.msra.mxu3 %v431_v23 }
  0xb9   : > { %796 = vmatpush.msra.mxu3 %v430_v26 }
  0xbb   : > { %797 = vmatpush.msra.mxu3 %v429_v28 }
  0xbc   : > { %492 = vmatmul.f32.gmra.mxu0 %v3422_v6 }
  0xbd   : > { %605 = vmatmul.f32.gmra.mxu1 %v341_v9  ;;  %v3476_v9 = vld [vmem:[%s3253_s8 + $0x110] sm:$0xff] }
  0xbe   : > { %718 = vmatmul.f32.gmra.mxu2 %v3320_v20  ;;  %v428_v20 = vld [vmem:[#allocation7 + $0x40] sm:$0xff] }
  0xbf   : > { %798 = vmatpush.msra.mxu3 %v428_v20 }
  0xc1   : > { %799 = vmatpush.msra.mxu3 %v427_v32 }
  0xc3   : > { %800 = vmatpush.msra.mxu3 %v426_v34 }
  0xc4   : > { %495 = vmatmul.f32.gmra.mxu0 %v3428_v22 }
  0xc5   : > { %608 = vmatmul.f32.gmra.mxu1 %v343_v25  ;;  %801 = vmatpush.msra.mxu3 %v425_v35  ;;  %v3484_v25 = vld [vmem:[%s3253_s8 + $0x120] sm:$0xff] }
  0xc6   : > { %721 = vmatmul.f32.gmra.mxu2 %v3312_v17  ;;  %v424_v17 = vld [vmem:[#allocation7 + $0x20] sm:$0xff] }
  0xc7   : > { %802 = vmatpush.msra.mxu3 %v424_v17  ;;  %v3503_v17 = vld [vmem:[%s3253_s8 + $0x140] sm:$0xff] }
  0xc9   : > { %803 = vmatpush.msra.mxu3 %v423_v40 }
  0xcb   : > { %804 = vmatpush.msra.mxu3 %v422_v41 }
  0xcc   : > { %498 = vmatmul.f32.gmra.mxu0 %v3434_v29 }
  0xcd   : > { %611 = vmatmul.f32.gmra.mxu1 %v345_v31  ;;  %v3492_v31 = vld [vmem:[%s3253_s8 + $0x130] sm:$0xff] }
  0xce   : > { %724 = vmatmul.f32.gmra.mxu2 %v3304_v14  ;;  %v421_v14 = vld [vmem:[#allocation7 + $0x8] sm:$0xff] }
  0xcf   : > { %805 = vmatpush.msra.mxu3 %v421_v14 }
  0xd1   : > { %806 = vmatpush.msra.mxu3 %v420_v47  ;;  %v3517_v47 = vld [vmem:[%s3253_s8 + $0x158] sm:$0xff] }
  0xd2   : > { %4820 = vst [vmem:[#allocation14_spill] sm:$0xff] %v3517_v47 }
  0xd4   : > { %501 = vmatmul.f32.gmra.mxu0 %v3440_v37 }
  0xd5   : > { %614 = vmatmul.f32.gmra.mxu1 %v347_v38  ;;  %v3506_v38 = vld [vmem:[%s3253_s8 + $0x148] sm:$0xff] }
  0xd6   : > { %727 = vmatmul.f32.gmra.mxu2 %v3296_v11  ;;  %v3458_v11 = vld [vmem:[%s3253_s8 + $0xe0] sm:$0xff]  ;;  %4819 = vst [vmem:[#allocation13_spill] sm:$0xff] %v3506_v38 }
  0xdc   : > { %504 = vmatmul.f32.gmra.mxu0 %v3446_v43 }
  0xdd   : > { %617 = vmatmul.f32.gmra.mxu1 %v349_v44  ;;  %v3514_v44 = vld [vmem:[%s3253_s8 + $0x150] sm:$0xff] }
  0xde   : > { %730 = vmatmul.f32.gmra.mxu2 %v3288_v7  ;;  %v355_v7 = vld [vmem:[%s3253_s8 + $0xf8] sm:$0xff] }
  0xe4   : > { %507 = vmatmul.f32.gmra.mxu0 %v3452_v48 }
  0xe5   : > { %620 = vmatmul.f32.gmra.mxu1 %v351_v49 }
  0xe6   : > { %733 = vmatmul.f32.gmra.mxu2 %v3280_v4 }
  0xec   : > { %510 = vmatmul.f32.gmra.mxu0 %v3458_v11 }
  0xed   : > { %623 = vmatmul.f32.gmra.mxu1 %v353_v51 }
  0xee   : > { %736 = vmatmul.f32.gmra.mxu2 %v3272_v2 }
  0xf4   : > { %513 = vmatmul.f32.gmra.mxu0 %v3464_v53 }
  0xf5   : > { %626 = vmatmul.f32.gmra.mxu1 %v355_v7 }
  0xf6   : > { %739 = vmatmul.f32.gmra.mxu2 %v3266_v0 }
  0xf9   : > { %v469_v55 = vpop.f32.mrf.mxu0 }
  0xfa   : > { %v582_v4 = vpop.f32.mrf.mxu1 }
  0xfb   : > { %v583_v61 = vadd.f32 %v582_v4, %v469_v55  ;;  %v3525_v55 = vld [vmem:[%s3253_s8 + $0x160] sm:$0xff]  ;;  %v3528_v4 = vld [vmem:[%s3253_s8 + $0x168] sm:$0xff] }
  0xfc   : > { %516 = vmatmul.f32.gmra.mxu0 %v3470_v57  ;;  %4821 = vst [vmem:[#allocation15_spill] sm:$0xff] %v3528_v4 }
  0xfd   : > { %629 = vmatmul.f32.gmra.mxu1 %v357_v59  ;;  %807 = vmatmul.f32.vlgmr.msra.gmra.mxu3 %v583_v61 }
  0xfe   : > { %742 = vmatmul.f32.gmra.mxu2 %v3374_v45  ;;  %v361_v45 = vld [vmem:[%s3253_s8 + $0x128] sm:$0xff] }
 0x101   : > { %v472_v2 = vpop.f32.mrf.mxu0  ;;  %v3479_v13 = vpop.f32.mrf.mxu2 }
 0x102   : > { %v585_v63 = vpop.f32.mrf.mxu1 }
 0x103   : > { %v586_v0 = vadd.f32 %v585_v63, %v472_v2  ;;  %v3536_v63 = vld [vmem:[%s3253_s8 + $0x170] sm:$0xff] }
 0x104   : > { %519 = vmatmul.f32.gmra.mxu0 %v3476_v9 }
 0x105   : > { %632 = vmatmul.f32.gmra.mxu1 %v359_v10  ;;  %810 = vmatmul.f32.gmra.mxu3 %v586_v0  ;;  %v3539_v10 = vld [vmem:[%s3253_s8 + $0x178] sm:$0xff] }
 0x106   : > { %745 = vmatmul.f32.gmra.mxu2 %v3369_v42  ;;  %v3495_v42 = vld [vmem:[%s3253_s8 + $0x138] sm:$0xff]  ;;  %4822 = vst [vmem:[#allocation16_spill] sm:$0xff] %v3539_v10 }
 0x107   : > { %4818 = vst [vmem:[#allocation12_spill] sm:$0xff] %v3495_v42 }
 0x109   : > { %v475_v16 = vpop.f32.mrf.mxu0  ;;  %v3487_v26 = vpop.f32.mrf.mxu2 }
 0x10a   : > { %v588_v19 = vpop.f32.mrf.mxu1 }
 0x10b   : > { %v589_v23 = vadd.f32 %v588_v19, %v475_v16 }
 0x10c   : > { %522 = vmatmul.f32.gmra.mxu0 %v3484_v25 }
 0x10d   : > { %635 = vmatmul.f32.gmra.mxu1 %v361_v45  ;;  %813 = vmatmul.f32.gmra.mxu3 %v589_v23  ;;  %v3547_v45 = vld [vmem:[%s3253_s8 + $0x180] sm:$0xff]  ;;  %v3550_v23 = vld [vmem:[%s3253_s8 + $0x188] sm:$0xff] }
 0x10e   : > { %748 = vmatmul.f32.gmra.mxu2 %v3364_v39  ;;  %4823 = vst [vmem:[#allocation17_spill] sm:$0xff] %v3550_v23 }
 0x111   : > { %v478_v28 = vpop.f32.mrf.mxu0  ;;  %v3497_v34 = vpop.f32.mrf.mxu2 }
 0x112   : > { %v591_v20 = vpop.f32.mrf.mxu1 }
 0x113   : > { %v592_v32 = vadd.f32 %v591_v20, %v478_v28 }
 0x114   : > { %525 = vmatmul.f32.gmra.mxu0 %v3492_v31 }
 0x115   : > { %638 = vmatmul.f32.gmra.mxu1 %v3495_v42  ;;  %816 = vmatmul.f32.gmra.mxu3 %v592_v32 }
 0x116   : > { %751 = vmatmul.f32.gmra.mxu2 %v3359_v36 }
 0x119   : > { %v481_v35 = vpop.f32.mrf.mxu0  ;;  %v3508_v41 = vpop.f32.mrf.mxu2 }
 0x11a   : > { %v594_v39 = vpop.f32.mrf.mxu1 }
 0x11b   : > { %v595_v40 = vadd.f32 %v594_v39, %v481_v35  ;;  %v3558_v35 = vld [vmem:[%s3253_s8 + $0x190] sm:$0xff]  ;;  %v3561_v39 = vld [vmem:[%s3253_s8 + $0x198] sm:$0xff] }
 0x11c   : > { %528 = vmatmul.f32.gmra.mxu0 %v3503_v17  ;;  %4824 = vst [vmem:[#allocation18_spill] sm:$0xff] %v3558_v35 }
 0x11d   : > { %641 = vmatmul.f32.gmra.mxu1 %v3506_v38  ;;  %819 = vmatmul.f32.gmra.mxu3 %v595_v40  ;;  %4825 = vst [vmem:[#allocation19_spill] sm:$0xff] %v3561_v39 }
 0x11e   : > { %754 = vmatmul.f32.gmra.mxu2 %v3353_v33 }
 0x121   : > { %v484_v14 = vpop.f32.mrf.mxu0  ;;  %v3519_v51 = vpop.f32.mrf.mxu2 }
 0x122   : > { %v597_v36 = vpop.f32.mrf.mxu1 }
 0x123   : > { %v598_v49 = vadd.f32 %v597_v36, %v484_v14  ;;  %v967_v14 = vld [vmem:[#allocation7 + $0x1f8] sm:$0xff] }
 0x124   : > { %531 = vmatmul.f32.gmra.mxu0 %v3514_v44  ;;  %1194 = vmatpush.msrb.mxu2 %v967_v14  ;;  %v961_v14 = vld [vmem:[#allocation7 + $0x1c8] sm:$0xff] }
 0x125   : > { %644 = vmatmul.f32.gmra.mxu1 %v3517_v47  ;;  %822 = vmatmul.f32.gmra.mxu3 %v598_v49  ;;  %v966_v49 = vld [vmem:[#allocation7 + $0x1f0] sm:$0xff] }
 0x126   : > { %757 = vmatmul.f32.gmra.mxu2 %v3347_v30 }
 0x127   : > { %1195 = vmatpush.msrb.mxu2 %v966_v49 }
 0x129   : > { %v487_v7 = vpop.f32.mrf.mxu0  ;;  %v3530_v61 = vpop.f32.mrf.mxu2 }
 0x12a   : > { %v600_v33 = vpop.f32.mrf.mxu1 }
 0x12b   : > { %v601_v59 = vadd.f32 %v600_v33, %v487_v7  ;;  %v3569_v33 = vld [vmem:[%s3253_s8 + $0x1a0] sm:$0xff] }
 0x12c   : > { %534 = vmatmul.f32.gmra.mxu0 %v3525_v55  ;;  %4826 = vst [vmem:[#allocation20_spill] sm:$0xff] %v3569_v33 }
 0x12d   : > { %647 = vmatmul.f32.gmra.mxu1 %v3528_v4  ;;  %825 = vmatmul.f32.gmra.mxu3 %v601_v59  ;;  %v3572_v59 = vld [vmem:[%s3253_s8 + $0x1a8] sm:$0xff] }
 0x12e   : > { %760 = vmatmul.f32.gmra.mxu2 %v3339_v27  ;;  %4827 = vst [vmem:[#allocation21_spill] sm:$0xff] %v3572_v59 }
 0x131   : > { %v490_v2 = vpop.f32.mrf.mxu0  ;;  %v3541_v16 = vpop.f32.mrf.mxu2 }
 0x132   : > { %v603_v30 = vpop.f32.mrf.mxu1 }
 0x133   : > { %v604_v0 = vadd.f32 %v603_v30, %v490_v2  ;;  %v965_v2 = vld [vmem:[#allocation7 + $0x1e8] sm:$0xff] }
 0x134   : > { %537 = vmatmul.f32.gmra.mxu0 %v3536_v63  ;;  %1196 = vmatpush.msrb.mxu2 %v965_v2 }
 0x135   : > { %650 = vmatmul.f32.gmra.mxu1 %v3539_v10  ;;  %828 = vmatmul.f32.gmra.mxu3 %v604_v0  ;;  %v964_v0 = vld [vmem:[#allocation7 + $0x1e0] sm:$0xff] }
 0x136   : > { %763 = vmatmul.f32.gmra.mxu2 %v3331_v24 }
 0x137   : > { %1197 = vmatpush.msrb.mxu2 %v964_v0  ;;  %v3589_v0 = vld [vmem:[%s3253_s8 + $0x1c0] sm:$0xff] }
 0x138   : > { %4830 = vst [vmem:[#allocation24_spill] sm:$0xff] %v3589_v0 }
 0x139   : > { %v493_v19 = vpop.f32.mrf.mxu0  ;;  %v3554_v20 = vpop.f32.mrf.mxu2 }
 0x13a   : > { %v606_v27 = vpop.f32.mrf.mxu1 }
 0x13b   : > { %v607_v28 = vadd.f32 %v606_v27, %v493_v19  ;;  %v962_v19 = vld [vmem:[#allocation7 + $0x1d0] sm:$0xff] }
 0x13c   : > { %540 = vmatmul.f32.gmra.mxu0 %v3547_v45 }
 0x13d   : > { %653 = vmatmul.f32.gmra.mxu1 %v3550_v23  ;;  %831 = vmatmul.f32.gmra.mxu3 %v607_v28 }
 0x13e   : > { %766 = vmatmul.f32.gmra.mxu2 %v3323_v21 }
 0x141   : > { %v496_v32 = vpop.f32.mrf.mxu0  ;;  %v3565_v36 = vpop.f32.mrf.mxu2 }
 0x142   : > { %v609_v24 = vpop.f32.mrf.mxu1 }
 0x143   : > { %v610_v40 = vadd.f32 %v609_v24, %v496_v32  ;;  %v3580_v24 = vld [vmem:[%s3253_s8 + $0x1b0] sm:$0xff] }
 0x144   : > { %543 = vmatmul.f32.gmra.mxu0 %v3558_v35  ;;  %4828 = vst [vmem:[#allocation22_spill] sm:$0xff] %v3580_v24 }
 0x145   : > { %656 = vmatmul.f32.gmra.mxu1 %v3561_v39  ;;  %834 = vmatmul.f32.gmra.mxu3 %v610_v40  ;;  %v3583_v40 = vld [vmem:[%s3253_s8 + $0x1b8] sm:$0xff] }
 0x146   : > { %769 = vmatmul.f32.gmra.mxu2 %v3315_v18  ;;  %v963_v18 = vld [vmem:[#allocation7 + $0x1d8] sm:$0xff]  ;;  %4829 = vst [vmem:[#allocation23_spill] sm:$0xff] %v3583_v40 }
 0x147   : > { %1198 = vmatpush.msrb.mxu2 %v963_v18  ;;  %v3592_v18 = vld [vmem:[%s3253_s8 + $0x1c8] sm:$0xff] }
 0x148   : > { %4831 = vst [vmem:[#allocation25_spill] sm:$0xff] %v3592_v18 }
 0x149   : > { %v499_v21 = vpop.f32.mrf.mxu0  ;;  %v3576_v27 = vpop.f32.mrf.mxu2  ;;  %1199 = vmatpush.msrb.mxu2 %v962_v19  ;;  %v957_v19 = vld [vmem:[#allocation7 + $0x1a8] sm:$0xff] }
 0x14a   : > { %v612_v7 = vpop.f32.mrf.mxu1 }
 0x14b   : > { %v613_v30 = vadd.f32 %v612_v7, %v499_v21  ;;  %v960_v21 = vld [vmem:[#allocation7 + $0x1c0] sm:$0xff]  ;;  %1200 = vmatpush.msrb.mxu2 %v961_v14  ;;  %v958_v7 = vld [vmem:[#allocation7 + $0x1b0] sm:$0xff] }
 0x14c   : > { %546 = vmatmul.f32.gmra.mxu0 %v3569_v33  ;;  %v956_v14 = vld [vmem:[#allocation7 + $0x1a0] sm:$0xff] }
 0x14d   : > { %659 = vmatmul.f32.gmra.mxu1 %v3572_v59  ;;  %837 = vmatmul.f32.gmra.mxu3 %v613_v30 }
 0x14e   : > { %772 = vmatmul.f32.gmra.mxu2 %v3307_v15  ;;  %v959_v15 = vld [vmem:[#allocation7 + $0x1b8] sm:$0xff] }
 0x14f   : > { %1201 = vmatpush.msrb.mxu2 %v960_v21 }
 0x151   : > { %v502_v28 = vpop.f32.mrf.mxu0  ;;  %1202 = vmatpush.msrb.mxu2 %v959_v15 }
 0x152   : > { %v615_v32 = vpop.f32.mrf.mxu1 }
 0x153   : > { %v616_v49 = vadd.f32 %v615_v32, %v502_v28  ;;  %1203 = vmatpush.msrb.mxu2 %v958_v7  ;;  %v3594_v28 = vpop.f32.mrf.mxu2  ;;  %v3600_v7 = vld [vmem:[%s3253_s8 + $0x1d0] sm:$0xff] }
 0x154   : > { %549 = vmatmul.f32.gmra.mxu0 %v3580_v24  ;;  %4832 = vst [vmem:[#allocation26_spill] sm:$0xff] %v3600_v7 }
 0x155   : > { %662 = vmatmul.f32.gmra.mxu1 %v3583_v40  ;;  %840 = vmatmul.f32.gmra.mxu3 %v616_v49  ;;  %v954_v49 = vld [vmem:[#allocation7 + $0x190] sm:$0xff] }
 0x156   : > { %775 = vmatmul.f32.gmra.mxu2 %v3299_v12  ;;  %v955_v12 = vld [vmem:[#allocation7 + $0x198] sm:$0xff] }
 0x157   : > { %1204 = vmatpush.msrb.mxu2 %v957_v19 }
 0x159   : > { %v505_v2 = vpop.f32.mrf.mxu0  ;;  %1205 = vmatpush.msrb.mxu2 %v956_v14 }
 0x15a   : > { %v618_v30 = vpop.f32.mrf.mxu1 }
 0x15b   : > { %v619_v32 = vadd.f32 %v618_v30, %v505_v2  ;;  %1206 = vmatpush.msrb.mxu2 %v955_v12  ;;  %v3603_v2 = vld [vmem:[%s3253_s8 + $0x1d8] sm:$0xff]  ;;  %v953_v30 = vld [vmem:[#allocation7 + $0x188] sm:$0xff]  ;;  %v3611_v12 = vld [vmem:[%s3253_s8 + $0x1e0] sm:$0xff] }
 0x15c   : > { %552 = vmatmul.f32.gmra.mxu0 %v3589_v0  ;;  %4833 = vst [vmem:[#allocation27_spill] sm:$0xff] %v3603_v2 }
 0x15d   : > { %665 = vmatmul.f32.gmra.mxu1 %v3592_v18  ;;  %843 = vmatmul.f32.gmra.mxu3 %v619_v32  ;;  %v952_v18 = vld [vmem:[#allocation7 + $0x180] sm:$0xff]  ;;  %v3605_v32 = vpop.f32.mrf.mxu2  ;;  %4834 = vst [vmem:[#allocation28_spill] sm:$0xff] %v3611_v12 }
 0x15e   : > { %778 = vmatmul.f32.gmra.mxu2 %v3291_v8 }
 0x15f   : > { %1207 = vmatpush.msrb.mxu2 %v954_v49  ;;  %v3614_v49 = vld [vmem:[%s3253_s8 + $0x1e8] sm:$0xff] }
 0x160   : > { %4835 = vst [vmem:[#allocation29_spill] sm:$0xff] %v3614_v49 }
 0x161   : > { %v508_v21 = vpop.f32.mrf.mxu0  ;;  %1208 = vmatpush.msrb.mxu2 %v953_v30 }
 0x162   : > { %v621_v15 = vpop.f32.mrf.mxu1 }
 0x163   : > { %v622_v19 = vadd.f32 %v621_v15, %v508_v21  ;;  %1209 = vmatpush.msrb.mxu2 %v952_v18 }
 0x164   : > { %555 = vmatmul.f32.gmra.mxu0 %v3600_v7 }
 0x165   : > { %668 = vmatmul.f32.gmra.mxu1 %v3603_v2  ;;  %846 = vmatmul.f32.gmra.mxu3 %v622_v19  ;;  %v3618_v15 = vpop.f32.mrf.mxu2  ;;  %v3622_v19 = vld [vmem:[%s3253_s8 + $0x1f0] sm:$0xff] }
 0x166   : > { %781 = vmatmul.f32.gmra.mxu2 %v3283_v5  ;;  %4836 = vst [vmem:[#allocation30_spill] sm:$0xff] %v3622_v19  ;;  %v3625_v5 = vld [vmem:[%s3253_s8 + $0x1f8] sm:$0xff] }
 0x167   : > { %4837 = vst [vmem:[#allocation31_spill] sm:$0xff] %v3625_v5 }
 0x169   : > { %v511_v8 = vpop.f32.mrf.mxu0 }
 0x16a   : > { %v624_v14 = vpop.f32.mrf.mxu1 }
 0x16b   : > { %v625_v21 = vadd.f32 %v624_v14, %v511_v8 }
 0x16c   : > { %558 = vmatmul.f32.gmra.mxu0 %v3611_v12 }
 0x16d   : > { %671 = vmatmul.f32.gmra.mxu1 %v3614_v49  ;;  %849 = vmatmul.f32.gmra.mxu3 %v625_v21  ;;  %v3629_v8 = vpop.f32.mrf.mxu2 }
 0x16e   : > { %784 = vmatmul.f32.gmra.mxu2 %v3277_v3 }
 0x171   : > { %v514_v30 = vpop.f32.mrf.mxu0 }
 0x172   : > { %v627_v18 = vpop.f32.mrf.mxu1 }
 0x173   : > { %v628_v2 = vadd.f32 %v627_v18, %v514_v30 }
 0x174   : > { %561 = vmatmul.f32.gmra.mxu0 %v3622_v19 }
 0x175   : > { %674 = vmatmul.f32.gmra.mxu1 %v3625_v5  ;;  %852 = vmatmul.f32.gmra.mxu3 %v628_v2  ;;  %v3635_v30 = vpop.f32.mrf.mxu2 }
 0x176   : > { %787 = vmatmul.f32.gmra.mxu2 %v3269_v1 }
 0x179   : > { %v517_v14 = vpop.f32.mrf.mxu0 }
 0x17a   : > { %v630_v21 = vpop.f32.mrf.mxu1 }
 0x17b   : > { %v631_v49 = vadd.f32 %v630_v21, %v517_v14 }
 0x17d   : > { %855 = vmatmul.f32.gmra.mxu3 %v631_v49 }
 0x180   : > { %v808_v3 = vpop.f32.mrf.mxu3 }
 0x181   : > { %v3633_v40 = vadd.f32 %v808_v3, %v3479_v13  ;;  %v520_v59 = vpop.f32.mrf.mxu0  ;;  %v3644_v3 = vpop.f32.mrf.mxu2 }
 0x182   : > { %v633_v39 = vpop.f32.mrf.mxu1 }
 0x183   : > { %v634_v18 = vadd.f32 %v633_v39, %v520_v59  ;;  %v4744_v5 = vmax.f32 %v3633_v40, 0.0 }
 0x185   : > { %858 = vmatmul.f32.gmra.mxu3 %v634_v18  ;;  %1210 = vmatmul.f32.vlgmr.msrb.gmra.mxu2 %v4744_v5 }
 0x188   : > { %v811_v1 = vpop.f32.mrf.mxu3 }
 0x189   : > { %v3641_v2 = vadd.f32 %v811_v1, %v3487_v26  ;;  %v523_v49 = vpop.f32.mrf.mxu0  ;;  %v3654_v1 = vpop.f32.mrf.mxu2 }
 0x18a   : > { %v636_v14 = vpop.f32.mrf.mxu1 }
 0x18b   : > { %v637_v21 = vadd.f32 %v636_v14, %v523_v49  ;;  %v4746_v13 = vmax.f32 %v3641_v2, 0.0 }
 0x18d   : > { %861 = vmatmul.f32.gmra.mxu3 %v637_v21  ;;  %1213 = vmatmul.f32.gmra.mxu2 %v4746_v13 }
 0x190   : > { %v814_v39 = vpop.f32.mrf.mxu3 }
 0x191   : > { %v3649_v59 = vadd.f32 %v814_v39, %v3497_v34  ;;  %v526_v18 = vpop.f32.mrf.mxu0 }
 0x192   : > { %v639_v5 = vpop.f32.mrf.mxu1 }
 0x193   : > { %v640_v23 = vadd.f32 %v639_v5, %v526_v18  ;;  %v4748_v26 = vmax.f32 %v3649_v59, 0.0  ;;  %v3662_v5 = vpop.f32.mrf.mxu2 }
 0x195   : > { %864 = vmatmul.f32.gmra.mxu3 %v640_v23  ;;  %1216 = vmatmul.f32.gmra.mxu2 %v4748_v26 }
 0x198   : > { %v817_v49 = vpop.f32.mrf.mxu3 }
 0x199   : > { %v3657_v14 = vadd.f32 %v817_v49, %v3508_v41  ;;  %v529_v21 = vpop.f32.mrf.mxu0 }
 0x19a   : > { %v642_v13 = vpop.f32.mrf.mxu1 }
 0x19b   : > { %v643_v10 = vadd.f32 %v642_v13, %v529_v21  ;;  %v4750_v34 = vmax.f32 %v3657_v14, 0.0 }
 0x19d   : > { %867 = vmatmul.f32.gmra.mxu3 %v643_v10  ;;  %1219 = vmatmul.f32.gmra.mxu2 %v4750_v34  ;;  %v3673_v34 = vpop.f32.mrf.mxu2 }
 0x1a0   : > { %v820_v23 = vpop.f32.mrf.mxu3 }
 0x1a1   : > { %v3665_v39 = vadd.f32 %v820_v23, %v3519_v51  ;;  %v532_v18 = vpop.f32.mrf.mxu0 }
 0x1a2   : > { %v645_v26 = vpop.f32.mrf.mxu1 }
 0x1a3   : > { %v646_v4 = vadd.f32 %v645_v26, %v532_v18  ;;  %v4752_v41 = vmax.f32 %v3665_v39, 0.0 }
 0x1a5   : > { %870 = vmatmul.f32.gmra.mxu3 %v646_v4  ;;  %1222 = vmatmul.f32.gmra.mxu2 %v4752_v41 }
 0x1a8   : > { %v823_v13 = vpop.f32.mrf.mxu3 }
 0x1a9   : > { %v3671_v10 = vadd.f32 %v823_v13, %v3530_v61  ;;  %v535_v49 = vpop.f32.mrf.mxu0  ;;  %v3682_v13 = vpop.f32.mrf.mxu2 }
 0x1aa   : > { %v648_v21 = vpop.f32.mrf.mxu1 }
 0x1ab   : > { %v649_v47 = vadd.f32 %v648_v21, %v535_v49  ;;  %v4753_v51 = vmax.f32 %v3671_v10, 0.0 }
 0x1ad   : > { %873 = vmatmul.f32.gmra.mxu3 %v649_v47  ;;  %1225 = vmatmul.f32.gmra.mxu2 %v4753_v51 }
 0x1b0   : > { %v826_v26 = vpop.f32.mrf.mxu3 }
 0x1b1   : > { %v3679_v4 = vadd.f32 %v826_v26, %v3541_v16  ;;  %v538_v23 = vpop.f32.mrf.mxu0  ;;  %v3692_v26 = vpop.f32.mrf.mxu2 }
 0x1b2   : > { %v651_v18 = vpop.f32.mrf.mxu1 }
 0x1b3   : > { %v652_v41 = vadd.f32 %v651_v18, %v538_v23  ;;  %v4755_v61 = vmax.f32 %v3679_v4, 0.0 }
 0x1b5   : > { %876 = vmatmul.f32.gmra.mxu3 %v652_v41  ;;  %1228 = vmatmul.f32.gmra.mxu2 %v4755_v61 }
 0x1b8   : > { %v829_v49 = vpop.f32.mrf.mxu3 }
 0x1b9   : > { %v3687_v47 = vadd.f32 %v829_v49, %v3554_v20  ;;  %v541_v21 = vpop.f32.mrf.mxu0 }
 0x1ba   : > { %v654_v51 = vpop.f32.mrf.mxu1 }
 0x1bb   : > { %v655_v38 = vadd.f32 %v654_v51, %v541_v21  ;;  %v4757_v16 = vmax.f32 %v3687_v47, 0.0  ;;  %v3700_v51 = vpop.f32.mrf.mxu2 }
 0x1bd   : > { %879 = vmatmul.f32.gmra.mxu3 %v655_v38  ;;  %1231 = vmatmul.f32.gmra.mxu2 %v4757_v16 }
 0x1c0   : > { %v832_v23 = vpop.f32.mrf.mxu3 }
 0x1c1   : > { %v3695_v41 = vadd.f32 %v832_v23, %v3565_v36  ;;  %v544_v18 = vpop.f32.mrf.mxu0 }
 0x1c2   : > { %v657_v61 = vpop.f32.mrf.mxu1 }
 0x1c3   : > { %v658_v42 = vadd.f32 %v657_v61, %v544_v18  ;;  %v4759_v20 = vmax.f32 %v3695_v41, 0.0 }
 0x1c5   : > { %882 = vmatmul.f32.gmra.mxu3 %v658_v42  ;;  %1234 = vmatmul.f32.gmra.mxu2 %v4759_v20  ;;  %v3709_v20 = vpop.f32.mrf.mxu2 }
 0x1c8   : > { %v835_v38 = vpop.f32.mrf.mxu3 }
 0x1c9   : > { %v3703_v49 = vadd.f32 %v835_v38, %v3576_v27  ;;  %v547_v21 = vpop.f32.mrf.mxu0 }
 0x1ca   : > { %v660_v16 = vpop.f32.mrf.mxu1 }
 0x1cb   : > { %v661_v19 = vadd.f32 %v660_v16, %v547_v21  ;;  %v4764_v36 = vmax.f32 %v3703_v49, 0.0 }
 0x1cd   : > { %885 = vmatmul.f32.gmra.mxu3 %v661_v19  ;;  %1237 = vmatmul.f32.gmra.mxu2 %v4764_v36  ;;  %v3712_v24 = vpop.f32.mrf.mxu2 }
 0x1d0   : > { %v838_v61 = vpop.f32.mrf.mxu3 }
 0x1d1   : > { %v839_v42 = vadd.f32 %v838_v61, %v3594_v28  ;;  %v550_v23 = vpop.f32.mrf.mxu0 }
 0x1d2   : > { %v663_v18 = vpop.f32.mrf.mxu1 }
 0x1d3   : > { %v664_v12 = vadd.f32 %v663_v18, %v550_v23  ;;  %v914_v7 = vmax.f32 %v839_v42, 0.0 }
 0x1d5   : > { %888 = vmatmul.f32.gmra.mxu3 %v664_v12  ;;  %1240 = vmatmul.f32.gmra.mxu2 %v914_v7  ;;  %v3715_v12 = vpop.f32.mrf.mxu2 }
 0x1d8   : > { %v841_v27 = vpop.f32.mrf.mxu3 }
 0x1d9   : > { %v842_v16 = vadd.f32 %v841_v27, %v3605_v32  ;;  %v553_v38 = vpop.f32.mrf.mxu0 }
 0x1da   : > { %v666_v21 = vpop.f32.mrf.mxu1 }
 0x1db   : > { %v667_v19 = vadd.f32 %v666_v21, %v553_v38  ;;  %v915_v0 = vmax.f32 %v842_v16, 0.0 }
 0x1dd   : > { %891 = vmatmul.f32.gmra.mxu3 %v667_v19  ;;  %1243 = vmatmul.f32.gmra.mxu2 %v915_v0  ;;  %v3718_v19 = vpop.f32.mrf.mxu2 }
 0x1e0   : > { %v844_v28 = vpop.f32.mrf.mxu3 }
 0x1e1   : > { %v845_v61 = vadd.f32 %v844_v28, %v3618_v15  ;;  %v556_v36 = vpop.f32.mrf.mxu0 }
 0x1e2   : > { %v669_v33 = vpop.f32.mrf.mxu1 }
 0x1e3   : > { %v670_v23 = vadd.f32 %v669_v33, %v556_v36  ;;  %v916_v42 = vmax.f32 %v845_v61, 0.0 }
 0x1e5   : > { %894 = vmatmul.f32.gmra.mxu3 %v670_v23  ;;  %1246 = vmatmul.f32.gmra.mxu2 %v916_v42 }
 0x1e8   : > { %v847_v32 = vpop.f32.mrf.mxu3 }
 0x1e9   : > { %v848_v18 = vadd.f32 %v847_v32, %v3629_v8  ;;  %v559_v27 = vpop.f32.mrf.mxu0  ;;  %v3722_v32 = vpop.f32.mrf.mxu2 }
 0x1ea   : > { %v672_v16 = vpop.f32.mrf.mxu1 }
 0x1eb   : > { %v673_v38 = vadd.f32 %v672_v16, %v559_v27  ;;  %v917_v21 = vmax.f32 %v848_v18, 0.0 }
 0x1ed   : > { %897 = vmatmul.f32.gmra.mxu3 %v673_v38  ;;  %1249 = vmatmul.f32.gmra.mxu2 %v917_v21 }
 0x1f0   : > { %v850_v15 = vpop.f32.mrf.mxu3 }
 0x1f1   : > { %v851_v28 = vadd.f32 %v850_v15, %v3635_v30  ;;  %v562_v33 = vpop.f32.mrf.mxu0  ;;  %v3728_v38 = vpop.f32.mrf.mxu2  ;;  %v4838_v15 = vmax.f32 %v3703_v49, 0.0 }
 0x1f2   : > { %v675_v36 = vpop.f32.mrf.mxu1 }
 0x1f3   : > { %v676_v61 = vadd.f32 %v675_v36, %v562_v33  ;;  %v918_v23 = vmax.f32 %v851_v28, 0.0  ;;  %v4842_v28 = vmax.f32 %v3671_v10, 0.0  ;;  %v4844_v33 = vmax.f32 %v3657_v14, 0.0 }
 0x1f4   : > { %v4846_v10 = vmax.f32 %v3641_v2, 0.0 }
 0x1f5   : > { %900 = vmatmul.f32.gmra.mxu3 %v676_v61  ;;  %1252 = vmatmul.f32.gmra.mxu2 %v918_v23 }
 0x1f8   : > { %v853_v35 = vpop.f32.mrf.mxu3 }
 0x1f9   : > { %v854_v8 = vadd.f32 %v853_v35, %v3644_v3 }
 0x1fb   : > { %v919_v27 = vmax.f32 %v854_v8, 0.0 }
 0x1fd   : > { %968 = vmatpush.msrb.mxu0 %v919_v27  ;;  %1255 = vmatmul.f32.gmra.mxu2 %v919_v27 }
 0x1ff   : > { %969 = vmatpush.msrb.mxu0 %v918_v23  ;;  %v4847_v23 = vmax.f32 %v3633_v40, 0.0 }
 0x200   : > { %v856_v18 = vpop.f32.mrf.mxu3 }
 0x201   : > { %v3725_v16 = vadd.f32 %v856_v18, %v3654_v1  ;;  %970 = vmatpush.msrb.mxu0 %v917_v21  ;;  %v4839_v21 = vmax.f32 %v3695_v41, 0.0 }
 0x203   : > { %v920_v30 = vmax.f32 %v3725_v16, 0.0  ;;  %971 = vmatpush.msrb.mxu0 %v916_v42  ;;  %v4840_v42 = vmax.f32 %v3687_v47, 0.0  ;;  %v4843_v47 = vmax.f32 %v3665_v39, 0.0  ;;  %v948_v16 = vld [vmem:[#allocation7 + $0x160] sm:$0xff] }
 0x205   : > { %972 = vmatpush.msrb.mxu0 %v915_v0  ;;  %1258 = vmatmul.f32.gmra.mxu2 %v920_v30  ;;  %v3744_v0 = vpop.f32.mrf.mxu2 }
 0x207   : > { %973 = vmatpush.msrb.mxu0 %v914_v7  ;;  %v4841_v7 = vmax.f32 %v3679_v4, 0.0  ;;  %v4845_v4 = vmax.f32 %v3649_v59, 0.0 }
 0x208   : > { %v859_v35 = vpop.f32.mrf.mxu3 }
 0x209   : > { %v3733_v3 = vadd.f32 %v859_v35, %v3662_v5  ;;  %974 = vmatpush.msrb.mxu0 %v4838_v15 }
 0x20b   : > { %v921_v1 = vmax.f32 %v3733_v3, 0.0  ;;  %975 = vmatpush.msrb.mxu0 %v4839_v21  ;;  %v946_v3 = vld [vmem:[#allocation7 + $0x150] sm:$0xff] }
 0x20d   : > { %976 = vmatpush.msrb.mxu0 %v4840_v42  ;;  %1261 = vmatmul.f32.gmra.mxu2 %v921_v1 }
 0x20f   : > { %977 = vmatpush.msrb.mxu0 %v4841_v7 }
 0x210   : > { %v862_v5 = vpop.f32.mrf.mxu3 }
 0x211   : > { %v3749_v49 = vadd.f32 %v862_v5, %v3673_v34  ;;  %978 = vmatpush.msrb.mxu0 %v4842_v28  ;;  %v782_v34 = vpop.f32.mrf.mxu2 }
 0x213   : > { %v922_v41 = vmax.f32 %v3749_v49, 0.0  ;;  %979 = vmatpush.msrb.mxu0 %v4843_v47  ;;  %v3891_v49 = vld [vmem:[%s3253_s8 + $0xa8] sm:$0xff] }
 0x215   : > { %980 = vmatpush.msrb.mxu0 %v4844_v33  ;;  %1264 = vmatmul.f32.gmra.mxu2 %v922_v41 }
 0x217   : > { %981 = vmatpush.msrb.mxu0 %v4845_v4 }
 0x218   : > { %v865_v36 = vpop.f32.mrf.mxu3 }
 0x219   : > { %v3763_v61 = vadd.f32 %v865_v36, %v3682_v13  ;;  %982 = vmatpush.msrb.mxu0 %v4846_v10  ;;  %v785_v8 = vpop.f32.mrf.mxu2 }
 0x21b   : > { %v923_v39 = vmax.f32 %v3763_v61, 0.0  ;;  %983 = vmatpush.msrb.mxu0 %v4847_v23  ;;  %v941_v61 = vld [vmem:[#allocation7 + $0x128] sm:$0xff] }
 0x21c   : > { %984 = vmatmul.f32.vlgmr.msrb.gmra.mxu0 %v3378_v46 }
 0x21d   : > { %1267 = vmatmul.f32.gmra.mxu2 %v923_v39 }
 0x220   : > { %v868_v59 = vpop.f32.mrf.mxu3 }
 0x221   : > { %v3774_v14 = vadd.f32 %v868_v59, %v3692_v26  ;;  %v788_v27 = vpop.f32.mrf.mxu2 }
 0x223   : > { %v924_v13 = vmax.f32 %v3774_v14, 0.0  ;;  %v3895_v14 = vld [vmem:[%s3253_s8 + $0xb8] sm:$0xff] }
 0x224   : > { %987 = vmatmul.f32.gmra.mxu0 %v3384_v50 }
 0x225   : > { %1270 = vmatmul.f32.gmra.mxu2 %v924_v13 }
 0x228   : > { %v871_v2 = vpop.f32.mrf.mxu3 }
 0x229   : > { %v3781_v40 = vadd.f32 %v871_v2, %v3700_v51  ;;  %v3794_v51 = vpop.f32.mrf.mxu2 }
 0x22b   : > { %v925_v46 = vmax.f32 %v3781_v40, 0.0 }
 0x22c   : > { %990 = vmatmul.f32.gmra.mxu0 %v3389_v52 }
 0x22d   : > { %1273 = vmatmul.f32.gmra.mxu2 %v925_v46 }
 0x230   : > { %v874_v26 = vpop.f32.mrf.mxu3 }
 0x231   : > { %v3788_v18 = vadd.f32 %v874_v26, %v3709_v20  ;;  %v3798_v42 = vpop.f32.mrf.mxu2 }
 0x233   : > { %v926_v50 = vmax.f32 %v3788_v18, 0.0  ;;  %v3900_v18 = vld [vmem:[%s3253_s8 + $0xc8] sm:$0xff] }
 0x234   : > { %993 = vmatmul.f32.gmra.mxu0 %v3394_v54 }
 0x235   : > { %1276 = vmatmul.f32.gmra.mxu2 %v926_v50 }
 0x238   : > { %v877_v35 = vpop.f32.mrf.mxu3 }
 0x239   : > { %v878_v52 = vadd.f32 %v877_v35, %v3712_v24  ;;  %v3803_v28 = vpop.f32.mrf.mxu2 }
 0x23b   : > { %v927_v15 = vmax.f32 %v878_v52, 0.0 }
 0x23c   : > { %996 = vmatmul.f32.gmra.mxu0 %v3399_v56 }
 0x23d   : > { %1279 = vmatmul.f32.gmra.mxu2 %v927_v15 }
 0x240   : > { %v880_v21 = vpop.f32.mrf.mxu3 }
 0x241   : > { %v881_v20 = vadd.f32 %v880_v21, %v3715_v12  ;;  %v3808_v12 = vpop.f32.mrf.mxu2 }
 0x243   : > { %v928_v7 = vmax.f32 %v881_v20, 0.0  ;;  %v3905_v20 = vld [vmem:[%s3253_s8 + $0xd8] sm:$0xff] }
 0x244   : > { %999 = vmatmul.f32.gmra.mxu0 %v3404_v58 }
 0x245   : > { %1282 = vmatmul.f32.gmra.mxu2 %v928_v7 }
 0x248   : > { %v883_v54 = vpop.f32.mrf.mxu3 }
 0x249   : > { %v884_v5 = vadd.f32 %v883_v54, %v3718_v19  ;;  %v3812_v19 = vpop.f32.mrf.mxu2  ;;  %v3910_v54 = vld [vmem:[%s3253_s8 + $0xe8] sm:$0xff] }
 0x24b   : > { %v929_v47 = vmax.f32 %v884_v5, 0.0 }
 0x24c   : > { %1002 = vmatmul.f32.gmra.mxu0 %v3410_v60 }
 0x24d   : > { %1285 = vmatmul.f32.gmra.mxu2 %v929_v47 }
 0x250   : > { %v886_v56 = vpop.f32.mrf.mxu3 }
 0x251   : > { %v887_v24 = vadd.f32 %v886_v56, %v3722_v32  ;;  %v3816_v32 = vpop.f32.mrf.mxu2  ;;  %v3915_v56 = vld [vmem:[%s3253_s8 + $0xf8] sm:$0xff] }
 0x253   : > { %v930_v33 = vmax.f32 %v887_v24, 0.0 }
 0x254   : > { %1005 = vmatmul.f32.gmra.mxu0 %v3416_v62 }
 0x255   : > { %1288 = vmatmul.f32.gmra.mxu2 %v930_v33 }
 0x258   : > { %v889_v58 = vpop.f32.mrf.mxu3 }
 0x259   : > { %v890_v4 = vadd.f32 %v889_v58, %v3728_v38  ;;  %v3819_v26 = vpop.f32.mrf.mxu2 }
 0x25b   : > { %v931_v36 = vmax.f32 %v890_v4, 0.0 }
 0x25c   : > { %1008 = vmatmul.f32.gmra.mxu0 %v3422_v6 }
 0x25d   : > { %1291 = vmatmul.f32.gmra.mxu2 %v931_v36 }
 0x260   : > { %v892_v60 = vpop.f32.mrf.mxu3 }
 0x261   : > { %v893_v10 = vadd.f32 %v892_v60, %v3744_v0  ;;  %v3823_v21 = vpop.f32.mrf.mxu2 }
 0x263   : > { %v932_v23 = vmax.f32 %v893_v10, 0.0  ;;  %v4852_v10 = vld [vmem:[#allocation26_spill] sm:$0xff] }
 0x264   : > { %1011 = vmatmul.f32.gmra.mxu0 %v3428_v22 }
 0x265   : > { %1294 = vmatmul.f32.gmra.mxu2 %v932_v23 }
 0x268   : > { %v895_v62 = vpop.f32.mrf.mxu3 }
 0x269   : > { %v896_v59 = vadd.f32 %v895_v62, %v782_v34  ;;  %v942_v34 = vld [vmem:[#allocation7 + $0x130] sm:$0xff] }
 0x26b   : > { %v933_v2 = vmax.f32 %v896_v59, 0.0  ;;  %v3925_v59 = vld [vmem:[%s3253_s8 + $0x118] sm:$0xff] }
 0x26c   : > { %1014 = vmatmul.f32.gmra.mxu0 %v3434_v29  ;;  %v3843_v29 = vld [vmem:[%s3253_s8 + $0x8] sm:$0xff] }
 0x26d   : > { %1297 = vmatmul.f32.gmra.mxu2 %v933_v2 }
 0x270   : > { %v898_v38 = vpop.f32.mrf.mxu3 }
 0x271   : > { %v899_v6 = vadd.f32 %v898_v38, %v785_v8  ;;  %v939_v8 = vld [vmem:[#allocation7 + $0x118] sm:$0xff]  ;;  %v4853_v38 = vld [vmem:[#allocation28_spill] sm:$0xff] }
 0x273   : > { %v934_v35 = vmax.f32 %v899_v6, 0.0 }
 0x274   : > { %1017 = vmatmul.f32.gmra.mxu0 %v3440_v37  ;;  %v3848_v37 = vld [vmem:[%s3253_s8 + $0x18] sm:$0xff] }
 0x275   : > { %1300 = vmatmul.f32.gmra.mxu2 %v934_v35 }
 0x278   : > { %v901_v0 = vpop.f32.mrf.mxu3 }
 0x279   : > { %v902_v52 = vadd.f32 %v901_v0, %v788_v27  ;;  %v936_v27 = vld [vmem:[#allocation7 + $0x100] sm:$0xff]  ;;  %v3930_v0 = vld [vmem:[%s3253_s8 + $0x128] sm:$0xff] }
 0x27b   : > { %v935_v22 = vmax.f32 %v902_v52, 0.0 }
 0x27c   : > { %1020 = vmatmul.f32.gmra.mxu0 %v3446_v43  ;;  %v3853_v43 = vld [vmem:[%s3253_s8 + $0x28] sm:$0xff] }
 0x27d   : > { %1081 = vmatpush.msrb.mxu1 %v935_v22  ;;  %1303 = vmatmul.f32.gmra.mxu2 %v935_v22  ;;  %v4854_v22 = vld [vmem:[#allocation30_spill] sm:$0xff] }
 0x27f   : > { %1082 = vmatpush.msrb.mxu1 %v934_v35 }
 0x281   : > { %1083 = vmatpush.msrb.mxu1 %v933_v2 }
 0x283   : > { %1084 = vmatpush.msrb.mxu1 %v932_v23 }
 0x284   : > { %1023 = vmatmul.f32.gmra.mxu0 %v3452_v48  ;;  %v3858_v48 = vld [vmem:[%s3253_s8 + $0x38] sm:$0xff] }
 0x285   : > { %1085 = vmatpush.msrb.mxu1 %v931_v36  ;;  %v3920_v36 = vld [vmem:[%s3253_s8 + $0x108] sm:$0xff] }
 0x287   : > { %1086 = vmatpush.msrb.mxu1 %v930_v33  ;;  %v4851_v33 = vld [vmem:[#allocation24_spill] sm:$0xff] }
 0x289   : > { %1087 = vmatpush.msrb.mxu1 %v929_v47  ;;  %v4850_v47 = vld [vmem:[#allocation22_spill] sm:$0xff] }
 0x28b   : > { %1088 = vmatpush.msrb.mxu1 %v928_v7  ;;  %v4849_v7 = vld [vmem:[#allocation20_spill] sm:$0xff] }
 0x28c   : > { %1026 = vmatmul.f32.gmra.mxu0 %v3458_v11  ;;  %v3863_v11 = vld [vmem:[%s3253_s8 + $0x48] sm:$0xff] }
 0x28d   : > { %1089 = vmatpush.msrb.mxu1 %v927_v15  ;;  %v4848_v15 = vld [vmem:[#allocation18_spill] sm:$0xff] }
 0x28f   : > { %1090 = vmatpush.msrb.mxu1 %v926_v50 }
 0x291   : > { %1091 = vmatpush.msrb.mxu1 %v925_v46  ;;  %v937_v46 = vld [vmem:[#allocation7 + $0x108] sm:$0xff] }
 0x293   : > { %1092 = vmatpush.msrb.mxu1 %v924_v13  ;;  %v938_v13 = vld [vmem:[#allocation7 + $0x110] sm:$0xff] }
 0x294   : > { %1029 = vmatmul.f32.gmra.mxu0 %v3464_v53  ;;  %v3868_v53 = vld [vmem:[%s3253_s8 + $0x58] sm:$0xff] }
 0x295   : > { %1093 = vmatpush.msrb.mxu1 %v923_v39  ;;  %v940_v39 = vld [vmem:[#allocation7 + $0x120] sm:$0xff] }
 0x297   : > { %1094 = vmatpush.msrb.mxu1 %v922_v41  ;;  %v943_v41 = vld [vmem:[#allocation7 + $0x138] sm:$0xff] }
 0x299   : > { %1095 = vmatpush.msrb.mxu1 %v921_v1  ;;  %v944_v1 = vld [vmem:[#allocation7 + $0x140] sm:$0xff]  ;;  %v985_v40 = vpop.f32.mrf.mxu0 }
 0x29b   : > { %1096 = vmatpush.msrb.mxu1 %v920_v30  ;;  %v947_v30 = vld [vmem:[#allocation7 + $0x158] sm:$0xff] }
 0x29c   : > { %1097 = vmatmul.f32.vlgmr.msrb.gmra.mxu1 %v3843_v29  ;;  %1032 = vmatmul.f32.gmra.mxu0 %v3470_v57  ;;  %v3873_v57 = vld [vmem:[%s3253_s8 + $0x68] sm:$0xff] }
 0x2a1   : > { %v988_v50 = vpop.f32.mrf.mxu0 }
 0x2a4   : > { %1100 = vmatmul.f32.gmra.mxu1 %v3848_v37  ;;  %1035 = vmatmul.f32.gmra.mxu0 %v3476_v9  ;;  %v3878_v9 = vld [vmem:[%s3253_s8 + $0x78] sm:$0xff] }
 0x2ac   : > { %1103 = vmatmul.f32.gmra.mxu1 %v3853_v43  ;;  %1038 = vmatmul.f32.gmra.mxu0 %v3484_v25  ;;  %v3883_v25 = vld [vmem:[%s3253_s8 + $0x88] sm:$0xff] }
 0x2b4   : > { %1106 = vmatmul.f32.gmra.mxu1 %v3858_v48  ;;  %1041 = vmatmul.f32.gmra.mxu0 %v3492_v31  ;;  %v951_v31 = vld [vmem:[#allocation7 + $0x178] sm:$0xff] }
 0x2b5   : > { %1307 = vmatpush.msrb.mxu3 %v951_v31 }
 0x2bc   : > { %1109 = vmatmul.f32.gmra.mxu1 %v3863_v11  ;;  %1044 = vmatmul.f32.gmra.mxu0 %v3503_v17  ;;  %v950_v17 = vld [vmem:[#allocation7 + $0x170] sm:$0xff] }
 0x2bd   : > { %1308 = vmatpush.msrb.mxu3 %v950_v17 }
 0x2c4   : > { %1112 = vmatmul.f32.gmra.mxu1 %v3868_v53  ;;  %1047 = vmatmul.f32.gmra.mxu0 %v3514_v44  ;;  %v949_v44 = vld [vmem:[#allocation7 + $0x168] sm:$0xff] }
 0x2c5   : > { %1309 = vmatpush.msrb.mxu3 %v949_v44  ;;  %v4855_v44 = vld [vmem:[#allocation12_spill] sm:$0xff] }
 0x2c7   : > { %1310 = vmatpush.msrb.mxu3 %v948_v16 }
 0x2c9   : > { %1311 = vmatpush.msrb.mxu3 %v947_v30 }
 0x2cb   : > { %1312 = vmatpush.msrb.mxu3 %v946_v3 }
 0x2cc   : > { %1115 = vmatmul.f32.gmra.mxu1 %v3873_v57  ;;  %1050 = vmatmul.f32.gmra.mxu0 %v3525_v55  ;;  %v3887_v55 = vld [vmem:[%s3253_s8 + $0x98] sm:$0xff] }
 0x2d4   : > { %1118 = vmatmul.f32.gmra.mxu1 %v3878_v9  ;;  %1053 = vmatmul.f32.gmra.mxu0 %v3536_v63  ;;  %v945_v63 = vld [vmem:[#allocation7 + $0x148] sm:$0xff] }
 0x2d5   : > { %1313 = vmatpush.msrb.mxu3 %v945_v63  ;;  %v4856_v63 = vld [vmem:[#allocation13_spill] sm:$0xff] }
 0x2d7   : > { %1314 = vmatpush.msrb.mxu3 %v944_v1 }
 0x2d9   : > { %1315 = vmatpush.msrb.mxu3 %v943_v41 }
 0x2db   : > { %1316 = vmatpush.msrb.mxu3 %v942_v34 }
 0x2dc   : > { %1121 = vmatmul.f32.gmra.mxu1 %v3883_v25  ;;  %1056 = vmatmul.f32.gmra.mxu0 %v3547_v45  ;;  %v991_v45 = vpop.f32.mrf.mxu0 }
 0x2dd   : > { %1317 = vmatpush.msrb.mxu3 %v941_v61  ;;  %v4857_v61 = vld [vmem:[#allocation14_spill] sm:$0xff] }
 0x2df   : > { %1318 = vmatpush.msrb.mxu3 %v940_v39 }
 0x2e1   : > { %1319 = vmatpush.msrb.mxu3 %v939_v8 }
 0x2e3   : > { %1320 = vmatpush.msrb.mxu3 %v938_v13 }
 0x2e4   : > { %1124 = vmatmul.f32.gmra.mxu1 %v3887_v55  ;;  %1059 = vmatmul.f32.gmra.mxu0 %v4848_v15  ;;  %v994_v5 = vpop.f32.mrf.mxu0  ;;  %v4859_v15 = vld [vmem:[#allocation16_spill] sm:$0xff] }
 0x2e5   : > { %1321 = vmatpush.msrb.mxu3 %v937_v46 }
 0x2e7   : > { %1322 = vmatpush.msrb.mxu3 %v936_v27 }
 0x2ec   : > { %1127 = vmatmul.f32.gmra.mxu1 %v3891_v49  ;;  %1062 = vmatmul.f32.gmra.mxu0 %v4849_v7  ;;  %v997_v24 = vpop.f32.mrf.mxu0 }
 0x2f4   : > { %1130 = vmatmul.f32.gmra.mxu1 %v3895_v14  ;;  %1065 = vmatmul.f32.gmra.mxu0 %v4850_v47  ;;  %v1000_v60 = vpop.f32.mrf.mxu0  ;;  %v4860_v47 = vld [vmem:[#allocation17_spill] sm:$0xff] }
 0x2fc   : > { %1133 = vmatmul.f32.gmra.mxu1 %v3900_v18  ;;  %1068 = vmatmul.f32.gmra.mxu0 %v4851_v33  ;;  %v1003_v2 = vpop.f32.mrf.mxu0 }
 0x304   : > { %1136 = vmatmul.f32.gmra.mxu1 %v3905_v20  ;;  %1071 = vmatmul.f32.gmra.mxu0 %v4852_v10  ;;  %v1006_v52 = vpop.f32.mrf.mxu0  ;;  %v1482_v10 = vld [vmem:[#allocation7 + $0x2f0] sm:$0xff] }
 0x30c   : > { %1139 = vmatmul.f32.gmra.mxu1 %v3910_v54  ;;  %1074 = vmatmul.f32.gmra.mxu0 %v4853_v38  ;;  %v1009_v16 = vpop.f32.mrf.mxu0 }
 0x314   : > { %1142 = vmatmul.f32.gmra.mxu1 %v3915_v56  ;;  %1077 = vmatmul.f32.gmra.mxu0 %v4854_v22  ;;  %v1012_v1 = vpop.f32.mrf.mxu0  ;;  %v1479_v22 = vld [vmem:[#allocation7 + $0x2d8] sm:$0xff] }
 0x319   : > { %v1098_v58 = vpop.f32.mrf.mxu1 }
 0x31a   : > { %v1099_v4 = vadd.f32 %v1098_v58, %v985_v40  ;;  %v4858_v40 = vld [vmem:[#allocation15_spill] sm:$0xff] }
 0x31c   : > { %1145 = vmatmul.f32.gmra.mxu1 %v3920_v36  ;;  %1323 = vmatmul.f32.vlgmr.msrb.gmra.mxu3 %v1099_v4  ;;  %v1015_v39 = vpop.f32.mrf.mxu0  ;;  %v4861_v4 = vld [vmem:[#allocation19_spill] sm:$0xff] }
 0x321   : > { %v1101_v23 = vpop.f32.mrf.mxu1 }
 0x322   : > { %v1102_v62 = vadd.f32 %v1101_v23, %v988_v50 }
 0x324   : > { %1148 = vmatmul.f32.gmra.mxu1 %v3925_v59  ;;  %1326 = vmatmul.f32.gmra.mxu3 %v1102_v62  ;;  %v1018_v46 = vpop.f32.mrf.mxu0  ;;  %v3941_v62 = vpop.f32.mrf.mxu2 }
 0x329   : > { %v1104_v6 = vpop.f32.mrf.mxu1 }
 0x32a   : > { %v1105_v35 = vadd.f32 %v1104_v6, %v991_v45 }
 0x32c   : > { %1151 = vmatmul.f32.gmra.mxu1 %v3930_v0  ;;  %1329 = vmatmul.f32.gmra.mxu3 %v1105_v35  ;;  %v1021_v45 = vpop.f32.mrf.mxu0  ;;  %v1480_v35 = vld [vmem:[#allocation7 + $0x2e0] sm:$0xff] }
 0x331   : > { %v1107_v31 = vpop.f32.mrf.mxu1 }
 0x332   : > { %v1108_v17 = vadd.f32 %v1107_v31, %v994_v5  ;;  %v1478_v31 = vld [vmem:[#allocation7 + $0x2d0] sm:$0xff] }
 0x334   : > { %1154 = vmatmul.f32.gmra.mxu1 %v4855_v44  ;;  %1332 = vmatmul.f32.gmra.mxu3 %v1108_v17  ;;  %v1477_v44 = vld [vmem:[#allocation7 + $0x2c8] sm:$0xff] }
 0x339   : > { %v1110_v30 = vpop.f32.mrf.mxu1 }
 0x33a   : > { %v1111_v3 = vadd.f32 %v1110_v30, %v997_v24  ;;  %v1024_v24 = vpop.f32.mrf.mxu0  ;;  %v3944_v30 = vpop.f32.mrf.mxu2 }
 0x33c   : > { %1157 = vmatmul.f32.gmra.mxu1 %v4856_v63  ;;  %1335 = vmatmul.f32.gmra.mxu3 %v1111_v3  ;;  %v1476_v63 = vld [vmem:[#allocation7 + $0x2c0] sm:$0xff] }
 0x341   : > { %v1113_v41 = vpop.f32.mrf.mxu1 }
 0x342   : > { %v1114_v34 = vadd.f32 %v1113_v41, %v1000_v60  ;;  %v1483_v60 = vld [vmem:[#allocation7 + $0x2f8] sm:$0xff]  ;;  %v1027_v23 = vpop.f32.mrf.mxu0 }
 0x343   : > { %1710 = vmatpush.msra.mxu2 %v1483_v60  ;;  %v1475_v41 = vld [vmem:[#allocation7 + $0x2b8] sm:$0xff] }
 0x344   : > { %1160 = vmatmul.f32.gmra.mxu1 %v4857_v61  ;;  %1338 = vmatmul.f32.gmra.mxu3 %v1114_v34  ;;  %v1474_v34 = vld [vmem:[#allocation7 + $0x2b0] sm:$0xff]  ;;  %v1473_v61 = vld [vmem:[#allocation7 + $0x2a8] sm:$0xff] }
 0x345   : > { %1711 = vmatpush.msra.mxu2 %v1482_v10 }
 0x349   : > { %v1116_v8 = vpop.f32.mrf.mxu1 }
 0x34a   : > { %v1117_v13 = vadd.f32 %v1116_v8, %v1003_v2  ;;  %v1481_v2 = vld [vmem:[#allocation7 + $0x2e8] sm:$0xff]  ;;  %v1030_v17 = vpop.f32.mrf.mxu0 }
 0x34b   : > { %1712 = vmatpush.msra.mxu2 %v1481_v2  ;;  %v4866_v2 = vld [vmem:[#allocation29_spill] sm:$0xff] }
 0x34c   : > { %1163 = vmatmul.f32.gmra.mxu1 %v4858_v40  ;;  %1341 = vmatmul.f32.gmra.mxu3 %v1117_v13  ;;  %v1472_v40 = vld [vmem:[#allocation7 + $0x2a0] sm:$0xff] }
 0x34d   : > { %1713 = vmatpush.msra.mxu2 %v1480_v35 }
 0x34f   : > { %1714 = vmatpush.msra.mxu2 %v1479_v22  ;;  %v4867_v22 = vld [vmem:[#allocation31_spill] sm:$0xff] }
 0x351   : > { %v1119_v27 = vpop.f32.mrf.mxu1  ;;  %1715 = vmatpush.msra.mxu2 %v1478_v31 }
 0x352   : > { %v1120_v50 = vadd.f32 %v1119_v27, %v1006_v52  ;;  %v4862_v52 = vld [vmem:[#allocation21_spill] sm:$0xff]  ;;  %v1033_v8 = vpop.f32.mrf.mxu0  ;;  %v3947_v27 = vpop.f32.mrf.mxu2 }
 0x353   : > { %1716 = vmatpush.msra.mxu2 %v1477_v44 }
 0x354   : > { %1166 = vmatmul.f32.gmra.mxu1 %v4859_v15  ;;  %1344 = vmatmul.f32.gmra.mxu3 %v1120_v50  ;;  %v4864_v50 = vld [vmem:[#allocation25_spill] sm:$0xff]  ;;  %v1470_v15 = vld [vmem:[#allocation7 + $0x290] sm:$0xff] }
 0x355   : > { %1717 = vmatpush.msra.mxu2 %v1476_v63 }
 0x357   : > { %1718 = vmatpush.msra.mxu2 %v1475_v41 }
 0x359   : > { %v1122_v7 = vpop.f32.mrf.mxu1  ;;  %1719 = vmatpush.msra.mxu2 %v1474_v34 }
 0x35a   : > { %v1123_v5 = vadd.f32 %v1122_v7, %v1009_v16  ;;  %v1469_v7 = vld [vmem:[#allocation7 + $0x288] sm:$0xff] }
 0x35b   : > { %1720 = vmatpush.msra.mxu2 %v1473_v61 }
 0x35c   : > { %1169 = vmatmul.f32.gmra.mxu1 %v4860_v47  ;;  %1347 = vmatmul.f32.gmra.mxu3 %v1123_v5 }
 0x35d   : > { %1721 = vmatpush.msra.mxu2 %v1472_v40 }
 0x361   : > { %v1125_v33 = vpop.f32.mrf.mxu1 }
 0x362   : > { %v1126_v58 = vadd.f32 %v1125_v33, %v1012_v1  ;;  %v4863_v1 = vld [vmem:[#allocation23_spill] sm:$0xff]  ;;  %v1468_v33 = vld [vmem:[#allocation7 + $0x280] sm:$0xff] }
 0x364   : > { %1172 = vmatmul.f32.gmra.mxu1 %v4861_v4  ;;  %1350 = vmatmul.f32.gmra.mxu3 %v1126_v58  ;;  %v1036_v58 = vpop.f32.mrf.mxu0  ;;  %v4865_v4 = vld [vmem:[#allocation27_spill] sm:$0xff] }
 0x369   : > { %v1128_v38 = vpop.f32.mrf.mxu1 }
 0x36a   : > { %v1129_v6 = vadd.f32 %v1128_v38, %v1015_v39 }
 0x36c   : > { %1175 = vmatmul.f32.gmra.mxu1 %v4862_v52  ;;  %1353 = vmatmul.f32.gmra.mxu3 %v1129_v6  ;;  %v1039_v38 = vpop.f32.mrf.mxu0 }
 0x371   : > { %v1131_v16 = vpop.f32.mrf.mxu1 }
 0x372   : > { %v1132_v3 = vadd.f32 %v1131_v16, %v1018_v46  ;;  %v1471_v46 = vld [vmem:[#allocation7 + $0x298] sm:$0xff] }
 0x373   : > { %1722 = vmatpush.msra.mxu2 %v1471_v46 }
 0x374   : > { %1178 = vmatmul.f32.gmra.mxu1 %v4863_v1  ;;  %1356 = vmatmul.f32.gmra.mxu3 %v1132_v3 }
 0x375   : > { %1723 = vmatpush.msra.mxu2 %v1470_v15 }
 0x377   : > { %1724 = vmatpush.msra.mxu2 %v1469_v7 }
 0x379   : > { %v1134_v39 = vpop.f32.mrf.mxu1  ;;  %1725 = vmatpush.msra.mxu2 %v1468_v33 }
 0x37a   : > { %v1135_v13 = vadd.f32 %v1134_v39, %v1021_v45  ;;  %v3951_v45 = vpop.f32.mrf.mxu2 }
 0x37c   : > { %1181 = vmatmul.f32.gmra.mxu1 %v4864_v50  ;;  %1359 = vmatmul.f32.gmra.mxu3 %v1135_v13 }
 0x381   : > { %v1137_v5 = vpop.f32.mrf.mxu1 }
 0x382   : > { %v1138_v47 = vadd.f32 %v1137_v5, %v1024_v24  ;;  %v3954_v6 = vpop.f32.mrf.mxu2  ;;  %v1042_v24 = vpop.f32.mrf.mxu0 }
 0x384   : > { %1184 = vmatmul.f32.gmra.mxu1 %v4865_v4  ;;  %1362 = vmatmul.f32.gmra.mxu3 %v1138_v47 }
 0x389   : > { %v1140_v60 = vpop.f32.mrf.mxu1 }
 0x38a   : > { %v1141_v10 = vadd.f32 %v1140_v60, %v1027_v23  ;;  %v3957_v44 = vpop.f32.mrf.mxu2  ;;  %v1045_v1 = vpop.f32.mrf.mxu0 }
 0x38c   : > { %1187 = vmatmul.f32.gmra.mxu1 %v4866_v2  ;;  %1365 = vmatmul.f32.gmra.mxu3 %v1141_v10 }
 0x391   : > { %v1143_v35 = vpop.f32.mrf.mxu1 }
 0x392   : > { %v1144_v52 = vadd.f32 %v1143_v35, %v1030_v17  ;;  %v3963_v61 = vpop.f32.mrf.mxu2  ;;  %v1048_v40 = vpop.f32.mrf.mxu0 }
 0x394   : > { %1190 = vmatmul.f32.gmra.mxu1 %v4867_v22  ;;  %1368 = vmatmul.f32.gmra.mxu3 %v1144_v52 }
 0x399   : > { %v1146_v31 = vpop.f32.mrf.mxu1 }
 0x39a   : > { %v1147_v16 = vadd.f32 %v1146_v31, %v1033_v8  ;;  %v3973_v50 = vpop.f32.mrf.mxu2  ;;  %v1051_v47 = vpop.f32.mrf.mxu0 }
 0x39c   : > { %1371 = vmatmul.f32.gmra.mxu3 %v1147_v16 }
 0x39f   : > { %v1324_v3 = vpop.f32.mrf.mxu3 }
 0x3a0   : > { %v3960_v23 = vadd.f32 %v1324_v3, %v3794_v51 }
 0x3a1   : > { %v1149_v63 = vpop.f32.mrf.mxu1 }
 0x3a2   : > { %v4767_v41 = vmax.f32 %v3960_v23, 0.0  ;;  %v1150_v34 = vadd.f32 %v1149_v63, %v1036_v58  ;;  %v3981_v58 = vpop.f32.mrf.mxu2 }
 0x3a4   : > { %1374 = vmatmul.f32.gmra.mxu3 %v1150_v34  ;;  %1726 = vmatmul.f32.vlgmr.msra.gmra.mxu2 %v4767_v41 }
 0x3a7   : > { %v1327_v17 = vpop.f32.mrf.mxu3 }
 0x3a8   : > { %v3968_v39 = vadd.f32 %v1327_v17, %v3798_v42 }
 0x3a9   : > { %v1152_v8 = vpop.f32.mrf.mxu1 }
 0x3aa   : > { %v4768_v13 = vmax.f32 %v3968_v39, 0.0  ;;  %v1153_v51 = vadd.f32 %v1152_v8, %v1039_v38  ;;  %v1054_v38 = vpop.f32.mrf.mxu0  ;;  %v3992_v22 = vpop.f32.mrf.mxu2 }
 0x3ac   : > { %1377 = vmatmul.f32.gmra.mxu3 %v1153_v51  ;;  %1729 = vmatmul.f32.gmra.mxu2 %v4768_v13 }
 0x3af   : > { %v1330_v46 = vpop.f32.mrf.mxu3 }
 0x3b0   : > { %v3976_v15 = vadd.f32 %v1330_v46, %v3803_v28 }
 0x3b1   : > { %v1155_v7 = vpop.f32.mrf.mxu1 }
 0x3b2   : > { %v4769_v5 = vmax.f32 %v3976_v15, 0.0  ;;  %v1156_v42 = vadd.f32 %v1155_v7, %v1042_v24  ;;  %v1057_v63 = vpop.f32.mrf.mxu0  ;;  %v4001_v34 = vpop.f32.mrf.mxu2 }
 0x3b4   : > { %1380 = vmatmul.f32.gmra.mxu3 %v1156_v42  ;;  %1732 = vmatmul.f32.gmra.mxu2 %v4769_v5 }
 0x3b7   : > { %v1333_v33 = vpop.f32.mrf.mxu3 }
 0x3b8   : > { %v3984_v4 = vadd.f32 %v1333_v33, %v3808_v12 }
 0x3b9   : > { %v1158_v60 = vpop.f32.mrf.mxu1 }
 0x3ba   : > { %v4770_v10 = vmax.f32 %v3984_v4, 0.0  ;;  %v1159_v28 = vadd.f32 %v1158_v60, %v1045_v1  ;;  %v1060_v46 = vpop.f32.mrf.mxu0  ;;  %v4011_v7 = vpop.f32.mrf.mxu2 }
 0x3bc   : > { %1383 = vmatmul.f32.gmra.mxu3 %v1159_v28  ;;  %1735 = vmatmul.f32.gmra.mxu2 %v4770_v10 }
 0x3bf   : > { %v1336_v2 = vpop.f32.mrf.mxu3 }
 0x3c0   : > { %v3990_v35 = vadd.f32 %v1336_v2, %v3812_v19 }
 0x3c1   : > { %v1161_v52 = vpop.f32.mrf.mxu1 }
 0x3c2   : > { %v4771_v24 = vmax.f32 %v3990_v35, 0.0  ;;  %v1162_v12 = vadd.f32 %v1161_v52, %v1048_v40  ;;  %v1063_v28 = vpop.f32.mrf.mxu0 }
 0x3c4   : > { %1386 = vmatmul.f32.gmra.mxu3 %v1162_v12  ;;  %1738 = vmatmul.f32.gmra.mxu2 %v4771_v24 }
 0x3c7   : > { %v1339_v31 = vpop.f32.mrf.mxu3 }
 0x3c8   : > { %v3998_v16 = vadd.f32 %v1339_v31, %v3816_v32 }
 0x3c9   : > { %v1164_v3 = vpop.f32.mrf.mxu1 }
 0x3ca   : > { %v1425_v1 = vmax.f32 %v3998_v16, 0.0  ;;  %v1165_v19 = vadd.f32 %v1164_v3, %v1051_v47  ;;  %v4871_v16 = vmax.f32 %v3968_v39, 0.0 }
 0x3cc   : > { %1389 = vmatmul.f32.gmra.mxu3 %v1165_v19  ;;  %1741 = vmatmul.f32.gmra.mxu2 %v1425_v1 }
 0x3cf   : > { %v1342_v17 = vpop.f32.mrf.mxu3 }
 0x3d0   : > { %v4006_v8 = vadd.f32 %v1342_v17, %v3819_v26 }
 0x3d1   : > { %v1167_v51 = vpop.f32.mrf.mxu1 }
 0x3d2   : > { %v1426_v40 = vmax.f32 %v4006_v8, 0.0  ;;  %v1168_v32 = vadd.f32 %v1167_v51, %v1054_v38  ;;  %v4019_v38 = vpop.f32.mrf.mxu2  ;;  %v4870_v8 = vmax.f32 %v3976_v15, 0.0 }
 0x3d4   : > { %1392 = vmatmul.f32.gmra.mxu3 %v1168_v32  ;;  %1744 = vmatmul.f32.gmra.mxu2 %v1426_v40 }
 0x3d7   : > { %v1345_v42 = vpop.f32.mrf.mxu3 }
 0x3d8   : > { %v4014_v47 = vadd.f32 %v1345_v42, %v3823_v21 }
 0x3d9   : > { %v1170_v33 = vpop.f32.mrf.mxu1 }
 0x3da   : > { %v1427_v60 = vmax.f32 %v4014_v47, 0.0  ;;  %v1171_v26 = vadd.f32 %v1170_v33, %v1057_v63  ;;  %v1066_v63 = vpop.f32.mrf.mxu0  ;;  %v4030_v51 = vpop.f32.mrf.mxu2  ;;  %v4868_v47 = vmax.f32 %v3990_v35, 0.0  ;;  %v4872_v35 = vmax.f32 %v3960_v23, 0.0 }
 0x3dc   : > { %1395 = vmatmul.f32.gmra.mxu3 %v1171_v26  ;;  %1747 = vmatmul.f32.gmra.mxu2 %v1427_v60 }
 0x3df   : > { %v1348_v2 = vpop.f32.mrf.mxu3 }
 0x3e0   : > { %v4022_v52 = vadd.f32 %v1348_v2, %v3941_v62 }
 0x3e1   : > { %v1173_v12 = vpop.f32.mrf.mxu1 }
 0x3e2   : > { %v1428_v31 = vmax.f32 %v4022_v52, 0.0  ;;  %v1174_v21 = vadd.f32 %v1173_v12, %v1060_v46  ;;  %v1069_v26 = vpop.f32.mrf.mxu0 }
 0x3e4   : > { %1398 = vmatmul.f32.gmra.mxu3 %v1174_v21  ;;  %1750 = vmatmul.f32.gmra.mxu2 %v1428_v31  ;;  %v4036_v21 = vpop.f32.mrf.mxu2 }
 0x3e7   : > { %v1351_v3 = vpop.f32.mrf.mxu3 }
 0x3e8   : > { %v4028_v19 = vadd.f32 %v1351_v3, %v3944_v30 }
 0x3e9   : > { %v1176_v17 = vpop.f32.mrf.mxu1 }
 0x3ea   : > { %v1429_v32 = vmax.f32 %v4028_v19, 0.0  ;;  %v1177_v62 = vadd.f32 %v1176_v17, %v1063_v28 }
 0x3ec   : > { %1401 = vmatmul.f32.gmra.mxu3 %v1177_v62  ;;  %1753 = vmatmul.f32.gmra.mxu2 %v1429_v32  ;;  %v1072_v62 = vpop.f32.mrf.mxu0  ;;  %v4039_v13 = vpop.f32.mrf.mxu2 }
 0x3ef   : > { %v1354_v46 = vpop.f32.mrf.mxu3 }
 0x3f0   : > { %v1355_v42 = vadd.f32 %v1354_v46, %v3947_v27 }
 0x3f1   : > { %v1179_v33 = vpop.f32.mrf.mxu1 }
 0x3f2   : > { %v1430_v2 = vmax.f32 %v1355_v42, 0.0  ;;  %v1180_v12 = vadd.f32 %v1179_v33, %v1066_v63 }
 0x3f4   : > { %1404 = vmatmul.f32.gmra.mxu3 %v1180_v12  ;;  %1756 = vmatmul.f32.gmra.mxu2 %v1430_v2  ;;  %v1075_v12 = vpop.f32.mrf.mxu0  ;;  %v4042_v10 = vpop.f32.mrf.mxu2 }
 0x3f7   : > { %v1357_v30 = vpop.f32.mrf.mxu3 }
 0x3f8   : > { %v1358_v3 = vadd.f32 %v1357_v30, %v3951_v45 }
 0x3f9   : > { %v1182_v41 = vpop.f32.mrf.mxu1 }
 0x3fa   : > { %v1431_v28 = vmax.f32 %v1358_v3, 0.0  ;;  %v1183_v17 = vadd.f32 %v1182_v41, %v1069_v26 }
 0x3fc   : > { %1407 = vmatmul.f32.gmra.mxu3 %v1183_v17  ;;  %1759 = vmatmul.f32.gmra.mxu2 %v1431_v28  ;;  %v1078_v17 = vpop.f32.mrf.mxu0 }
 0x3ff   : > { %v1360_v27 = vpop.f32.mrf.mxu3 }
 0x400   : > { %v1361_v46 = vadd.f32 %v1360_v27, %v3954_v6 }
 0x401   : > { %v1185_v42 = vpop.f32.mrf.mxu1 }
 0x402   : > { %v1432_v63 = vmax.f32 %v1361_v46, 0.0  ;;  %v1186_v33 = vadd.f32 %v1185_v42, %v1072_v62  ;;  %v4046_v46 = vpop.f32.mrf.mxu2 }
 0x404   : > { %1410 = vmatmul.f32.gmra.mxu3 %v1186_v33  ;;  %1762 = vmatmul.f32.gmra.mxu2 %v1432_v63 }
 0x407   : > { %v1363_v5 = vpop.f32.mrf.mxu3 }
 0x408   : > { %v1364_v45 = vadd.f32 %v1363_v5, %v3957_v44 }
 0x409   : > { %v1188_v41 = vpop.f32.mrf.mxu1 }
 0x40a   : > { %v1433_v26 = vmax.f32 %v1364_v45, 0.0  ;;  %v1189_v30 = vadd.f32 %v1188_v41, %v1075_v12  ;;  %v4049_v5 = vpop.f32.mrf.mxu2 }
 0x40c   : > { %1413 = vmatmul.f32.gmra.mxu3 %v1189_v30  ;;  %1765 = vmatmul.f32.gmra.mxu2 %v1433_v26 }
 0x40f   : > { %v1366_v3 = vpop.f32.mrf.mxu3 }
 0x410   : > { %v1367_v6 = vadd.f32 %v1366_v3, %v3963_v61 }
 0x411   : > { %v1191_v27 = vpop.f32.mrf.mxu1 }
 0x412   : > { %v1434_v62 = vmax.f32 %v1367_v6, 0.0  ;;  %v1192_v42 = vadd.f32 %v1191_v27, %v1078_v17  ;;  %v4057_v41 = vpop.f32.mrf.mxu2  ;;  %v4134_v6 = vld [vmem:[%s3253_s8 + $0x30] sm:$0xff] }
 0x414   : > { %1416 = vmatmul.f32.gmra.mxu3 %v1192_v42  ;;  %1768 = vmatmul.f32.gmra.mxu2 %v1434_v62 }
 0x417   : > { %v1369_v33 = vpop.f32.mrf.mxu3 }
 0x418   : > { %v1370_v24 = vadd.f32 %v1369_v33, %v3973_v50  ;;  %v4146_v33 = vld [vmem:[%s3253_s8 + $0x40] sm:$0xff] }
 0x41a   : > { %v1435_v44 = vmax.f32 %v1370_v24, 0.0 }
 0x41c   : > { %1484 = vmatpush.msra.mxu0 %v1435_v44  ;;  %1771 = vmatmul.f32.gmra.mxu2 %v1435_v44 }
 0x41e   : > { %1485 = vmatpush.msra.mxu0 %v1434_v62 }
 0x41f   : > { %v1372_v12 = vpop.f32.mrf.mxu3 }
 0x420   : > { %v4052_v45 = vadd.f32 %v1372_v12, %v3981_v58  ;;  %1486 = vmatpush.msra.mxu0 %v1433_v26  ;;  %v4122_v26 = vld [vmem:[%s3253_s8 + $0x20] sm:$0xff] }
 0x422   : > { %v4772_v61 = vmax.f32 %v4052_v45, 0.0  ;;  %1487 = vmatpush.msra.mxu0 %v1432_v63 }
 0x424   : > { %1488 = vmatpush.msra.mxu0 %v1431_v28  ;;  %1774 = vmatmul.f32.gmra.mxu2 %v4772_v61 }
 0x426   : > { %1489 = vmatpush.msra.mxu0 %v1430_v2  ;;  %v4073_v2 = vpop.f32.mrf.mxu2 }
 0x427   : > { %v1375_v50 = vpop.f32.mrf.mxu3 }
 0x428   : > { %v4060_v24 = vadd.f32 %v1375_v50, %v3992_v22  ;;  %1490 = vmatpush.msra.mxu0 %v1429_v32  ;;  %v4110_v32 = vld [vmem:[%s3253_s8 + $0x10] sm:$0xff] }
 0x42a   : > { %v4773_v58 = vmax.f32 %v4060_v24, 0.0  ;;  %1491 = vmatpush.msra.mxu0 %v1428_v31  ;;  %v4100_v31 = vld [vmem:[%s3253_s8] sm:$0xff] }
 0x42c   : > { %1492 = vmatpush.msra.mxu0 %v1427_v60  ;;  %1777 = vmatmul.f32.gmra.mxu2 %v4773_v58  ;;  %v4869_v60 = vmax.f32 %v3984_v4, 0.0  ;;  %v4188_v58 = vld [vmem:[%s3253_s8 + $0xa0] sm:$0xff] }
 0x42e   : > { %1493 = vmatpush.msra.mxu0 %v1426_v40 }
 0x42f   : > { %v1378_v22 = vpop.f32.mrf.mxu3 }
 0x430   : > { %v4076_v19 = vadd.f32 %v1378_v22, %v4001_v34  ;;  %1494 = vmatpush.msra.mxu0 %v1425_v1  ;;  %v4094_v1 = vpop.f32.mrf.mxu2 }
 0x432   : > { %v4774_v52 = vmax.f32 %v4076_v19, 0.0  ;;  %1495 = vmatpush.msra.mxu0 %v4868_v47  ;;  %v4155_v47 = vld [vmem:[%s3253_s8 + $0x50] sm:$0xff] }
 0x434   : > { %1496 = vmatpush.msra.mxu0 %v4869_v60  ;;  %1780 = vmatmul.f32.gmra.mxu2 %v4774_v52 }
 0x436   : > { %1497 = vmatpush.msra.mxu0 %v4870_v8 }
 0x437   : > { %v1381_v34 = vpop.f32.mrf.mxu3 }
 0x438   : > { %v4090_v40 = vadd.f32 %v1381_v34, %v4011_v7  ;;  %1498 = vmatpush.msra.mxu0 %v4871_v16  ;;  %v4113_v23 = vpop.f32.mrf.mxu2  ;;  %v4162_v16 = vld [vmem:[%s3253_s8 + $0x60] sm:$0xff] }
 0x43a   : > { %v4775_v4 = vmax.f32 %v4090_v40, 0.0  ;;  %1499 = vmatpush.msra.mxu0 %v4872_v35 }
 0x43b   : > { %1500 = vmatmul.f32.vlgmr.msra.gmra.mxu0 %v4100_v31 }
 0x43c   : > { %1783 = vmatmul.f32.gmra.mxu2 %v4775_v4  ;;  %v4195_v4 = vld [vmem:[%s3253_s8 + $0xb0] sm:$0xff] }
 0x43f   : > { %v1384_v15 = vpop.f32.mrf.mxu3 }
 0x440   : > { %v4106_v7 = vadd.f32 %v1384_v15, %v4019_v38  ;;  %v4127_v30 = vpop.f32.mrf.mxu2 }
 0x442   : > { %v4776_v39 = vmax.f32 %v4106_v7, 0.0 }
 0x443   : > { %1503 = vmatmul.f32.gmra.mxu0 %v4110_v32 }
 0x444   : > { %1786 = vmatmul.f32.gmra.mxu2 %v4776_v39 }
 0x447   : > { %v1387_v28 = vpop.f32.mrf.mxu3 }
 0x448   : > { %v4118_v63 = vadd.f32 %v1387_v28, %v4030_v51  ;;  %v4139_v27 = vpop.f32.mrf.mxu2  ;;  %v4167_v28 = vld [vmem:[%s3253_s8 + $0x70] sm:$0xff] }
 0x44a   : > { %v4777_v38 = vmax.f32 %v4118_v63, 0.0 }
 0x44b   : > { %1506 = vmatmul.f32.gmra.mxu0 %v4122_v26 }
 0x44c   : > { %1789 = vmatmul.f32.gmra.mxu2 %v4777_v38 }
 0x44f   : > { %v1390_v3 = vpop.f32.mrf.mxu3 }
 0x450   : > { %v4130_v17 = vadd.f32 %v1390_v3, %v4036_v21  ;;  %v4151_v12 = vpop.f32.mrf.mxu2 }
 0x452   : > { %v1442_v51 = vmax.f32 %v4130_v17, 0.0  ;;  %v4877_v17 = vmax.f32 %v4060_v24, 0.0  ;;  %v4245_v24 = vld [vmem:[%s3253_s8 + $0x120] sm:$0xff] }
 0x453   : > { %1509 = vmatmul.f32.gmra.mxu0 %v4134_v6 }
 0x454   : > { %1792 = vmatmul.f32.gmra.mxu2 %v1442_v51 }
 0x457   : > { %v1393_v62 = vpop.f32.mrf.mxu3 }
 0x458   : > { %v4142_v42 = vadd.f32 %v1393_v62, %v4039_v13  ;;  %v4159_v8 = vpop.f32.mrf.mxu2 }
 0x45a   : > { %v1443_v21 = vmax.f32 %v4142_v42, 0.0  ;;  %v4876_v42 = vmax.f32 %v4076_v19, 0.0  ;;  %v1465_v19 = vld [vmem:[#allocation7 + $0x268] sm:$0xff] }
 0x45b   : > { %1512 = vmatmul.f32.gmra.mxu0 %v4146_v33 }
 0x45c   : > { %1795 = vmatmul.f32.gmra.mxu2 %v1443_v21 }
 0x45f   : > { %v1396_v44 = vpop.f32.mrf.mxu3 }
 0x460   : > { %v1397_v50 = vadd.f32 %v1396_v44, %v4042_v10  ;;  %v4170_v3 = vpop.f32.mrf.mxu2 }
 0x462   : > { %v1444_v22 = vmax.f32 %v1397_v50, 0.0  ;;  %v4174_v50 = vld [vmem:[%s3253_s8 + $0x80] sm:$0xff] }
 0x463   : > { %1515 = vmatmul.f32.gmra.mxu0 %v4155_v47 }
 0x464   : > { %1798 = vmatmul.f32.gmra.mxu2 %v1444_v22 }
 0x467   : > { %v1399_v13 = vpop.f32.mrf.mxu3 }
 0x468   : > { %v1400_v60 = vadd.f32 %v1399_v13, %v4046_v46 }
 0x46a   : > { %v1445_v34 = vmax.f32 %v1400_v60, 0.0 }
 0x46b   : > { %1518 = vmatmul.f32.gmra.mxu0 %v4162_v16 }
 0x46c   : > { %1801 = vmatmul.f32.gmra.mxu2 %v1445_v34 }
 0x46f   : > { %v1402_v35 = vpop.f32.mrf.mxu3 }
 0x470   : > { %v1403_v10 = vadd.f32 %v1402_v35, %v4049_v5  ;;  %v4177_v5 = vpop.f32.mrf.mxu2 }
 0x472   : > { %v1446_v15 = vmax.f32 %v1403_v10, 0.0  ;;  %v4181_v10 = vld [vmem:[%s3253_s8 + $0x90] sm:$0xff] }
 0x473   : > { %1521 = vmatmul.f32.gmra.mxu0 %v4167_v28 }
 0x474   : > { %1804 = vmatmul.f32.gmra.mxu2 %v1446_v15 }
 0x477   : > { %v1405_v46 = vpop.f32.mrf.mxu3 }
 0x478   : > { %v1406_v62 = vadd.f32 %v1405_v46, %v4057_v41  ;;  %v4184_v46 = vpop.f32.mrf.mxu2 }
 0x47a   : > { %v1447_v44 = vmax.f32 %v1406_v62, 0.0 }
 0x47b   : > { %1524 = vmatmul.f32.gmra.mxu0 %v4174_v50 }
 0x47c   : > { %1807 = vmatmul.f32.gmra.mxu2 %v1447_v44 }
 0x47f   : > { %v1408_v13 = vpop.f32.mrf.mxu3 }
 0x480   : > { %v1409_v60 = vadd.f32 %v1408_v13, %v4073_v2 }
 0x482   : > { %v1448_v35 = vmax.f32 %v1409_v60, 0.0  ;;  %v4192_v60 = vpop.f32.mrf.mxu2 }
 0x483   : > { %1527 = vmatmul.f32.gmra.mxu0 %v4181_v10 }
 0x484   : > { %1810 = vmatmul.f32.gmra.mxu2 %v1448_v35 }
 0x487   : > { %v1411_v41 = vpop.f32.mrf.mxu3 }
 0x488   : > { %v1412_v62 = vadd.f32 %v1411_v41, %v4094_v1 }
 0x48a   : > { %v1449_v61 = vmax.f32 %v1412_v62, 0.0  ;;  %v4200_v62 = vld [vmem:[%s3253_s8 + $0xc0] sm:$0xff]  ;;  %v4203_v38 = vpop.f32.mrf.mxu2 }
 0x48b   : > { %1530 = vmatmul.f32.gmra.mxu0 %v4188_v58 }
 0x48c   : > { %1813 = vmatmul.f32.gmra.mxu2 %v1449_v61 }
 0x48f   : > { %v1414_v2 = vpop.f32.mrf.mxu3 }
 0x490   : > { %v1415_v13 = vadd.f32 %v1414_v2, %v4113_v23  ;;  %v4206_v23 = vld [vmem:[%s3253_s8 + $0xd0] sm:$0xff] }
 0x491   : > { %v1454_v2 = vld [vmem:[#allocation7 + $0x210] sm:$0xff] }
 0x492   : > { %v1450_v52 = vmax.f32 %v1415_v13, 0.0 }
 0x493   : > { %1533 = vmatmul.f32.gmra.mxu0 %v4195_v4 }
 0x494   : > { %1816 = vmatmul.f32.gmra.mxu2 %v1450_v52 }
 0x497   : > { %v1417_v39 = vpop.f32.mrf.mxu3 }
 0x498   : > { %v1418_v1 = vadd.f32 %v1417_v39, %v4127_v30  ;;  %v4210_v39 = vld [vmem:[%s3253_s8 + $0xe0] sm:$0xff]  ;;  %v4222_v30 = vld [vmem:[%s3253_s8 + $0xf0] sm:$0xff] }
 0x49a   : > { %v1451_v41 = vmax.f32 %v1418_v1, 0.0  ;;  %v4278_v1 = vld [vmem:[%s3253_s8 + $0x180] sm:$0xff] }
 0x49b   : > { %1536 = vmatmul.f32.gmra.mxu0 %v4200_v62  ;;  %4879 = vst [vmem:[#allocation18_spill] sm:$0xff] %v4278_v1 }
 0x49c   : > { %1597 = vmatpush.msra.mxu1 %v1451_v41  ;;  %1819 = vmatmul.f32.gmra.mxu2 %v1451_v41  ;;  %v1452_v41 = vld [vmem:[#allocation7 + $0x200] sm:$0xff] }
 0x49e   : > { %1598 = vmatpush.msra.mxu1 %v1450_v52  ;;  %v4874_v52 = vmax.f32 %v4106_v7, 0.0  ;;  %v4235_v7 = vld [vmem:[%s3253_s8 + $0x100] sm:$0xff] }
 0x4a0   : > { %1599 = vmatpush.msra.mxu1 %v1449_v61  ;;  %v4873_v61 = vmax.f32 %v4118_v63, 0.0  ;;  %v4878_v63 = vmax.f32 %v4052_v45, 0.0  ;;  %v4265_v45 = vld [vmem:[%s3253_s8 + $0x160] sm:$0xff] }
 0x4a2   : > { %1600 = vmatpush.msra.mxu1 %v1448_v35  ;;  %v1456_v35 = vld [vmem:[#allocation7 + $0x220] sm:$0xff] }
 0x4a3   : > { %1539 = vmatmul.f32.gmra.mxu0 %v4206_v23 }
 0x4a4   : > { %1601 = vmatpush.msra.mxu1 %v1447_v44  ;;  %v1457_v44 = vld [vmem:[#allocation7 + $0x228] sm:$0xff] }
 0x4a6   : > { %1602 = vmatpush.msra.mxu1 %v1446_v15  ;;  %v1458_v15 = vld [vmem:[#allocation7 + $0x230] sm:$0xff] }
 0x4a8   : > { %1603 = vmatpush.msra.mxu1 %v1445_v34  ;;  %v1460_v34 = vld [vmem:[#allocation7 + $0x240] sm:$0xff] }
 0x4aa   : > { %1604 = vmatpush.msra.mxu1 %v1444_v22  ;;  %v4875_v22 = vmax.f32 %v4090_v40, 0.0  ;;  %v4240_v40 = vld [vmem:[%s3253_s8 + $0x110] sm:$0xff] }
 0x4ab   : > { %1542 = vmatmul.f32.gmra.mxu0 %v4210_v39 }
 0x4ac   : > { %1605 = vmatpush.msra.mxu1 %v1443_v21  ;;  %v1462_v21 = vld [vmem:[#allocation7 + $0x250] sm:$0xff] }
 0x4ae   : > { %1606 = vmatpush.msra.mxu1 %v1442_v51  ;;  %v1464_v51 = vld [vmem:[#allocation7 + $0x260] sm:$0xff] }
 0x4b0   : > { %1607 = vmatpush.msra.mxu1 %v4873_v61 }
 0x4b2   : > { %1608 = vmatpush.msra.mxu1 %v4874_v52 }
 0x4b3   : > { %1545 = vmatmul.f32.gmra.mxu0 %v4222_v30 }
 0x4b4   : > { %1609 = vmatpush.msra.mxu1 %v4875_v22  ;;  %v4288_v22 = vld [vmem:[%s3253_s8 + $0x1a0] sm:$0xff] }
 0x4b5   : > { %4881 = vst [vmem:[#allocation22_spill] sm:$0xff] %v4288_v22 }
 0x4b6   : > { %1610 = vmatpush.msra.mxu1 %v4876_v42 }
 0x4b8   : > { %1611 = vmatpush.msra.mxu1 %v4877_v17  ;;  %v1501_v13 = vpop.f32.mrf.mxu0  ;;  %v4293_v17 = vld [vmem:[%s3253_s8 + $0x1b0] sm:$0xff] }
 0x4b9   : > { %4882 = vst [vmem:[#allocation24_spill] sm:$0xff] %v4293_v17 }
 0x4ba   : > { %1612 = vmatpush.msra.mxu1 %v4878_v63  ;;  %v4298_v63 = vld [vmem:[%s3253_s8 + $0x1c0] sm:$0xff] }
 0x4bb   : > { %1613 = vmatmul.f32.vlgmr.msra.gmra.mxu1 %v3843_v29  ;;  %1548 = vmatmul.f32.gmra.mxu0 %v4235_v7  ;;  %v4250_v29 = vld [vmem:[%s3253_s8 + $0x130] sm:$0xff]  ;;  %4883 = vst [vmem:[#allocation26_spill] sm:$0xff] %v4298_v63 }
 0x4c0   : > { %v1504_v61 = vpop.f32.mrf.mxu0 }
 0x4c3   : > { %1616 = vmatmul.f32.gmra.mxu1 %v3848_v37  ;;  %1551 = vmatmul.f32.gmra.mxu0 %v4240_v40  ;;  %v4255_v37 = vld [vmem:[%s3253_s8 + $0x140] sm:$0xff] }
 0x4c8   : > { %v1507_v52 = vpop.f32.mrf.mxu0 }
 0x4cb   : > { %1619 = vmatmul.f32.gmra.mxu1 %v3853_v43  ;;  %1554 = vmatmul.f32.gmra.mxu0 %v4245_v24  ;;  %v4260_v43 = vld [vmem:[%s3253_s8 + $0x150] sm:$0xff] }
 0x4d0   : > { %v1510_v42 = vpop.f32.mrf.mxu0 }
 0x4d3   : > { %1622 = vmatmul.f32.gmra.mxu1 %v3858_v48  ;;  %1557 = vmatmul.f32.gmra.mxu0 %v4250_v29  ;;  %v4270_v48 = vld [vmem:[%s3253_s8 + $0x170] sm:$0xff] }
 0x4db   : > { %1625 = vmatmul.f32.gmra.mxu1 %v3863_v11  ;;  %1560 = vmatmul.f32.gmra.mxu0 %v4255_v37  ;;  %v1467_v11 = vld [vmem:[#allocation7 + $0x278] sm:$0xff] }
 0x4dc   : > { %1823 = vmatpush.msra.mxu3 %v1467_v11 }
 0x4e3   : > { %1628 = vmatmul.f32.gmra.mxu1 %v3868_v53  ;;  %1563 = vmatmul.f32.gmra.mxu0 %v4260_v43  ;;  %v1466_v53 = vld [vmem:[#allocation7 + $0x270] sm:$0xff] }
 0x4e4   : > { %1824 = vmatpush.msra.mxu3 %v1466_v53  ;;  %v4303_v53 = vld [vmem:[%s3253_s8 + $0x1d0] sm:$0xff] }
 0x4e5   : > { %4884 = vst [vmem:[#allocation28_spill] sm:$0xff] %v4303_v53 }
 0x4e6   : > { %1825 = vmatpush.msra.mxu3 %v1465_v19 }
 0x4e8   : > { %1826 = vmatpush.msra.mxu3 %v1464_v51 }
 0x4eb   : > { %1631 = vmatmul.f32.gmra.mxu1 %v3873_v57  ;;  %1566 = vmatmul.f32.gmra.mxu0 %v4265_v45  ;;  %v1463_v57 = vld [vmem:[#allocation7 + $0x258] sm:$0xff] }
 0x4ec   : > { %1827 = vmatpush.msra.mxu3 %v1463_v57  ;;  %v4308_v57 = vld [vmem:[%s3253_s8 + $0x1e0] sm:$0xff] }
 0x4ed   : > { %4885 = vst [vmem:[#allocation30_spill] sm:$0xff] %v4308_v57 }
 0x4ee   : > { %1828 = vmatpush.msra.mxu3 %v1462_v21 }
 0x4f3   : > { %1634 = vmatmul.f32.gmra.mxu1 %v3878_v9  ;;  %1569 = vmatmul.f32.gmra.mxu0 %v4270_v48  ;;  %v1461_v9 = vld [vmem:[#allocation7 + $0x248] sm:$0xff] }
 0x4f4   : > { %1829 = vmatpush.msra.mxu3 %v1461_v9 }
 0x4f6   : > { %1830 = vmatpush.msra.mxu3 %v1460_v34  ;;  %v4313_v34 = vld [vmem:[%s3253_s8 + $0x1f0] sm:$0xff] }
 0x4f7   : > { %4886 = vst [vmem:[#allocation12_spill] sm:$0xff] %v4313_v34 }
 0x4fb   : > { %1637 = vmatmul.f32.gmra.mxu1 %v3883_v25  ;;  %v1459_v25 = vld [vmem:[#allocation7 + $0x238] sm:$0xff]  ;;  %1572 = vmatmul.f32.gmra.mxu0 %v4278_v1 }
 0x4fc   : > { %1831 = vmatpush.msra.mxu3 %v1459_v25 }
 0x4fe   : > { %1832 = vmatpush.msra.mxu3 %v1458_v15  ;;  %v4317_v15 = vld [vmem:[%s3253_s8 + $0x138] sm:$0xff] }
 0x4ff   : > { %4887 = vst [vmem:[#allocation13_spill] sm:$0xff] %v4317_v15 }
 0x500   : > { %1833 = vmatpush.msra.mxu3 %v1457_v44 }
 0x502   : > { %1834 = vmatpush.msra.mxu3 %v1456_v35 }
 0x503   : > { %1640 = vmatmul.f32.gmra.mxu1 %v3887_v55  ;;  %v1455_v55 = vld [vmem:[#allocation7 + $0x218] sm:$0xff] }
 0x504   : > { %1835 = vmatpush.msra.mxu3 %v1455_v55 }
 0x506   : > { %1836 = vmatpush.msra.mxu3 %v1454_v2  ;;  %v4321_v2 = vld [vmem:[%s3253_s8 + $0x148] sm:$0xff] }
 0x507   : > { %4888 = vst [vmem:[#allocation14_spill] sm:$0xff] %v4321_v2 }
 0x50b   : > { %1643 = vmatmul.f32.gmra.mxu1 %v3891_v49  ;;  %v1453_v49 = vld [vmem:[#allocation7 + $0x208] sm:$0xff] }
 0x50c   : > { %1837 = vmatpush.msra.mxu3 %v1453_v49 }
 0x50e   : > { %1838 = vmatpush.msra.mxu3 %v1452_v41  ;;  %v4325_v41 = vld [vmem:[%s3253_s8 + $0x158] sm:$0xff] }
 0x50f   : > { %4889 = vst [vmem:[#allocation15_spill] sm:$0xff] %v4325_v41 }
 0x513   : > { %1646 = vmatmul.f32.gmra.mxu1 %v3895_v14  ;;  %v4283_v14 = vld [vmem:[%s3253_s8 + $0x190] sm:$0xff] }
 0x514   : > { %4880 = vst [vmem:[#allocation20_spill] sm:$0xff] %v4283_v14  ;;  %1575 = vmatmul.f32.gmra.mxu0 %v4283_v14 }
 0x51b   : > { %1649 = vmatmul.f32.gmra.mxu1 %v3900_v18  ;;  %v1513_v18 = vpop.f32.mrf.mxu0 }
 0x51c   : > { %1578 = vmatmul.f32.gmra.mxu0 %v4288_v22 }
 0x523   : > { %1652 = vmatmul.f32.gmra.mxu1 %v3905_v20 }
 0x524   : > { %1581 = vmatmul.f32.gmra.mxu0 %v4293_v17 }
 0x52b   : > { %1655 = vmatmul.f32.gmra.mxu1 %v3910_v54  ;;  %v1516_v54 = vpop.f32.mrf.mxu0 }
 0x52c   : > { %1584 = vmatmul.f32.gmra.mxu0 %v4298_v63 }
 0x533   : > { %1658 = vmatmul.f32.gmra.mxu1 %v3915_v56  ;;  %v1519_v51 = vpop.f32.mrf.mxu0 }
 0x534   : > { %1587 = vmatmul.f32.gmra.mxu0 %v4303_v53 }
 0x538   : > { %v1614_v20 = vpop.f32.mrf.mxu1 }
 0x539   : > { %v1615_v11 = vadd.f32 %v1614_v20, %v1501_v13  ;;  %v4329_v20 = vld [vmem:[%s3253_s8 + $0x168] sm:$0xff] }
 0x53a   : > { %4890 = vst [vmem:[#allocation16_spill] sm:$0xff] %v4329_v20 }
 0x53b   : > { %1661 = vmatmul.f32.gmra.mxu1 %v3920_v36  ;;  %1839 = vmatmul.f32.vlgmr.msra.gmra.mxu3 %v1615_v11  ;;  %v1522_v9 = vpop.f32.mrf.mxu0 }
 0x53c   : > { %1590 = vmatmul.f32.gmra.mxu0 %v4308_v57 }
 0x540   : > { %v1617_v19 = vpop.f32.mrf.mxu1 }
 0x541   : > { %v1618_v56 = vadd.f32 %v1617_v19, %v1504_v61 }
 0x543   : > { %1664 = vmatmul.f32.gmra.mxu1 %v3925_v59  ;;  %1842 = vmatmul.f32.gmra.mxu3 %v1618_v56  ;;  %v1525_v44 = vpop.f32.mrf.mxu0  ;;  %v4333_v56 = vld [vmem:[%s3253_s8 + $0x178] sm:$0xff] }
 0x544   : > { %1593 = vmatmul.f32.gmra.mxu0 %v4313_v34  ;;  %4891 = vst [vmem:[#allocation17_spill] sm:$0xff] %v4333_v56 }
 0x548   : > { %v1620_v36 = vpop.f32.mrf.mxu1 }
 0x549   : > { %v1621_v21 = vadd.f32 %v1620_v36, %v1507_v52 }
 0x54b   : > { %1667 = vmatmul.f32.gmra.mxu1 %v3930_v0  ;;  %1845 = vmatmul.f32.gmra.mxu3 %v1621_v21  ;;  %v1528_v0 = vpop.f32.mrf.mxu0 }
 0x550   : > { %v1623_v25 = vpop.f32.mrf.mxu1 }
 0x551   : > { %v1624_v59 = vadd.f32 %v1623_v25, %v1510_v42  ;;  %v4337_v25 = vld [vmem:[%s3253_s8 + $0x188] sm:$0xff] }
 0x552   : > { %4892 = vst [vmem:[#allocation19_spill] sm:$0xff] %v4337_v25 }
 0x553   : > { %1670 = vmatmul.f32.gmra.mxu1 %v4317_v15  ;;  %1848 = vmatmul.f32.gmra.mxu3 %v1624_v59  ;;  %v1531_v61 = vpop.f32.mrf.mxu0 }
 0x558   : > { %v1626_v35 = vpop.f32.mrf.mxu1 }
 0x559   : > { %v1627_v55 = vadd.f32 %v1626_v35, %v1513_v18 }
 0x55b   : > { %1673 = vmatmul.f32.gmra.mxu1 %v4321_v2  ;;  %1851 = vmatmul.f32.gmra.mxu3 %v1627_v55  ;;  %v1534_v18 = vpop.f32.mrf.mxu0  ;;  %v4341_v55 = vld [vmem:[%s3253_s8 + $0x198] sm:$0xff] }
 0x55c   : > { %4893 = vst [vmem:[#allocation21_spill] sm:$0xff] %v4341_v55 }
 0x560   : > { %v1629_v13 = vpop.f32.mrf.mxu1 }
 0x561   : > { %v1630_v49 = vadd.f32 %v1629_v13, %v1516_v54  ;;  %v1998_v13 = vld [vmem:[#allocation7 + $0x3f0] sm:$0xff] }
 0x563   : > { %1676 = vmatmul.f32.gmra.mxu1 %v4325_v41  ;;  %1854 = vmatmul.f32.gmra.mxu3 %v1630_v49  ;;  %v1537_v54 = vpop.f32.mrf.mxu0 }
 0x568   : > { %v1632_v52 = vpop.f32.mrf.mxu1 }
 0x569   : > { %v1633_v42 = vadd.f32 %v1632_v52, %v1519_v51  ;;  %v1997_v52 = vld [vmem:[#allocation7 + $0x3e8] sm:$0xff] }
 0x56b   : > { %1679 = vmatmul.f32.gmra.mxu1 %v4329_v20  ;;  %1857 = vmatmul.f32.gmra.mxu3 %v1633_v42  ;;  %v1540_v51 = vpop.f32.mrf.mxu0 }
 0x570   : > { %v1635_v11 = vpop.f32.mrf.mxu1 }
 0x571   : > { %v1636_v19 = vadd.f32 %v1635_v11, %v1522_v9  ;;  %v1999_v9 = vld [vmem:[#allocation7 + $0x3f8] sm:$0xff] }
 0x572   : > { %2226 = vmatpush.msrb.mxu2 %v1999_v9 }
 0x573   : > { %1682 = vmatmul.f32.gmra.mxu1 %v4333_v56  ;;  %1860 = vmatmul.f32.gmra.mxu3 %v1636_v19  ;;  %v1543_v49 = vpop.f32.mrf.mxu0  ;;  %v1996_v19 = vld [vmem:[#allocation7 + $0x3e0] sm:$0xff] }
 0x574   : > { %2227 = vmatpush.msrb.mxu2 %v1998_v13 }
 0x576   : > { %2228 = vmatpush.msrb.mxu2 %v1997_v52 }
 0x578   : > { %v1638_v36 = vpop.f32.mrf.mxu1  ;;  %2229 = vmatpush.msrb.mxu2 %v1996_v19  ;;  %v1990_v19 = vld [vmem:[#allocation7 + $0x3b0] sm:$0xff] }
 0x579   : > { %v1639_v21 = vadd.f32 %v1638_v36, %v1525_v44  ;;  %v4344_v44 = vpop.f32.mrf.mxu2  ;;  %v1995_v36 = vld [vmem:[#allocation7 + $0x3d8] sm:$0xff] }
 0x57a   : > { %2230 = vmatpush.msrb.mxu2 %v1995_v36  ;;  %v1989_v36 = vld [vmem:[#allocation7 + $0x3a8] sm:$0xff] }
 0x57b   : > { %1685 = vmatmul.f32.gmra.mxu1 %v4337_v25  ;;  %1863 = vmatmul.f32.gmra.mxu3 %v1639_v21  ;;  %v1994_v21 = vld [vmem:[#allocation7 + $0x3d0] sm:$0xff] }
 0x57c   : > { %2231 = vmatpush.msrb.mxu2 %v1994_v21 }
 0x580   : > { %v1641_v59 = vpop.f32.mrf.mxu1 }
 0x581   : > { %v1642_v35 = vadd.f32 %v1641_v59, %v1528_v0  ;;  %v4347_v0 = vld [vmem:[%s3253_s8 + $0x1a8] sm:$0xff]  ;;  %v1546_v59 = vpop.f32.mrf.mxu0  ;;  %v4350_v13 = vpop.f32.mrf.mxu2 }
 0x582   : > { %4894 = vst [vmem:[#allocation23_spill] sm:$0xff] %v4347_v0 }
 0x583   : > { %1688 = vmatmul.f32.gmra.mxu1 %v4341_v55  ;;  %1866 = vmatmul.f32.gmra.mxu3 %v1642_v35  ;;  %v1993_v35 = vld [vmem:[#allocation7 + $0x3c8] sm:$0xff]  ;;  %v1988_v55 = vld [vmem:[#allocation7 + $0x3a0] sm:$0xff] }
 0x584   : > { %2232 = vmatpush.msrb.mxu2 %v1993_v35 }
 0x588   : > { %v1644_v42 = vpop.f32.mrf.mxu1 }
 0x589   : > { %v1645_v11 = vadd.f32 %v1644_v42, %v1531_v61  ;;  %v1992_v61 = vld [vmem:[#allocation7 + $0x3c0] sm:$0xff]  ;;  %v4353_v42 = vld [vmem:[%s3253_s8 + $0x1b8] sm:$0xff] }
 0x58a   : > { %2233 = vmatpush.msrb.mxu2 %v1992_v61  ;;  %4895 = vst [vmem:[#allocation25_spill] sm:$0xff] %v4353_v42  ;;  %v1986_v61 = vld [vmem:[#allocation7 + $0x390] sm:$0xff] }
 0x58b   : > { %1691 = vmatmul.f32.gmra.mxu1 %v4347_v0  ;;  %1869 = vmatmul.f32.gmra.mxu3 %v1645_v11  ;;  %v1991_v11 = vld [vmem:[#allocation7 + $0x3b8] sm:$0xff]  ;;  %v1549_v0 = vpop.f32.mrf.mxu0 }
 0x58c   : > { %2234 = vmatpush.msrb.mxu2 %v1991_v11  ;;  %v1985_v11 = vld [vmem:[#allocation7 + $0x388] sm:$0xff] }
 0x58e   : > { %2235 = vmatpush.msrb.mxu2 %v1990_v19 }
 0x590   : > { %v1647_v9 = vpop.f32.mrf.mxu1  ;;  %2236 = vmatpush.msrb.mxu2 %v1989_v36 }
 0x591   : > { %v1648_v52 = vadd.f32 %v1647_v9, %v1534_v18  ;;  %v4356_v18 = vpop.f32.mrf.mxu2  ;;  %v4359_v9 = vld [vmem:[%s3253_s8 + $0x1c8] sm:$0xff] }
 0x592   : > { %2237 = vmatpush.msrb.mxu2 %v1988_v55  ;;  %4896 = vst [vmem:[#allocation27_spill] sm:$0xff] %v4359_v9 }
 0x593   : > { %1694 = vmatmul.f32.gmra.mxu1 %v4353_v42  ;;  %1872 = vmatmul.f32.gmra.mxu3 %v1648_v52  ;;  %v1987_v52 = vld [vmem:[#allocation7 + $0x398] sm:$0xff]  ;;  %v1552_v55 = vpop.f32.mrf.mxu0  ;;  %v4369_v42 = vld [vmem:[%s3253_s8 + $0x1e8] sm:$0xff] }
 0x594   : > { %2238 = vmatpush.msrb.mxu2 %v1987_v52  ;;  %4898 = vst [vmem:[#allocation31_spill] sm:$0xff] %v4369_v42 }
 0x596   : > { %2239 = vmatpush.msrb.mxu2 %v1986_v61 }
 0x598   : > { %v1650_v21 = vpop.f32.mrf.mxu1  ;;  %2240 = vmatpush.msrb.mxu2 %v1985_v11 }
 0x599   : > { %v1651_v35 = vadd.f32 %v1650_v21, %v1537_v54  ;;  %v1984_v54 = vld [vmem:[#allocation7 + $0x380] sm:$0xff]  ;;  %v4363_v21 = vld [vmem:[%s3253_s8 + $0x1d8] sm:$0xff] }
 0x59a   : > { %2241 = vmatpush.msrb.mxu2 %v1984_v54  ;;  %4897 = vst [vmem:[#allocation29_spill] sm:$0xff] %v4363_v21  ;;  %v4375_v54 = vld [vmem:[%s3253_s8 + $0x1f8] sm:$0xff] }
 0x59b   : > { %1697 = vmatmul.f32.gmra.mxu1 %v4359_v9  ;;  %1875 = vmatmul.f32.gmra.mxu3 %v1651_v35  ;;  %v4366_v9 = vpop.f32.mrf.mxu2  ;;  %v1555_v61 = vpop.f32.mrf.mxu0  ;;  %4899 = vst [vmem:[#allocation32_spill] sm:$0xff] %v4375_v54 }
 0x5a0   : > { %v1653_v19 = vpop.f32.mrf.mxu1 }
 0x5a1   : > { %v1654_v36 = vadd.f32 %v1653_v19, %v1540_v51 }
 0x5a3   : > { %1700 = vmatmul.f32.gmra.mxu1 %v4363_v21  ;;  %1878 = vmatmul.f32.gmra.mxu3 %v1654_v36  ;;  %v4372_v51 = vpop.f32.mrf.mxu2  ;;  %v1558_v36 = vpop.f32.mrf.mxu0 }
 0x5a8   : > { %v1656_v35 = vpop.f32.mrf.mxu1 }
 0x5a9   : > { %v1657_v52 = vadd.f32 %v1656_v35, %v1543_v49 }
 0x5ab   : > { %1703 = vmatmul.f32.gmra.mxu1 %v4369_v42  ;;  %1881 = vmatmul.f32.gmra.mxu3 %v1657_v52  ;;  %v4378_v25 = vpop.f32.mrf.mxu2  ;;  %v1561_v56 = vpop.f32.mrf.mxu0 }
 0x5b0   : > { %v1659_v11 = vpop.f32.mrf.mxu1 }
 0x5b1   : > { %v1660_v19 = vadd.f32 %v1659_v11, %v1546_v59 }
 0x5b3   : > { %1706 = vmatmul.f32.gmra.mxu1 %v4375_v54  ;;  %1884 = vmatmul.f32.gmra.mxu3 %v1660_v19  ;;  %v4384_v11 = vpop.f32.mrf.mxu2 }
 0x5b8   : > { %v1662_v21 = vpop.f32.mrf.mxu1 }
 0x5b9   : > { %v1663_v49 = vadd.f32 %v1662_v21, %v1549_v0 }
 0x5bb   : > { %1887 = vmatmul.f32.gmra.mxu3 %v1663_v49  ;;  %v1564_v49 = vpop.f32.mrf.mxu0 }
 0x5be   : > { %v1840_v35 = vpop.f32.mrf.mxu3 }
 0x5bf   : > { %v4381_v42 = vadd.f32 %v1840_v35, %v4139_v27 }
 0x5c0   : > { %v1665_v52 = vpop.f32.mrf.mxu1 }
 0x5c1   : > { %v4788_v20 = vmax.f32 %v4381_v42, 0.0  ;;  %v1666_v59 = vadd.f32 %v1665_v52, %v1552_v55  ;;  %v4394_v55 = vpop.f32.mrf.mxu2 }
 0x5c3   : > { %1890 = vmatmul.f32.gmra.mxu3 %v1666_v59  ;;  %2242 = vmatmul.f32.vlgmr.msrb.gmra.mxu2 %v4788_v20 }
 0x5c6   : > { %v1843_v19 = vpop.f32.mrf.mxu3 }
 0x5c7   : > { %v4389_v54 = vadd.f32 %v1843_v19, %v4151_v12 }
 0x5c8   : > { %v1668_v0 = vpop.f32.mrf.mxu1 }
 0x5c9   : > { %v4789_v21 = vmax.f32 %v4389_v54, 0.0  ;;  %v1669_v27 = vadd.f32 %v1668_v0, %v1555_v61  ;;  %v1567_v61 = vpop.f32.mrf.mxu0  ;;  %v4402_v0 = vpop.f32.mrf.mxu2 }
 0x5cb   : > { %1893 = vmatmul.f32.gmra.mxu3 %v1669_v27  ;;  %2245 = vmatmul.f32.gmra.mxu2 %v4789_v21 }
 0x5ce   : > { %v1846_v35 = vpop.f32.mrf.mxu3 }
 0x5cf   : > { %v4397_v52 = vadd.f32 %v1846_v35, %v4159_v8 }
 0x5d0   : > { %v1671_v59 = vpop.f32.mrf.mxu1 }
 0x5d1   : > { %v4791_v20 = vmax.f32 %v4397_v52, 0.0  ;;  %v1672_v12 = vadd.f32 %v1671_v59, %v1558_v36  ;;  %v1570_v35 = vpop.f32.mrf.mxu0 }
 0x5d3   : > { %1896 = vmatmul.f32.gmra.mxu3 %v1672_v12  ;;  %2248 = vmatmul.f32.gmra.mxu2 %v4791_v20  ;;  %v4413_v20 = vpop.f32.mrf.mxu2 }
 0x5d6   : > { %v1849_v19 = vpop.f32.mrf.mxu3 }
 0x5d7   : > { %v4405_v27 = vadd.f32 %v1849_v19, %v4170_v3 }
 0x5d8   : > { %v1674_v21 = vpop.f32.mrf.mxu1 }
 0x5d9   : > { %v4793_v41 = vmax.f32 %v4405_v27, 0.0  ;;  %v1675_v8 = vadd.f32 %v1674_v21, %v1561_v56 }
 0x5db   : > { %1899 = vmatmul.f32.gmra.mxu3 %v1675_v8  ;;  %2251 = vmatmul.f32.gmra.mxu2 %v4793_v41  ;;  %v1573_v8 = vpop.f32.mrf.mxu0 }
 0x5de   : > { %v1852_v36 = vpop.f32.mrf.mxu3 }
 0x5df   : > { %v4411_v59 = vadd.f32 %v1852_v36, %v4177_v5  ;;  %v4422_v36 = vpop.f32.mrf.mxu2 }
 0x5e0   : > { %v1677_v12 = vpop.f32.mrf.mxu1 }
 0x5e1   : > { %v4794_v2 = vmax.f32 %v4411_v59, 0.0  ;;  %v1678_v3 = vadd.f32 %v1677_v12, %v1564_v49 }
 0x5e3   : > { %1902 = vmatmul.f32.gmra.mxu3 %v1678_v3  ;;  %2254 = vmatmul.f32.gmra.mxu2 %v4794_v2 }
 0x5e6   : > { %v1855_v56 = vpop.f32.mrf.mxu3 }
 0x5e7   : > { %v4419_v21 = vadd.f32 %v1855_v56, %v4184_v46  ;;  %v1576_v56 = vpop.f32.mrf.mxu0 }
 0x5e8   : > { %v1680_v19 = vpop.f32.mrf.mxu1 }
 0x5e9   : > { %v4795_v41 = vmax.f32 %v4419_v21, 0.0  ;;  %v1681_v5 = vadd.f32 %v1680_v19, %v1567_v61  ;;  %v4432_v61 = vpop.f32.mrf.mxu2 }
 0x5eb   : > { %1905 = vmatmul.f32.gmra.mxu3 %v1681_v5  ;;  %2257 = vmatmul.f32.gmra.mxu2 %v4795_v41 }
 0x5ee   : > { %v1858_v49 = vpop.f32.mrf.mxu3 }
 0x5ef   : > { %v4427_v12 = vadd.f32 %v1858_v49, %v4192_v60 }
 0x5f0   : > { %v1683_v3 = vpop.f32.mrf.mxu1 }
 0x5f1   : > { %v4797_v2 = vmax.f32 %v4427_v12, 0.0  ;;  %v1684_v46 = vadd.f32 %v1683_v3, %v1570_v35  ;;  %v1579_v35 = vpop.f32.mrf.mxu0  ;;  %v4440_v3 = vpop.f32.mrf.mxu2 }
 0x5f3   : > { %1908 = vmatmul.f32.gmra.mxu3 %v1684_v46  ;;  %2260 = vmatmul.f32.gmra.mxu2 %v4797_v2 }
 0x5f6   : > { %v1861_v19 = vpop.f32.mrf.mxu3 }
 0x5f7   : > { %v4435_v5 = vadd.f32 %v1861_v19, %v4203_v38 }
 0x5f8   : > { %v1686_v41 = vpop.f32.mrf.mxu1 }
 0x5f9   : > { %v4799_v15 = vmax.f32 %v4435_v5, 0.0  ;;  %v1687_v60 = vadd.f32 %v1686_v41, %v1573_v8  ;;  %v1582_v8 = vpop.f32.mrf.mxu0 }
 0x5fb   : > { %1911 = vmatmul.f32.gmra.mxu3 %v1687_v60  ;;  %2263 = vmatmul.f32.gmra.mxu2 %v4799_v15  ;;  %v4451_v15 = vpop.f32.mrf.mxu2 }
 0x5fe   : > { %v1864_v49 = vpop.f32.mrf.mxu3 }
 0x5ff   : > { %v4443_v46 = vadd.f32 %v1864_v49, %v4344_v44 }
 0x600   : > { %v1689_v2 = vpop.f32.mrf.mxu1 }
 0x601   : > { %v4801_v34 = vmax.f32 %v4443_v46, 0.0  ;;  %v1690_v38 = vadd.f32 %v1689_v2, %v1576_v56 }
 0x603   : > { %1914 = vmatmul.f32.gmra.mxu3 %v1690_v38  ;;  %2266 = vmatmul.f32.gmra.mxu2 %v4801_v34  ;;  %v1585_v38 = vpop.f32.mrf.mxu0  ;;  %v4457_v63 = vpop.f32.mrf.mxu2 }
 0x606   : > { %v1867_v41 = vpop.f32.mrf.mxu3 }
 0x607   : > { %v4449_v19 = vadd.f32 %v1867_v41, %v4350_v13 }
 0x608   : > { %v1692_v60 = vpop.f32.mrf.mxu1 }
 0x609   : > { %v4805_v57 = vmax.f32 %v4449_v19, 0.0  ;;  %v1693_v44 = vadd.f32 %v1692_v60, %v1579_v35 }
 0x60b   : > { %1917 = vmatmul.f32.gmra.mxu3 %v1693_v44  ;;  %2269 = vmatmul.f32.gmra.mxu2 %v4805_v57  ;;  %v1588_v44 = vpop.f32.mrf.mxu0  ;;  %v4460_v57 = vpop.f32.mrf.mxu2 }
 0x60e   : > { %v1870_v2 = vpop.f32.mrf.mxu3 }
 0x60f   : > { %v1871_v56 = vadd.f32 %v1870_v2, %v4356_v18 }
 0x610   : > { %v1695_v49 = vpop.f32.mrf.mxu1 }
 0x611   : > { %v1946_v34 = vmax.f32 %v1871_v56, 0.0  ;;  %v1696_v53 = vadd.f32 %v1695_v49, %v1582_v8 }
 0x613   : > { %1920 = vmatmul.f32.gmra.mxu3 %v1696_v53  ;;  %2272 = vmatmul.f32.gmra.mxu2 %v1946_v34  ;;  %v1591_v53 = vpop.f32.mrf.mxu0  ;;  %v4463_v14 = vpop.f32.mrf.mxu2 }
 0x616   : > { %v1873_v13 = vpop.f32.mrf.mxu3 }
 0x617   : > { %v1874_v41 = vadd.f32 %v1873_v13, %v4366_v9 }
 0x618   : > { %v1698_v17 = vpop.f32.mrf.mxu1 }
 0x619   : > { %v1947_v35 = vmax.f32 %v1874_v41, 0.0  ;;  %v1699_v60 = vadd.f32 %v1698_v17, %v1585_v38 }
 0x61b   : > { %1923 = vmatmul.f32.gmra.mxu3 %v1699_v60  ;;  %2275 = vmatmul.f32.gmra.mxu2 %v1947_v35  ;;  %v1594_v60 = vpop.f32.mrf.mxu0 }
 0x61e   : > { %v1876_v18 = vpop.f32.mrf.mxu3 }
 0x61f   : > { %v1877_v2 = vadd.f32 %v1876_v18, %v4372_v51 }
 0x620   : > { %v1701_v56 = vpop.f32.mrf.mxu1 }
 0x621   : > { %v1948_v8 = vmax.f32 %v1877_v2, 0.0  ;;  %v1702_v49 = vadd.f32 %v1701_v56, %v1588_v44  ;;  %v4467_v2 = vpop.f32.mrf.mxu2 }
 0x623   : > { %1926 = vmatmul.f32.gmra.mxu3 %v1702_v49  ;;  %2278 = vmatmul.f32.gmra.mxu2 %v1948_v8 }
 0x626   : > { %v1879_v22 = vpop.f32.mrf.mxu3 }
 0x627   : > { %v1880_v9 = vadd.f32 %v1879_v22, %v4378_v25 }
 0x628   : > { %v1704_v17 = vpop.f32.mrf.mxu1 }
 0x629   : > { %v1949_v38 = vmax.f32 %v1880_v9, 0.0  ;;  %v1705_v13 = vadd.f32 %v1704_v17, %v1591_v53  ;;  %v4470_v25 = vpop.f32.mrf.mxu2 }
 0x62b   : > { %1929 = vmatmul.f32.gmra.mxu3 %v1705_v13  ;;  %2281 = vmatmul.f32.gmra.mxu2 %v1949_v38  ;;  %v4900_v13 = vmax.f32 %v4449_v19, 0.0 }
 0x62e   : > { %v1882_v41 = vpop.f32.mrf.mxu3 }
 0x62f   : > { %v1883_v51 = vadd.f32 %v1882_v41, %v4384_v11  ;;  %v4904_v41 = vmax.f32 %v4419_v21, 0.0  ;;  %v4908_v21 = vmax.f32 %v4389_v54, 0.0 }
 0x630   : > { %v1707_v18 = vpop.f32.mrf.mxu1 }
 0x631   : > { %v1950_v44 = vmax.f32 %v1883_v51, 0.0  ;;  %v1708_v56 = vadd.f32 %v1707_v18, %v1594_v60  ;;  %v4478_v17 = vpop.f32.mrf.mxu2  ;;  %v4906_v60 = vmax.f32 %v4405_v27, 0.0 }
 0x633   : > { %1932 = vmatmul.f32.gmra.mxu3 %v1708_v56  ;;  %2284 = vmatmul.f32.gmra.mxu2 %v1950_v44 }
 0x636   : > { %v1885_v49 = vpop.f32.mrf.mxu3 }
 0x637   : > { %v1886_v1 = vadd.f32 %v1885_v49, %v4394_v55 }
 0x639   : > { %v1951_v22 = vmax.f32 %v1886_v1, 0.0 }
 0x63b   : > { %2000 = vmatpush.msrb.mxu0 %v1951_v22  ;;  %2287 = vmatmul.f32.gmra.mxu2 %v1951_v22 }
 0x63d   : > { %2001 = vmatpush.msrb.mxu0 %v1950_v44  ;;  %v4909_v44 = vmax.f32 %v4381_v42, 0.0 }
 0x63e   : > { %v1888_v53 = vpop.f32.mrf.mxu3 }
 0x63f   : > { %v4473_v9 = vadd.f32 %v1888_v53, %v4402_v0  ;;  %2002 = vmatpush.msrb.mxu0 %v1949_v38  ;;  %v4901_v38 = vmax.f32 %v4443_v46, 0.0 }
 0x641   : > { %v1952_v11 = vmax.f32 %v4473_v9, 0.0  ;;  %2003 = vmatpush.msrb.mxu0 %v1948_v8  ;;  %v1982_v9 = vld [vmem:[#allocation7 + $0x370] sm:$0xff] }
 0x643   : > { %2004 = vmatpush.msrb.mxu0 %v1947_v35  ;;  %2290 = vmatmul.f32.gmra.mxu2 %v1952_v11  ;;  %v4902_v35 = vmax.f32 %v4435_v5, 0.0  ;;  %v4905_v5 = vmax.f32 %v4411_v59, 0.0 }
 0x645   : > { %2005 = vmatpush.msrb.mxu0 %v1946_v34  ;;  %v4903_v34 = vmax.f32 %v4427_v12, 0.0  ;;  %v4907_v12 = vmax.f32 %v4397_v52, 0.0 }
 0x646   : > { %v1891_v1 = vpop.f32.mrf.mxu3 }
 0x647   : > { %v4481_v55 = vadd.f32 %v1891_v1, %v4413_v20  ;;  %2006 = vmatpush.msrb.mxu0 %v4900_v13  ;;  %v4494_v20 = vpop.f32.mrf.mxu2 }
 0x649   : > { %v1953_v0 = vmax.f32 %v4481_v55, 0.0  ;;  %2007 = vmatpush.msrb.mxu0 %v4901_v38  ;;  %v1979_v55 = vld [vmem:[#allocation7 + $0x358] sm:$0xff] }
 0x64b   : > { %2008 = vmatpush.msrb.mxu0 %v4902_v35  ;;  %2293 = vmatmul.f32.gmra.mxu2 %v1953_v0 }
 0x64d   : > { %2009 = vmatpush.msrb.mxu0 %v4903_v34 }
 0x64e   : > { %v1894_v8 = vpop.f32.mrf.mxu3 }
 0x64f   : > { %v4497_v19 = vadd.f32 %v1894_v8, %v4422_v36  ;;  %2010 = vmatpush.msrb.mxu0 %v4904_v41  ;;  %v1814_v18 = vpop.f32.mrf.mxu2 }
 0x651   : > { %v1954_v46 = vmax.f32 %v4497_v19, 0.0  ;;  %2011 = vmatpush.msrb.mxu0 %v4905_v5  ;;  %v2913_v19 = vld [vmem:[%s3253_s8 + $0xa8] sm:$0xff] }
 0x653   : > { %2012 = vmatpush.msrb.mxu0 %v4906_v60  ;;  %2296 = vmatmul.f32.gmra.mxu2 %v1954_v46 }
 0x655   : > { %2013 = vmatpush.msrb.mxu0 %v4907_v12 }
 0x656   : > { %v1897_v51 = vpop.f32.mrf.mxu3 }
 0x657   : > { %v4511_v36 = vadd.f32 %v1897_v51, %v4432_v61  ;;  %2014 = vmatpush.msrb.mxu0 %v4908_v21  ;;  %v1817_v54 = vpop.f32.mrf.mxu2 }
 0x659   : > { %v1955_v59 = vmax.f32 %v4511_v36, 0.0  ;;  %2015 = vmatpush.msrb.mxu0 %v4909_v44  ;;  %v1974_v36 = vld [vmem:[#allocation7 + $0x330] sm:$0xff] }
 0x65a   : > { %2016 = vmatmul.f32.vlgmr.msrb.gmra.mxu0 %v4100_v31 }
 0x65b   : > { %2299 = vmatmul.f32.gmra.mxu2 %v1955_v59 }
 0x65e   : > { %v1900_v52 = vpop.f32.mrf.mxu3 }
 0x65f   : > { %v4522_v27 = vadd.f32 %v1900_v52, %v4440_v3  ;;  %v1820_v3 = vpop.f32.mrf.mxu2 }
 0x661   : > { %v1956_v61 = vmax.f32 %v4522_v27, 0.0  ;;  %v2914_v27 = vld [vmem:[%s3253_s8 + $0xb8] sm:$0xff] }
 0x662   : > { %2019 = vmatmul.f32.gmra.mxu0 %v4110_v32 }
 0x663   : > { %2302 = vmatmul.f32.gmra.mxu2 %v1956_v61 }
 0x666   : > { %v1903_v56 = vpop.f32.mrf.mxu3 }
 0x667   : > { %v4529_v42 = vadd.f32 %v1903_v56, %v4451_v15  ;;  %v4542_v15 = vpop.f32.mrf.mxu2 }
 0x669   : > { %v1957_v31 = vmax.f32 %v4529_v42, 0.0 }
 0x66a   : > { %2022 = vmatmul.f32.gmra.mxu0 %v4122_v26 }
 0x66b   : > { %2305 = vmatmul.f32.gmra.mxu2 %v1957_v31 }
 0x66e   : > { %v1906_v49 = vpop.f32.mrf.mxu3 }
 0x66f   : > { %v4536_v22 = vadd.f32 %v1906_v49, %v4457_v63  ;;  %v4546_v38 = vpop.f32.mrf.mxu2 }
 0x671   : > { %v1958_v32 = vmax.f32 %v4536_v22, 0.0  ;;  %v1968_v22 = vld [vmem:[#allocation7 + $0x300] sm:$0xff] }
 0x672   : > { %2025 = vmatmul.f32.gmra.mxu0 %v4134_v6 }
 0x673   : > { %2308 = vmatmul.f32.gmra.mxu2 %v1958_v32 }
 0x676   : > { %v1909_v53 = vpop.f32.mrf.mxu3 }
 0x677   : > { %v1910_v26 = vadd.f32 %v1909_v53, %v4460_v57  ;;  %v4551_v8 = vpop.f32.mrf.mxu2 }
 0x679   : > { %v1959_v1 = vmax.f32 %v1910_v26, 0.0 }
 0x67a   : > { %2028 = vmatmul.f32.gmra.mxu0 %v4146_v33 }
 0x67b   : > { %2311 = vmatmul.f32.gmra.mxu2 %v1959_v1 }
 0x67e   : > { %v1912_v13 = vpop.f32.mrf.mxu3 }
 0x67f   : > { %v1913_v63 = vadd.f32 %v1912_v13, %v4463_v14  ;;  %v4556_v14 = vpop.f32.mrf.mxu2  ;;  %v4911_v13 = vld [vmem:[#allocation20_spill] sm:$0xff] }
 0x681   : > { %v1960_v35 = vmax.f32 %v1913_v63, 0.0  ;;  %v2916_v63 = vld [vmem:[%s3253_s8 + $0xd8] sm:$0xff] }
 0x682   : > { %2031 = vmatmul.f32.gmra.mxu0 %v4155_v47 }
 0x683   : > { %2314 = vmatmul.f32.gmra.mxu2 %v1960_v35 }
 0x686   : > { %v1915_v6 = vpop.f32.mrf.mxu3 }
 0x687   : > { %v1916_v34 = vadd.f32 %v1915_v6, %v4467_v2  ;;  %v4560_v2 = vpop.f32.mrf.mxu2  ;;  %v4912_v6 = vld [vmem:[#allocation22_spill] sm:$0xff] }
 0x689   : > { %v1961_v41 = vmax.f32 %v1916_v34, 0.0  ;;  %v2917_v34 = vld [vmem:[%s3253_s8 + $0xe8] sm:$0xff] }
 0x68a   : > { %2034 = vmatmul.f32.gmra.mxu0 %v4162_v16 }
 0x68b   : > { %2317 = vmatmul.f32.gmra.mxu2 %v1961_v41 }
 0x68e   : > { %v1918_v33 = vpop.f32.mrf.mxu3 }
 0x68f   : > { %v1919_v57 = vadd.f32 %v1918_v33, %v4470_v25  ;;  %v4564_v25 = vpop.f32.mrf.mxu2  ;;  %v4913_v33 = vld [vmem:[#allocation24_spill] sm:$0xff] }
 0x691   : > { %v1962_v5 = vmax.f32 %v1919_v57, 0.0  ;;  %v2918_v57 = vld [vmem:[%s3253_s8 + $0xf8] sm:$0xff] }
 0x692   : > { %2037 = vmatmul.f32.gmra.mxu0 %v4167_v28 }
 0x693   : > { %2320 = vmatmul.f32.gmra.mxu2 %v1962_v5 }
 0x696   : > { %v1921_v47 = vpop.f32.mrf.mxu3 }
 0x697   : > { %v1922_v60 = vadd.f32 %v1921_v47, %v4478_v17  ;;  %v4567_v56 = vpop.f32.mrf.mxu2  ;;  %v4914_v47 = vld [vmem:[#allocation26_spill] sm:$0xff] }
 0x699   : > { %v1963_v12 = vmax.f32 %v1922_v60, 0.0 }
 0x69a   : > { %2040 = vmatmul.f32.gmra.mxu0 %v4174_v50 }
 0x69b   : > { %2323 = vmatmul.f32.gmra.mxu2 %v1963_v12 }
 0x69e   : > { %v1924_v16 = vpop.f32.mrf.mxu3 }
 0x69f   : > { %v1925_v51 = vadd.f32 %v1924_v16, %v4494_v20  ;;  %v4571_v26 = vpop.f32.mrf.mxu2  ;;  %v2919_v16 = vld [vmem:[%s3253_s8 + $0x108] sm:$0xff] }
 0x6a1   : > { %v1964_v21 = vmax.f32 %v1925_v51, 0.0 }
 0x6a2   : > { %2043 = vmatmul.f32.gmra.mxu0 %v4181_v10 }
 0x6a3   : > { %2326 = vmatmul.f32.gmra.mxu2 %v1964_v21 }
 0x6a6   : > { %v1927_v28 = vpop.f32.mrf.mxu3 }
 0x6a7   : > { %v1928_v44 = vadd.f32 %v1927_v28, %v1814_v18  ;;  %v1973_v18 = vld [vmem:[#allocation7 + $0x328] sm:$0xff] }
 0x6a9   : > { %v1965_v52 = vmax.f32 %v1928_v44, 0.0 }
 0x6aa   : > { %2046 = vmatmul.f32.gmra.mxu0 %v4188_v58  ;;  %v2903_v58 = vld [vmem:[%s3253_s8 + $0x8] sm:$0xff] }
 0x6ab   : > { %2329 = vmatmul.f32.gmra.mxu2 %v1965_v52 }
 0x6ae   : > { %v1930_v17 = vpop.f32.mrf.mxu3 }
 0x6af   : > { %v1931_v50 = vadd.f32 %v1930_v17, %v1817_v54  ;;  %v1970_v54 = vld [vmem:[#allocation7 + $0x310] sm:$0xff] }
 0x6b1   : > { %v1966_v49 = vmax.f32 %v1931_v50, 0.0  ;;  %v4916_v50 = vld [vmem:[#allocation30_spill] sm:$0xff] }
 0x6b2   : > { %2049 = vmatmul.f32.gmra.mxu0 %v4195_v4  ;;  %v2904_v4 = vld [vmem:[%s3253_s8 + $0x18] sm:$0xff] }
 0x6b3   : > { %2332 = vmatmul.f32.gmra.mxu2 %v1966_v49 }
 0x6b6   : > { %v1933_v20 = vpop.f32.mrf.mxu3 }
 0x6b7   : > { %v1934_v53 = vadd.f32 %v1933_v20, %v1820_v3  ;;  %v1969_v3 = vld [vmem:[#allocation7 + $0x308] sm:$0xff] }
 0x6b9   : > { %v1967_v10 = vmax.f32 %v1934_v53, 0.0  ;;  %v2921_v53 = vld [vmem:[%s3253_s8 + $0x128] sm:$0xff] }
 0x6ba   : > { %2052 = vmatmul.f32.gmra.mxu0 %v4200_v62  ;;  %v2905_v62 = vld [vmem:[%s3253_s8 + $0x28] sm:$0xff] }
 0x6bb   : > { %2113 = vmatpush.msrb.mxu1 %v1967_v10  ;;  %2335 = vmatmul.f32.gmra.mxu2 %v1967_v10 }
 0x6bd   : > { %2114 = vmatpush.msrb.mxu1 %v1966_v49 }
 0x6bf   : > { %2115 = vmatpush.msrb.mxu1 %v1965_v52  ;;  %v2920_v52 = vld [vmem:[%s3253_s8 + $0x118] sm:$0xff] }
 0x6c1   : > { %2116 = vmatpush.msrb.mxu1 %v1964_v21  ;;  %v4915_v21 = vld [vmem:[#allocation28_spill] sm:$0xff] }
 0x6c2   : > { %2055 = vmatmul.f32.gmra.mxu0 %v4206_v23  ;;  %v2906_v23 = vld [vmem:[%s3253_s8 + $0x38] sm:$0xff] }
 0x6c3   : > { %2117 = vmatpush.msrb.mxu1 %v1963_v12 }
 0x6c5   : > { %2118 = vmatpush.msrb.mxu1 %v1962_v5 }
 0x6c7   : > { %2119 = vmatpush.msrb.mxu1 %v1961_v41 }
 0x6c9   : > { %2120 = vmatpush.msrb.mxu1 %v1960_v35 }
 0x6ca   : > { %2058 = vmatmul.f32.gmra.mxu0 %v4210_v39  ;;  %v2907_v39 = vld [vmem:[%s3253_s8 + $0x48] sm:$0xff] }
 0x6cb   : > { %2121 = vmatpush.msrb.mxu1 %v1959_v1 }
 0x6cd   : > { %2122 = vmatpush.msrb.mxu1 %v1958_v32  ;;  %v2915_v32 = vld [vmem:[%s3253_s8 + $0xc8] sm:$0xff] }
 0x6cf   : > { %2123 = vmatpush.msrb.mxu1 %v1957_v31  ;;  %v4910_v31 = vld [vmem:[#allocation18_spill] sm:$0xff] }
 0x6d1   : > { %2124 = vmatpush.msrb.mxu1 %v1956_v61  ;;  %v1971_v61 = vld [vmem:[#allocation7 + $0x318] sm:$0xff] }
 0x6d2   : > { %2061 = vmatmul.f32.gmra.mxu0 %v4222_v30  ;;  %v2908_v30 = vld [vmem:[%s3253_s8 + $0x58] sm:$0xff] }
 0x6d3   : > { %2125 = vmatpush.msrb.mxu1 %v1955_v59  ;;  %v1972_v59 = vld [vmem:[#allocation7 + $0x320] sm:$0xff] }
 0x6d5   : > { %2126 = vmatpush.msrb.mxu1 %v1954_v46  ;;  %v1975_v46 = vld [vmem:[#allocation7 + $0x338] sm:$0xff] }
 0x6d7   : > { %2127 = vmatpush.msrb.mxu1 %v1953_v0  ;;  %v1978_v0 = vld [vmem:[#allocation7 + $0x350] sm:$0xff]  ;;  %v2017_v42 = vpop.f32.mrf.mxu0 }
 0x6d9   : > { %2128 = vmatpush.msrb.mxu1 %v1952_v11  ;;  %v1980_v11 = vld [vmem:[#allocation7 + $0x360] sm:$0xff] }
 0x6da   : > { %2129 = vmatmul.f32.vlgmr.msrb.gmra.mxu1 %v2903_v58  ;;  %2064 = vmatmul.f32.gmra.mxu0 %v4235_v7  ;;  %v2909_v7 = vld [vmem:[%s3253_s8 + $0x68] sm:$0xff]  ;;  %v4917_v58 = vld [vmem:[#allocation12_spill] sm:$0xff] }
 0x6df   : > { %v2020_v1 = vpop.f32.mrf.mxu0 }
 0x6e2   : > { %2132 = vmatmul.f32.gmra.mxu1 %v2904_v4  ;;  %2067 = vmatmul.f32.gmra.mxu0 %v4240_v40  ;;  %v2910_v40 = vld [vmem:[%s3253_s8 + $0x78] sm:$0xff] }
 0x6e7   : > { %v2023_v35 = vpop.f32.mrf.mxu0 }
 0x6ea   : > { %2135 = vmatmul.f32.gmra.mxu1 %v2905_v62  ;;  %2070 = vmatmul.f32.gmra.mxu0 %v4245_v24  ;;  %v2911_v24 = vld [vmem:[%s3253_s8 + $0x88] sm:$0xff] }
 0x6ef   : > { %v2026_v41 = vpop.f32.mrf.mxu0 }
 0x6f2   : > { %2138 = vmatmul.f32.gmra.mxu1 %v2906_v23  ;;  %2073 = vmatmul.f32.gmra.mxu0 %v4250_v29  ;;  %v1983_v29 = vld [vmem:[#allocation7 + $0x378] sm:$0xff]  ;;  %v4918_v23 = vld [vmem:[#allocation13_spill] sm:$0xff] }
 0x6f3   : > { %2339 = vmatpush.msrb.mxu3 %v1983_v29 }
 0x6f5   : > { %2340 = vmatpush.msrb.mxu3 %v1982_v9 }
 0x6f7   : > { %v2029_v5 = vpop.f32.mrf.mxu0 }
 0x6fa   : > { %2141 = vmatmul.f32.gmra.mxu1 %v2907_v39  ;;  %2076 = vmatmul.f32.gmra.mxu0 %v4255_v37  ;;  %v1981_v37 = vld [vmem:[#allocation7 + $0x368] sm:$0xff] }
 0x6fb   : > { %2341 = vmatpush.msrb.mxu3 %v1981_v37  ;;  %v4920_v37 = vld [vmem:[#allocation15_spill] sm:$0xff] }
 0x6fd   : > { %2342 = vmatpush.msrb.mxu3 %v1980_v11 }
 0x6ff   : > { %2343 = vmatpush.msrb.mxu3 %v1979_v55  ;;  %v2032_v51 = vpop.f32.mrf.mxu0 }
 0x701   : > { %2344 = vmatpush.msrb.mxu3 %v1978_v0  ;;  %v4921_v0 = vld [vmem:[#allocation16_spill] sm:$0xff] }
 0x702   : > { %2144 = vmatmul.f32.gmra.mxu1 %v2908_v30  ;;  %2079 = vmatmul.f32.gmra.mxu0 %v4260_v43  ;;  %v2912_v43 = vld [vmem:[%s3253_s8 + $0x98] sm:$0xff] }
 0x707   : > { %v2035_v17 = vpop.f32.mrf.mxu0 }
 0x70a   : > { %2147 = vmatmul.f32.gmra.mxu1 %v2909_v7  ;;  %2082 = vmatmul.f32.gmra.mxu0 %v4265_v45  ;;  %v1977_v45 = vld [vmem:[#allocation7 + $0x348] sm:$0xff] }
 0x70b   : > { %2345 = vmatpush.msrb.mxu3 %v1977_v45 }
 0x70f   : > { %v2038_v10 = vpop.f32.mrf.mxu0 }
 0x712   : > { %2150 = vmatmul.f32.gmra.mxu1 %v2910_v40  ;;  %2085 = vmatmul.f32.gmra.mxu0 %v4270_v48  ;;  %v1976_v48 = vld [vmem:[#allocation7 + $0x340] sm:$0xff]  ;;  %v4919_v40 = vld [vmem:[#allocation14_spill] sm:$0xff] }
 0x713   : > { %2346 = vmatpush.msrb.mxu3 %v1976_v48 }
 0x715   : > { %2347 = vmatpush.msrb.mxu3 %v1975_v46  ;;  %v4922_v46 = vld [vmem:[#allocation17_spill] sm:$0xff] }
 0x717   : > { %2348 = vmatpush.msrb.mxu3 %v1974_v36  ;;  %v2041_v39 = vpop.f32.mrf.mxu0 }
 0x719   : > { %2349 = vmatpush.msrb.mxu3 %v1973_v18 }
 0x71a   : > { %2153 = vmatmul.f32.gmra.mxu1 %v2911_v24  ;;  %2088 = vmatmul.f32.gmra.mxu0 %v4910_v31  ;;  %v4924_v31 = vld [vmem:[#allocation21_spill] sm:$0xff] }
 0x71b   : > { %2350 = vmatpush.msrb.mxu3 %v1972_v59 }
 0x71d   : > { %2351 = vmatpush.msrb.mxu3 %v1971_v61 }
 0x71f   : > { %2352 = vmatpush.msrb.mxu3 %v1970_v54  ;;  %v2044_v24 = vpop.f32.mrf.mxu0 }
 0x721   : > { %2353 = vmatpush.msrb.mxu3 %v1969_v3 }
 0x722   : > { %2156 = vmatmul.f32.gmra.mxu1 %v2912_v43  ;;  %2091 = vmatmul.f32.gmra.mxu0 %v4911_v13 }
 0x723   : > { %2354 = vmatpush.msrb.mxu3 %v1968_v22 }
 0x727   : > { %v2047_v11 = vpop.f32.mrf.mxu0 }
 0x72a   : > { %2159 = vmatmul.f32.gmra.mxu1 %v2913_v19  ;;  %2094 = vmatmul.f32.gmra.mxu0 %v4912_v6  ;;  %v4926_v6 = vld [vmem:[#allocation25_spill] sm:$0xff] }
 0x72f   : > { %v2050_v45 = vpop.f32.mrf.mxu0 }
 0x732   : > { %2162 = vmatmul.f32.gmra.mxu1 %v2914_v27  ;;  %2097 = vmatmul.f32.gmra.mxu0 %v4913_v33  ;;  %v4923_v27 = vld [vmem:[#allocation19_spill] sm:$0xff] }
 0x737   : > { %v2053_v36 = vpop.f32.mrf.mxu0 }
 0x73a   : > { %2165 = vmatmul.f32.gmra.mxu1 %v2915_v32  ;;  %2100 = vmatmul.f32.gmra.mxu0 %v4914_v47 }
 0x73f   : > { %v2056_v61 = vpop.f32.mrf.mxu0 }
 0x742   : > { %2168 = vmatmul.f32.gmra.mxu1 %v2916_v63  ;;  %2103 = vmatmul.f32.gmra.mxu0 %v4915_v21  ;;  %v4929_v21 = vld [vmem:[#allocation31_spill] sm:$0xff] }
 0x747   : > { %v2059_v3 = vpop.f32.mrf.mxu0 }
 0x74a   : > { %2171 = vmatmul.f32.gmra.mxu1 %v2917_v34  ;;  %2106 = vmatmul.f32.gmra.mxu0 %v4916_v50 }
 0x74f   : > { %v2062_v13 = vpop.f32.mrf.mxu0 }
 0x752   : > { %2174 = vmatmul.f32.gmra.mxu1 %v2918_v57  ;;  %2109 = vmatmul.f32.gmra.mxu0 %v4917_v58  ;;  %v4927_v57 = vld [vmem:[#allocation27_spill] sm:$0xff] }
 0x757   : > { %v2130_v60 = vpop.f32.mrf.mxu1 }
 0x758   : > { %v2131_v12 = vadd.f32 %v2130_v60, %v2017_v42 }
 0x75a   : > { %2177 = vmatmul.f32.gmra.mxu1 %v2919_v16  ;;  %2355 = vmatmul.f32.vlgmr.msrb.gmra.mxu3 %v2131_v12  ;;  %v4928_v12 = vld [vmem:[#allocation29_spill] sm:$0xff] }
 0x75f   : > { %v2133_v28 = vpop.f32.mrf.mxu1 }
 0x760   : > { %v2134_v44 = vadd.f32 %v2133_v28, %v2020_v1  ;;  %v4925_v1 = vld [vmem:[#allocation23_spill] sm:$0xff] }
 0x762   : > { %2180 = vmatmul.f32.gmra.mxu1 %v2920_v52  ;;  %2358 = vmatmul.f32.gmra.mxu3 %v2134_v44 }
 0x767   : > { %v2136_v49 = vpop.f32.mrf.mxu1 }
 0x768   : > { %v2137_v20 = vadd.f32 %v2136_v49, %v2023_v35 }
 0x76a   : > { %2183 = vmatmul.f32.gmra.mxu1 %v2921_v53  ;;  %2361 = vmatmul.f32.gmra.mxu3 %v2137_v20 }
 0x76f   : > { %v2139_v4 = vpop.f32.mrf.mxu1 }
 0x770   : > { %v2140_v62 = vadd.f32 %v2139_v4, %v2026_v41  ;;  %v2065_v41 = vpop.f32.mrf.mxu0 }
 0x772   : > { %2186 = vmatmul.f32.gmra.mxu1 %v4918_v23  ;;  %2364 = vmatmul.f32.gmra.mxu3 %v2140_v62 }
 0x777   : > { %v2142_v30 = vpop.f32.mrf.mxu1 }
 0x778   : > { %v2143_v7 = vadd.f32 %v2142_v30, %v2029_v5  ;;  %v2068_v60 = vpop.f32.mrf.mxu0 }
 0x77a   : > { %2189 = vmatmul.f32.gmra.mxu1 %v4919_v40  ;;  %2367 = vmatmul.f32.gmra.mxu3 %v2143_v7  ;;  %v4644_v40 = vpop.f32.mrf.mxu2 }
 0x77f   : > { %v2145_v29 = vpop.f32.mrf.mxu1 }
 0x780   : > { %v2146_v9 = vadd.f32 %v2145_v29, %v2032_v51  ;;  %v2071_v28 = vpop.f32.mrf.mxu0 }
 0x782   : > { %2192 = vmatmul.f32.gmra.mxu1 %v4920_v37  ;;  %2370 = vmatmul.f32.gmra.mxu3 %v2146_v9 }
 0x787   : > { %v2148_v43 = vpop.f32.mrf.mxu1 }
 0x788   : > { %v2149_v55 = vadd.f32 %v2148_v43, %v2035_v17  ;;  %v4930_v17 = vld [vmem:[#allocation32_spill] sm:$0xff]  ;;  %v2074_v50 = vpop.f32.mrf.mxu0 }
 0x78a   : > { %2195 = vmatmul.f32.gmra.mxu1 %v4921_v0  ;;  %2373 = vmatmul.f32.gmra.mxu3 %v2149_v55  ;;  %v4648_v55 = vpop.f32.mrf.mxu2 }
 0x78f   : > { %v2151_v48 = vpop.f32.mrf.mxu1 }
 0x790   : > { %v2152_v19 = vadd.f32 %v2151_v48, %v2038_v10  ;;  %v2077_v58 = vpop.f32.mrf.mxu0 }
 0x792   : > { %2198 = vmatmul.f32.gmra.mxu1 %v4922_v46  ;;  %2376 = vmatmul.f32.gmra.mxu3 %v2152_v19  ;;  %v4652_v46 = vpop.f32.mrf.mxu2 }
 0x797   : > { %v2154_v18 = vpop.f32.mrf.mxu1 }
 0x798   : > { %v2155_v59 = vadd.f32 %v2154_v18, %v2041_v39  ;;  %v2080_v30 = vpop.f32.mrf.mxu0 }
 0x79a   : > { %2201 = vmatmul.f32.gmra.mxu1 %v4923_v27  ;;  %2379 = vmatmul.f32.gmra.mxu3 %v2155_v59 }
 0x79f   : > { %v2157_v54 = vpop.f32.mrf.mxu1 }
 0x7a0   : > { %v2158_v42 = vadd.f32 %v2157_v54, %v2044_v24  ;;  %v2083_v9 = vpop.f32.mrf.mxu0 }
 0x7a2   : > { %2204 = vmatmul.f32.gmra.mxu1 %v4924_v31  ;;  %2382 = vmatmul.f32.gmra.mxu3 %v2158_v42 }
 0x7a7   : > { %v2160_v22 = vpop.f32.mrf.mxu1 }
 0x7a8   : > { %v2161_v32 = vadd.f32 %v2160_v22, %v2047_v11 }
 0x7aa   : > { %2207 = vmatmul.f32.gmra.mxu1 %v4925_v1  ;;  %2385 = vmatmul.f32.gmra.mxu3 %v2161_v32 }
 0x7af   : > { %v2163_v63 = vpop.f32.mrf.mxu1 }
 0x7b0   : > { %v2164_v35 = vadd.f32 %v2163_v63, %v2050_v45  ;;  %v2086_v45 = vpop.f32.mrf.mxu0 }
 0x7b2   : > { %2210 = vmatmul.f32.gmra.mxu1 %v4926_v6  ;;  %2388 = vmatmul.f32.gmra.mxu3 %v2164_v35 }
 0x7b7   : > { %v2166_v34 = vpop.f32.mrf.mxu1 }
 0x7b8   : > { %v2167_v33 = vadd.f32 %v2166_v34, %v2053_v36  ;;  %v2089_v59 = vpop.f32.mrf.mxu0 }
 0x7ba   : > { %2213 = vmatmul.f32.gmra.mxu1 %v4927_v57  ;;  %2391 = vmatmul.f32.gmra.mxu3 %v2167_v33 }
 0x7bf   : > { %v2169_v5 = vpop.f32.mrf.mxu1 }
 0x7c0   : > { %v2170_v47 = vadd.f32 %v2169_v5, %v2056_v61  ;;  %v2276_v61 = vpop.f32.mrf.mxu2 }
 0x7c2   : > { %2216 = vmatmul.f32.gmra.mxu1 %v4928_v12  ;;  %2394 = vmatmul.f32.gmra.mxu3 %v2170_v47 }
 0x7c7   : > { %v2172_v16 = vpop.f32.mrf.mxu1 }
 0x7c8   : > { %v2173_v51 = vadd.f32 %v2172_v16, %v2059_v3  ;;  %v2092_v3 = vpop.f32.mrf.mxu0  ;;  %v2279_v32 = vpop.f32.mrf.mxu2 }
 0x7ca   : > { %2219 = vmatmul.f32.gmra.mxu1 %v4929_v21  ;;  %2397 = vmatmul.f32.gmra.mxu3 %v2173_v51 }
 0x7cf   : > { %v2175_v44 = vpop.f32.mrf.mxu1 }
 0x7d0   : > { %v2176_v52 = vadd.f32 %v2175_v44, %v2062_v13  ;;  %v2095_v63 = vpop.f32.mrf.mxu0 }
 0x7d2   : > { %2222 = vmatmul.f32.gmra.mxu1 %v4930_v17  ;;  %2400 = vmatmul.f32.gmra.mxu3 %v2176_v52 }
 0x7d7   : > { %v2178_v49 = vpop.f32.mrf.mxu1 }
 0x7d8   : > { %v2179_v20 = vadd.f32 %v2178_v49, %v2065_v41  ;;  %v2282_v41 = vpop.f32.mrf.mxu2  ;;  %v2098_v57 = vpop.f32.mrf.mxu0 }
 0x7da   : > { %2403 = vmatmul.f32.gmra.mxu3 %v2179_v20 }
 0x7dd   : > { %v4638_v53 = vpop.f32.mrf.mxu3 }
 0x7df   : > { %v2181_v10 = vpop.f32.mrf.mxu1 }
 0x7e0   : > { %v2182_v4 = vadd.f32 %v2181_v10, %v2068_v60  ;;  %v2285_v60 = vpop.f32.mrf.mxu2  ;;  %v2101_v51 = vpop.f32.mrf.mxu0 }
 0x7e2   : > { %2406 = vmatmul.f32.gmra.mxu3 %v2182_v4 }
 0x7e5   : > { %v4640_v62 = vpop.f32.mrf.mxu3 }
 0x7e7   : > { %v2184_v23 = vpop.f32.mrf.mxu1 }
 0x7e8   : > { %v2185_v39 = vadd.f32 %v2184_v23, %v2071_v28  ;;  %v2288_v28 = vpop.f32.mrf.mxu2 }
 0x7ea   : > { %2409 = vmatmul.f32.gmra.mxu3 %v2185_v39 }
 0x7ed   : > { %v4642_v7 = vpop.f32.mrf.mxu3 }
 0x7ef   : > { %v2187_v24 = vpop.f32.mrf.mxu1 }
 0x7f0   : > { %v2188_v29 = vadd.f32 %v2187_v24, %v2074_v50  ;;  %v2104_v50 = vpop.f32.mrf.mxu0  ;;  %v4660_v20 = vpop.f32.mrf.mxu2 }
 0x7f2   : > { %2412 = vmatmul.f32.gmra.mxu3 %v2188_v29 }
 0x7f5   : > { %v4646_v37 = vpop.f32.mrf.mxu3 }
 0x7f7   : > { %v2190_v11 = vpop.f32.mrf.mxu1 }
 0x7f8   : > { %v2191_v43 = vadd.f32 %v2190_v11, %v2077_v58  ;;  %v2107_v4 = vpop.f32.mrf.mxu0  ;;  %v4662_v24 = vpop.f32.mrf.mxu2 }
 0x7fa   : > { %2415 = vmatmul.f32.gmra.mxu3 %v2191_v43 }
 0x7fd   : > { %v4650_v0 = vpop.f32.mrf.mxu3 }
 0x7ff   : > { %v2193_v48 = vpop.f32.mrf.mxu1 }
 0x800   : > { %v2194_v19 = vadd.f32 %v2193_v48, %v2080_v30 }
 0x802   : > { %2418 = vmatmul.f32.gmra.mxu3 %v2194_v19 }
 0x805   : > { %v4654_v36 = vpop.f32.mrf.mxu3 }
 0x807   : > { %v2196_v18 = vpop.f32.mrf.mxu1 }
 0x808   : > { %v2197_v27 = vadd.f32 %v2196_v18, %v2083_v9  ;;  %v2110_v9 = vpop.f32.mrf.mxu0 }
 0x80a   : > { %2421 = vmatmul.f32.gmra.mxu3 %v2197_v27 }
 0x80d   : > { %v4656_v54 = vpop.f32.mrf.mxu3 }
 0x80f   : > { %v2199_v42 = vpop.f32.mrf.mxu1 }
 0x810   : > { %v2200_v31 = vadd.f32 %v2199_v42, %v2086_v45  ;;  %v4664_v45 = vpop.f32.mrf.mxu2 }
 0x812   : > { %2424 = vmatmul.f32.gmra.mxu3 %v2200_v31 }
 0x815   : > { %v4658_v22 = vpop.f32.mrf.mxu3 }
 0x817   : > { %v2202_v1 = vpop.f32.mrf.mxu1 }
 0x818   : > { %v2203_v13 = vadd.f32 %v2202_v1, %v2089_v59 }
 0x81a   : > { %2427 = vmatmul.f32.gmra.mxu3 %v2203_v13  ;;  %v4666_v13 = vpop.f32.mrf.mxu2 }
 0x81d   : > { %v2380_v35 = vpop.f32.mrf.mxu3 }
 0x81f   : > { %v2205_v6 = vpop.f32.mrf.mxu1 }
 0x820   : > { %v2206_v34 = vadd.f32 %v2205_v6, %v2092_v3 }
 0x822   : > { %2430 = vmatmul.f32.gmra.mxu3 %v2206_v34 }
 0x825   : > { %v2383_v33 = vpop.f32.mrf.mxu3 }
 0x827   : > { %v2208_v5 = vpop.f32.mrf.mxu1 }
 0x828   : > { %v2209_v47 = vadd.f32 %v2208_v5, %v2095_v63  ;;  %v2378_v5 = vadd.f32 %v4658_v22, %v4571_v26  ;;  %v2369_v26 = vadd.f32 %v4650_v0, %v4560_v2  ;;  %v2360_v2 = vadd.f32 %v4640_v62, %v4546_v38 }
 0x82a   : > { %2433 = vmatmul.f32.gmra.mxu3 %v2209_v47 }
 0x82d   : > { %v2386_v12 = vpop.f32.mrf.mxu3 }
 0x82e   : > { %v2387_v6 = vadd.f32 %v2386_v12, %v4652_v46 }
 0x82f   : > { %v2211_v16 = vpop.f32.mrf.mxu1 }
 0x830   : > { %v2212_v21 = vadd.f32 %v2211_v16, %v2098_v57 }
 0x832   : > { %2436 = vmatmul.f32.gmra.mxu3 %v2212_v21 }
 0x835   : > { %v2389_v44 = vpop.f32.mrf.mxu3 }
 0x836   : > { %v2390_v3 = vadd.f32 %v2389_v44, %v2276_v61  ;;  %v2462_v61 = vmax.f32 %v2387_v6, 0.0 }
 0x837   : > { %v2214_v52 = vpop.f32.mrf.mxu1 }
 0x838   : > { %v2215_v17 = vadd.f32 %v2214_v52, %v2101_v51  ;;  %v2463_v57 = vmax.f32 %v2390_v3, 0.0  ;;  %v2453_v51 = vmax.f32 %v2360_v2, 0.0  ;;  %v2486_v3 = vld [vmem:[%s3259_s14 + $0x10] sm:$0xff] }
 0x83a   : > { %2439 = vmatmul.f32.gmra.mxu3 %v2215_v17 }
 0x83d   : > { %v2392_v49 = vpop.f32.mrf.mxu3 }
 0x83e   : > { %v2393_v42 = vadd.f32 %v2392_v49, %v2279_v32  ;;  %v2381_v32 = vadd.f32 %v2380_v35, %v4644_v40  ;;  %v2372_v40 = vadd.f32 %v4654_v36, %v4564_v25  ;;  %v2459_v35 = vmax.f32 %v2378_v5, 0.0 }
 0x83f   : > { %v2217_v10 = vpop.f32.mrf.mxu1  ;;  %v2363_v25 = vadd.f32 %v4642_v7, %v4551_v8  ;;  %v2456_v36 = vmax.f32 %v2369_v26, 0.0 }
 0x840   : > { %v2218_v58 = vadd.f32 %v2217_v10, %v2104_v50  ;;  %v2464_v34 = vmax.f32 %v2393_v42, 0.0 }
 0x842   : > { %2442 = vmatmul.f32.gmra.mxu3 %v2218_v58 }
 0x845   : > { %v2395_v23 = vpop.f32.mrf.mxu3 }
 0x846   : > { %v2396_v59 = vadd.f32 %v2395_v23, %v2282_v41  ;;  %v2384_v41 = vadd.f32 %v2383_v33, %v4648_v55  ;;  %v2460_v55 = vmax.f32 %v2381_v32, 0.0  ;;  %v4679_v33 = vpop.f32.mrf.mxu2 }
 0x847   : > { %v2220_v39 = vpop.f32.mrf.mxu1 }
 0x848   : > { %v2221_v30 = vadd.f32 %v2220_v39, %v2107_v4  ;;  %v2465_v1 = vmax.f32 %v2396_v59, 0.0  ;;  %v2461_v47 = vmax.f32 %v2384_v41, 0.0 }
 0x84a   : > { %2445 = vmatmul.f32.gmra.mxu3 %v2221_v30 }
 0x84d   : > { %v2398_v29 = vpop.f32.mrf.mxu3 }
 0x84e   : > { %v2399_v19 = vadd.f32 %v2398_v29, %v2285_v60  ;;  %v2375_v60 = vadd.f32 %v4656_v54, %v4567_v56  ;;  %v2366_v56 = vadd.f32 %v4646_v37, %v4556_v14  ;;  %v2457_v54 = vmax.f32 %v2372_v40, 0.0  ;;  %v4693_v16 = vpop.f32.mrf.mxu2 }
 0x84f   : > { %v2223_v11 = vpop.f32.mrf.mxu1  ;;  %v2357_v14 = vadd.f32 %v4638_v53, %v4542_v15  ;;  %v2454_v37 = vmax.f32 %v2363_v25, 0.0 }
 0x850   : > { %v2224_v43 = vadd.f32 %v2223_v11, %v2110_v9  ;;  %v2466_v31 = vmax.f32 %v2399_v19, 0.0  ;;  %v2458_v22 = vmax.f32 %v2375_v60, 0.0  ;;  %v2455_v0 = vmax.f32 %v2366_v56, 0.0 }
 0x851   : > { %v2452_v7 = vmax.f32 %v2357_v14, 0.0 }
 0x852   : > { %2448 = vmatmul.f32.gmra.mxu3 %v2224_v43 }
 0x855   : > { %v2401_v48 = vpop.f32.mrf.mxu3 }
 0x856   : > { %v2402_v18 = vadd.f32 %v2401_v48, %v2288_v28  ;;  %v2309_v38 = vpop.f32.mrf.mxu2 }
 0x858   : > { %v2467_v27 = vmax.f32 %v2402_v18, 0.0 }
 0x85a   : > { %2488 = vmatpush.msra.mxu0 %v2467_v27  ;;  %2735 = vmatpush.msra.mxu2 %v2467_v27 }
 0x85c   : > { %2489 = vmatpush.msra.mxu0 %v2466_v31  ;;  %2736 = vmatpush.msra.mxu2 %v2466_v31  ;;  %v2484_v31 = vld [vmem:[%s3259_s14] sm:$0xff] }
 0x85d   : > { %v4668_v63 = vpop.f32.mrf.mxu3 }
 0x85e   : > { %2490 = vmatpush.msra.mxu0 %v2465_v1  ;;  %2737 = vmatpush.msra.mxu2 %v2465_v1  ;;  %v2312_v21 = vpop.f32.mrf.mxu2 }
 0x860   : > { %2491 = vmatpush.msra.mxu0 %v2464_v34  ;;  %2738 = vmatpush.msra.mxu2 %v2464_v34 }
 0x862   : > { %2492 = vmatpush.msra.mxu0 %v2463_v57  ;;  %2739 = vmatpush.msra.mxu2 %v2463_v57 }
 0x864   : > { %2493 = vmatpush.msra.mxu0 %v2462_v61  ;;  %2740 = vmatpush.msra.mxu2 %v2462_v61 }
 0x865   : > { %v4675_v46 = vpop.f32.mrf.mxu3 }
 0x866   : > { %2494 = vmatpush.msra.mxu0 %v2461_v47  ;;  %2741 = vmatpush.msra.mxu2 %v2461_v47  ;;  %v2315_v52 = vpop.f32.mrf.mxu2 }
 0x868   : > { %2495 = vmatpush.msra.mxu0 %v2460_v55  ;;  %2742 = vmatpush.msra.mxu2 %v2460_v55 }
 0x86a   : > { %2496 = vmatpush.msra.mxu0 %v2459_v35  ;;  %2743 = vmatpush.msra.mxu2 %v2459_v35 }
 0x86c   : > { %2497 = vmatpush.msra.mxu0 %v2458_v22  ;;  %2744 = vmatpush.msra.mxu2 %v2458_v22 }
 0x86d   : > { %v4687_v12 = vpop.f32.mrf.mxu3 }
 0x86e   : > { %2498 = vmatpush.msra.mxu0 %v2457_v54  ;;  %2745 = vmatpush.msra.mxu2 %v2457_v54  ;;  %v2318_v53 = vpop.f32.mrf.mxu2  ;;  %v2411_v2 = vadd.f32 %v4687_v12, %v4664_v45  ;;  %v2485_v12 = vld [vmem:[%s3259_s14 + $0x8] sm:$0xff] }
 0x870   : > { %2499 = vmatpush.msra.mxu0 %v2456_v36  ;;  %2746 = vmatpush.msra.mxu2 %v2456_v36  ;;  %v2470_v14 = vmax.f32 %v2411_v2, 0.0 }
 0x872   : > { %2500 = vmatpush.msra.mxu0 %v2455_v0  ;;  %2747 = vmatpush.msra.mxu2 %v2455_v0 }
 0x874   : > { %2501 = vmatpush.msra.mxu0 %v2454_v37  ;;  %2748 = vmatpush.msra.mxu2 %v2454_v37 }
 0x875   : > { %v4697_v8 = vpop.f32.mrf.mxu3 }
 0x876   : > { %2502 = vmatpush.msra.mxu0 %v2453_v51  ;;  %2749 = vmatpush.msra.mxu2 %v2453_v51  ;;  %v2321_v49 = vpop.f32.mrf.mxu2  ;;  %v2414_v25 = vadd.f32 %v4697_v8, %v4666_v13  ;;  %v2405_v13 = vadd.f32 %v4668_v63, %v4660_v20  ;;  %v2487_v51 = vld [vmem:[%s3259_s14 + $0x18] sm:$0xff] }
 0x878   : > { %2503 = vmatpush.msra.mxu0 %v2452_v7  ;;  %2750 = vmatpush.msra.mxu2 %v2452_v7  ;;  %v2468_v45 = vmax.f32 %v2405_v13, 0.0 }
 0x879   : > { %2504 = vmatmul.f32.vlgmr.msra.gmra.mxu0 %v2484_v31  ;;  %2507 = vmatmul.f32.vlgmr.msra.gmra.mxu2 %v2486_v3 }
 0x87d   : > { %v2416_v62 = vpop.f32.mrf.mxu3 }
 0x87e   : > { %v2324_v58 = vpop.f32.mrf.mxu2  ;;  %v2417_v56 = vadd.f32 %v2416_v62, %v4679_v33  ;;  %v2408_v33 = vadd.f32 %v4675_v46, %v4662_v24  ;;  %v2534_v24 = vlaneseq }
 0x880   : > { %v2472_v0 = vmax.f32 %v2417_v56, 0.0  ;;  %v2469_v37 = vmax.f32 %v2408_v33, 0.0  ;;  %v2535_v46 = vand.u32 127, %v2534_v24 }
 0x882   : > { %vm2536_vm0 = vcmp.lt.s32.totalorder %v2535_v46, 2 }
 0x885   : > { %v2419_v28 = vpop.f32.mrf.mxu3 }
 0x886   : > { %v2327_v39 = vpop.f32.mrf.mxu2  ;;  %v2420_v26 = vadd.f32 %v2419_v28, %v4693_v16  ;;  %v2471_v16 = vmax.f32 %v2414_v25, 0.0 }
 0x888   : > { %v2473_v36 = vmax.f32 %v2420_v26, 0.0 }
 0x88d   : > { %v2422_v44 = vpop.f32.mrf.mxu3 }
 0x88e   : > { %v2330_v29 = vpop.f32.mrf.mxu2  ;;  %v2423_v40 = vadd.f32 %v2422_v44, %v2309_v38 }
 0x890   : > { %v2474_v54 = vmax.f32 %v2423_v40, 0.0 }
 0x895   : > { %v2425_v15 = vpop.f32.mrf.mxu3 }
 0x896   : > { %v2333_v11 = vpop.f32.mrf.mxu2  ;;  %v2426_v60 = vadd.f32 %v2425_v15, %v2312_v21 }
 0x898   : > { %v2475_v22 = vmax.f32 %v2426_v60, 0.0 }
 0x89d   : > { %v2428_v17 = vpop.f32.mrf.mxu3 }
 0x89e   : > { %v2429_v50 = vadd.f32 %v2428_v17, %v2315_v52  ;;  %v2336_v48 = vpop.f32.mrf.mxu2 }
 0x8a0   : > { %v2476_v35 = vmax.f32 %v2429_v50, 0.0 }
 0x8a5   : > { %v2431_v10 = vpop.f32.mrf.mxu3 }
 0x8a6   : > { %v2432_v61 = vadd.f32 %v2431_v10, %v2318_v53 }
 0x8a8   : > { %v2477_v55 = vmax.f32 %v2432_v61, 0.0 }
 0x8ad   : > { %v2434_v4 = vpop.f32.mrf.mxu3 }
 0x8ae   : > { %v2435_v57 = vadd.f32 %v2434_v4, %v2321_v49 }
 0x8b0   : > { %v2478_v47 = vmax.f32 %v2435_v57, 0.0 }
 0x8b5   : > { %v2437_v23 = vpop.f32.mrf.mxu3 }
 0x8b6   : > { %v2438_v34 = vadd.f32 %v2437_v23, %v2324_v58 }
 0x8b8   : > { %v2479_v5 = vmax.f32 %v2438_v34, 0.0 }
 0x8bd   : > { %v2440_v30 = vpop.f32.mrf.mxu3 }
 0x8be   : > { %v2441_v1 = vadd.f32 %v2440_v30, %v2327_v39 }
 0x8c0   : > { %v2480_v32 = vmax.f32 %v2441_v1, 0.0 }
 0x8c5   : > { %v2443_v9 = vpop.f32.mrf.mxu3 }
 0x8c6   : > { %v2444_v27 = vadd.f32 %v2443_v9, %v2330_v29 }
 0x8c8   : > { %v2481_v41 = vmax.f32 %v2444_v27, 0.0 }
 0x8cd   : > { %v2446_v43 = vpop.f32.mrf.mxu3 }
 0x8ce   : > { %v2447_v18 = vadd.f32 %v2446_v43, %v2333_v11 }
 0x8d0   : > { %v2482_v6 = vmax.f32 %v2447_v18, 0.0 }
 0x8d5   : > { %v2449_v19 = vpop.f32.mrf.mxu3 }
 0x8d6   : > { %v2450_v59 = vadd.f32 %v2449_v19, %v2336_v48 }
 0x8d8   : > { %v2483_v42 = vmax.f32 %v2450_v59, 0.0 }
 0x8da   : > { %2511 = vmatpush.msra.mxu1 %v2483_v42  ;;  %2751 = vmatpush.msra.mxu3 %v2483_v42 }
 0x8dc   : > { %2512 = vmatpush.msra.mxu1 %v2482_v6  ;;  %2752 = vmatpush.msra.mxu3 %v2482_v6 }
 0x8de   : > { %2513 = vmatpush.msra.mxu1 %v2481_v41  ;;  %2753 = vmatpush.msra.mxu3 %v2481_v41 }
 0x8e0   : > { %2514 = vmatpush.msra.mxu1 %v2480_v32  ;;  %2754 = vmatpush.msra.mxu3 %v2480_v32 }
 0x8e2   : > { %2515 = vmatpush.msra.mxu1 %v2479_v5  ;;  %2755 = vmatpush.msra.mxu3 %v2479_v5 }
 0x8e4   : > { %2516 = vmatpush.msra.mxu1 %v2478_v47  ;;  %2756 = vmatpush.msra.mxu3 %v2478_v47 }
 0x8e6   : > { %2517 = vmatpush.msra.mxu1 %v2477_v55  ;;  %2757 = vmatpush.msra.mxu3 %v2477_v55 }
 0x8e8   : > { %2518 = vmatpush.msra.mxu1 %v2476_v35  ;;  %2758 = vmatpush.msra.mxu3 %v2476_v35 }
 0x8ea   : > { %2519 = vmatpush.msra.mxu1 %v2475_v22  ;;  %2759 = vmatpush.msra.mxu3 %v2475_v22 }
 0x8ec   : > { %2520 = vmatpush.msra.mxu1 %v2474_v54  ;;  %2760 = vmatpush.msra.mxu3 %v2474_v54 }
 0x8ee   : > { %2521 = vmatpush.msra.mxu1 %v2473_v36  ;;  %2761 = vmatpush.msra.mxu3 %v2473_v36 }
 0x8f0   : > { %2522 = vmatpush.msra.mxu1 %v2472_v0  ;;  %2762 = vmatpush.msra.mxu3 %v2472_v0 }
 0x8f2   : > { %2523 = vmatpush.msra.mxu1 %v2471_v16  ;;  %2763 = vmatpush.msra.mxu3 %v2471_v16 }
 0x8f4   : > { %2524 = vmatpush.msra.mxu1 %v2470_v14  ;;  %2764 = vmatpush.msra.mxu3 %v2470_v14 }
 0x8f6   : > { %2525 = vmatpush.msra.mxu1 %v2469_v37  ;;  %2765 = vmatpush.msra.mxu3 %v2469_v37  ;;  %v2505_v8 = vpop.f32.mrf.mxu0 }
 0x8f8   : > { %2526 = vmatpush.msra.mxu1 %v2468_v45  ;;  %2766 = vmatpush.msra.mxu3 %v2468_v45 }
 0x8f9   : > { %2527 = vmatmul.f32.vlgmr.msra.gmra.mxu1 %v2485_v12  ;;  %2530 = vmatmul.f32.vlgmr.msra.gmra.mxu3 %v2487_v51 }
 0x8fc   : > { %v2508_v38 = vpop.f32.mrf.mxu2 }
 0x976   : > { %v2528_v7 = vpop.f32.mrf.mxu1 }
 0x977   : > { %v2529_v20 = vadd.f32 %v2528_v7, %v2505_v8 }
 0x979   : > { %v2537_v63 = vsel %vm2536_vm0, %v2529_v20, -1e+30 }
 0x97a   : > { %2539 = vmax.xlane.f32.xlu0 %v2537_v63 }
 0x97c   : > { %v2531_v62 = vpop.f32.mrf.mxu3 }
 0x97d   : > { %v2532_v21 = vadd.f32 %v2531_v62, %v2508_v38 }
 0x97f   : > { %v2538_v28 = vsel %vm2536_vm0, %v2532_v21, -1e+30 }
 0x982   : > { %2541 = vmax.xlane.f32.xlu0 %v2538_v28 }
 0x9ed   : > { %v2540_v44 = vpop.xlane.xlu0 %2539 }
 0x9ee   : > { %v2543_v52 = vsub.f32 %v2537_v63, %v2540_v44 }
 0x9f0   : > { %v2545_v15 = vmul.f32 1.442695, %v2543_v52 }
 0x9f2   : > { %2831 = vpow2.f32 %v2545_v15 }
 0x9f5   : > { %v2542_v53 = vpop.xlane.xlu0 %2541 }
 0x9f6   : > { %v2544_v17 = vsub.f32 %v2538_v28, %v2542_v53 }
 0x9f8   : > { %v2832_v50 = vpop.eup %2831  ;;  %v2547_v49 = vmul.f32 1.442695, %v2544_v17 }
 0x9f9   : > { %2549 = vadd.xlane.f32.xlu1 %v2832_v50 }
 0x9fa   : > { %2833 = vpow2.f32 %v2547_v49 }
 0xa00   : > { %v2834_v10 = vpop.eup %2833 }
 0xa01   : > { %2551 = vadd.xlane.f32.xlu1 %v2834_v10 }
 0xa6c   : > { %v2550_v58 = vpop.xlane.xlu1 %2549 }
 0xa6d   : > { %2835 = vrcp.f32 %v2550_v58  ;;  %v2564_v29 = vand.u32 2147483648, %v2550_v58  ;;  %v2562_v11 = vand.u32 2147483647, %v2550_v58  ;;  %vm2558_vm2 = vweird.f32 %v2550_v58 }
 0xa6f   : > { %v2565_v19 = vor.u32 1.1754944e-38, %v2564_v29  ;;  %vm2563_vm4 = vcmp.eq.f32.partialorder %v2562_v11, 8.507059e+37 }
 0xa73   : > { %v2836_v4 = vpop.eup %2835 }
 0xa74   : > { %v2554_v23 = vmul.f32 %v2836_v4, %v2550_v58  ;;  %v2552_v39 = vpop.xlane.xlu1 %2551  ;;  %vm2559_vm1 = vweird.f32 %v2836_v4 }
 0xa75   : > { %2837 = vrcp.f32 %v2552_v39  ;;  %vm2560_vm3 = vmor %vm2558_vm2, %vm2559_vm1  ;;  %v2579_v3 = vand.u32 2147483648, %v2552_v39  ;;  %v2577_v6 = vand.u32 2147483647, %v2552_v39  ;;  %vm2573_vm6 = vweird.f32 %v2552_v39 }
 0xa76   : > { %v2555_v30 = vsub.f32 1.0, %v2554_v23 }
 0xa77   : > { %v2580_v41 = vor.u32 1.1754944e-38, %v2579_v3  ;;  %vm2578_vm8 = vcmp.eq.f32.partialorder %v2577_v6, 8.507059e+37 }
 0xa78   : > { %v2556_v9 = vmul.f32 %v2836_v4, %v2555_v30 }
 0xa7a   : > { %v2557_v43 = vadd.f32 %v2836_v4, %v2556_v9 }
 0xa7b   : > { %v2838_v48 = vpop.eup %2837 }
 0xa7c   : > { %v2561_v18 = vsel %vm2560_vm3, %v2836_v4, %v2557_v43  ;;  %v2569_v59 = vmul.f32 %v2838_v48, %v2552_v39  ;;  %vm2574_vm5 = vweird.f32 %v2838_v48 }
 0xa7d   : > { %v2566_v27 = vsel %vm2563_vm4, %v2565_v19, %v2561_v18  ;;  %vm2575_vm7 = vmor %vm2573_vm6, %vm2574_vm5 }
 0xa7e   : > { %v2567_v42 = vmul.f32 %v2832_v50, %v2566_v27  ;;  %v2570_v31 = vsub.f32 1.0, %v2569_v59 }
 0xa80   : > { %2583 = vst [vmem:[%s322_s6] sm:$0xff] %v2567_v42  ;;  %v2571_v1 = vmul.f32 %v2838_v48, %v2570_v31 }
 0xa82   : > { %v2572_v34 = vadd.f32 %v2838_v48, %v2571_v1 }
 0xa84   : > { %v2576_v57 = vsel %vm2575_vm7, %v2838_v48, %v2572_v34 }
 0xa85   : > { %v2581_v32 = vsel %vm2578_vm8, %v2580_v41, %v2576_v57 }
 0xa86   : > { %v2582_v61 = vmul.f32 %v2834_v10, %v2581_v32 }
 0xa88   : > { %2584 = vst [vmem:[%s322_s6 + $0x8] sm:$0xff] %v2582_v61 }
 0xa89 PF: > { %p18_p7 = scmp.ge.s32.totalorder %s3137_s19, 4   ;;  %s4931_s15 = smov %s3076_s16 }
 0xa8a   : > { %s4932_s16 = smov %s3080_s17  ;;  %s4933_s17 = smov %s3147_s22 }
 0xa8b   : > { %s4934_s18 = smov %s3137_s19  ;;  %20 = sbr.rel (!%p18_p7) target bundleno = 9 (0x9), region = 104 }
 0xa90   :  { %2607 = vsyncpa [#allocation3], 1 }
 0xa91   :  { %2609 = vsyncpa [#allocation3 + $0x1], 1 }
 0xa92   :  { %2610 = vsyncpa [#allocation5], 1 }
 0xa93   :  { %2612 = vsyncpa [#allocation5 + $0x1], 1 }
 0xa94   :  { %2613 = vsyncpa [#allocation8], 1 }

</bundles_post_ra>
